<compile_context>
chip_gen: v7x
topology: tpu7x:2x2x1
jax: 0.10.0
libtpu: 0.0.40
codegen_flags: <defaults>
</compile_context>

<pallas_src>
import numpy as np
import jax
import jax.numpy as jnp
from jax import lax
from jax.experimental import pallas as pl
from jax.experimental.pallas import tpu as pltpu

EPS = 1e-5


# ----------------------------- in-kernel math ------------------------------ #
def _batch_norm(x, gamma, beta):
    mean = jnp.mean(x, axis=0, keepdims=True)
    var = jnp.mean((x - mean) ** 2, axis=0, keepdims=True)   # biased, like PyTorch BN
    return gamma * (x - mean) * lax.rsqrt(var + EPS) + beta


def _glu_layer(x, w, gamma, beta):
    # Linear bias omitted: it feeds straight into training-mode BatchNorm which
    # subtracts the batch mean, so the bias cancels exactly (no-op).
    y = jnp.dot(x, w, preferred_element_type=jnp.float32)
    y = _batch_norm(y, gamma, beta)
    h = y.shape[-1] // 2
    return y[:, :h] * jax.nn.sigmoid(y[:, h:])               # F.glu


def _feature_transformer(x, layer_params):
    scale = jnp.sqrt(jnp.float32(0.5))
    out = _glu_layer(x, *layer_params[0])
    for p in layer_params[1:]:
        out = (out + _glu_layer(out, *p)) * scale
    return out


def _sparsemax(z):
    """Sparsemax along the last axis; sort-free, fully vectorized."""
    # ge[b, i, j] = (z[b, j] >= z[b, i])
    ge = (z[:, None, :] >= z[:, :, None]).astype(jnp.float32)
    r = jnp.sum(ge, axis=-1)                        # rank: #{j : z_j >= z_i}
    s = jnp.sum(z[:, None, :] * ge, axis=-1)        # sum of z_j over that set
    supp = (1.0 + r * z) > s
    tau = jnp.max(jnp.where(supp, (s - 1.0) / r, -jnp.inf), axis=-1, keepdims=True)
    return jnp.maximum(z - tau, 0.0)


# ------------------------------- the kernel -------------------------------- #
def make_tabnet_kernel(cfg):
    n_steps = cfg["n_steps"]
    nrof_glu = cfg["nrof_glu"]
    n_numeric = cfg["n_numeric"]
    n_emb = cfg["n_emb"]
    nrof_cat = cfg["nrof_cat"]
    split_size = cfg["split_size"]
    dense_size = cfg["dense_size"]
    output_size = cfg["output_size"]
    relax_coef = cfg["relax_coef"]

    total_cat = int(sum(nrof_cat))
    cat_offsets = [int(x) for x in np.cumsum([0] + list(nrof_cat[:-1]))]
    lhs_width = n_numeric + total_cat

    def kernel(*refs):
        it = iter(refs)
        numeric_ref = next(it)
        idx_ref = next(it)
        feat_tbl_ref = next(it)            # [n_numeric+total_cat, input_size]
        fbn_g_ref = next(it)
        fbn_b_ref = next(it)
        common_refs = [tuple(next(it) for _ in range(3)) for _ in range(nrof_glu)]
        step_refs = [[tuple(next(it) for _ in range(3)) for _ in range(nrof_glu)]
                     for _ in range(n_steps + 1)]
        att_refs = tuple(next(it) for _ in range(3))
        w_out_ref = next(it)
        b_out_ref = next(it)
        out_ref = next(it)
        mask_ref = next(it)

        B = numeric_ref.shape[0]
        load = lambda group: tuple(r[...] for r in group)

        # ---- DenseFeatureLayer: stack numeric cols + embedding lookups + concat
        # realised as ONE matmul:   [value|one-hot] @ stacked_feature_table
        lane = lax.broadcasted_iota(jnp.int32, (B, lhs_width), 1)
        numeric = numeric_ref[...]
        idx = idx_ref[...]
        lhs = jnp.zeros((B, lhs_width), jnp.float32)
        for j in range(n_numeric):         # static, tiny: place numeric value at lane j
            lhs = lhs + jnp.where(lane == j, numeric[:, j:j + 1], 0.0)
        for j in range(n_emb):             # static, tiny: shifted one-hot per cat column
            off = n_numeric + cat_offsets[j]
            lhs = lhs + (lane == (idx[:, j:j + 1] + off)).astype(jnp.float32)
        x = jnp.dot(lhs, feat_tbl_ref[...], preferred_element_type=jnp.float32)
        x = _batch_norm(x, fbn_g_ref[...], fbn_b_ref[...])

        common_p = [load(g) for g in common_refs]
        step_p = [[load(g) for g in layer] for layer in step_refs]
        w_att, g_att, be_att = load(att_refs)

        # ---- shared + step-0 feature transformers
        x = _feature_transformer(x, common_p)
        x = _feature_transformer(x, step_p[0])
        data = x[:, :split_size]

        prior = jnp.ones((B, output_size), jnp.float32)
        out_acc = jnp.zeros((B, dense_size), jnp.float32)
        for i in range(1, n_steps + 1):
            # AttentiveTransformer (bias dropped: cancels in BN)
            a = jnp.dot(data, w_att, preferred_element_type=jnp.float32)
            a = _batch_norm(a, g_att, be_att)
            m = _sparsemax(a * prior)
            prior = prior * (relax_coef - m)
            mask_ref[i - 1] = m
            # shared + step-i feature transformers
            h = _feature_transformer(m, common_p)
            h = _feature_transformer(h, step_p[i])
            data = h[:, :split_size]
            out_acc = out_acc + jnp.maximum(h[:, split_size:], 0.0)   # ReLU accumulate

        out_ref[...] = (jnp.dot(out_acc, w_out_ref[...],
                                preferred_element_type=jnp.float32) + b_out_ref[...])

    return kernel


# --------------------------------- wrapper --------------------------------- #
def tabnet_forward(cfg, params, numeric, cat_idx):
    B = numeric.shape[0]
    kernel = make_tabnet_kernel(cfg)
    out_shape = (
        jax.ShapeDtypeStruct((B, cfg["nrof_out_classes"]), jnp.float32),
        jax.ShapeDtypeStruct((cfg["n_steps"], B, cfg["output_size"]), jnp.float32),
    )
    inputs = (numeric, cat_idx) + tuple(params)
    out, mask = pl.pallas_call(
        kernel,
        out_shape=out_shape,
        in_specs=[pl.BlockSpec(memory_space=pltpu.MemorySpace.VMEM) for _ in inputs],
        out_specs=(pl.BlockSpec(memory_space=pltpu.MemorySpace.VMEM),
                   pl.BlockSpec(memory_space=pltpu.MemorySpace.VMEM)),
        compiler_params=pltpu.CompilerParams(vmem_limit_bytes=32 * 1024 * 1024),
    )(*inputs)
    return out.reshape(-1), mask   # .flatten() in the torch module


# ------------------------- deterministic parameters ------------------------ #
def init_params(key, cfg):
    n_numeric, n_emb = cfg["n_numeric"], cfg["n_emb"]
    emb_dim, nrof_cat = cfg["emb_dim"], cfg["nrof_cat"]
    input_size, output_size = cfg["input_size"], cfg["output_size"]
    half = output_size // 2
    keys = iter(jax.random.split(key, 64))
    params = []

    def linear_w(k, fan_in, fan_out):
        bound = 1.0 / np.sqrt(fan_in)
        return jax.random.uniform(k, (fan_in, fan_out), jnp.float32, -bound, bound)

    # stacked feature table: numeric identity placement rows + block-placed
    # embedding tables -> one matmul reproduces torch.cat([numeric, emb_0, emb_1, ...])
    total_cat = int(sum(nrof_cat))
    feat_tbl = np.zeros((n_numeric + total_cat, input_size), np.float32)
    for j in range(n_numeric):
        feat_tbl[j, j] = 1.0
    feat_tbl = jnp.asarray(feat_tbl)
    row = n_numeric
    for j in range(n_emb):
        t = jax.random.normal(next(keys), (nrof_cat[j], emb_dim), jnp.float32)
        col = n_numeric + j * emb_dim
        feat_tbl = feat_tbl.at[row:row + nrof_cat[j], col:col + emb_dim].set(t)
        row += nrof_cat[j]
    params.append(feat_tbl)

    # feature BN affine (PyTorch defaults: gamma=1, beta=0)
    params += [jnp.ones((1, input_size), jnp.float32),
               jnp.zeros((1, input_size), jnp.float32)]

    def glu_params(k, fan_in):
        # (weight, bn_gamma, bn_beta) — linear bias omitted (cancels in BN)
        return [linear_w(k, fan_in, output_size),
                jnp.ones((1, output_size), jnp.float32),
                jnp.zeros((1, output_size), jnp.float32)]

    # shared ("common") feature transformer
    for fi in [input_size] + [half] * (cfg["nrof_glu"] - 1):
        params += glu_params(next(keys), fi)

    # per-step feature transformers (n_steps + 1 of them)
    for _ in range(cfg["n_steps"] + 1):
        for _ in range(cfg["nrof_glu"]):
            params += glu_params(next(keys), half)

    # attentive transformer (Linear(split_size, input_size) + BN; bias omitted)
    params += [linear_w(next(keys), cfg["split_size"], input_size),
               jnp.ones((1, input_size), jnp.float32),
               jnp.zeros((1, input_size), jnp.float32)]

    # output dense layer (bias kept — no BN after it)
    kw, kb = jax.random.split(next(keys))
    bound = 1.0 / np.sqrt(cfg["dense_size"])
    params += [jax.random.uniform(kw, (cfg["dense_size"], cfg["nrof_out_classes"]),
                                  jnp.float32, -bound, bound),
               jax.random.uniform(kb, (1, cfg["nrof_out_classes"]),
                                  jnp.float32, -bound, bound)]
    return params


# ----------------------------------- main ----------------------------------- #
if __name__ == "__main__":
    n_numeric, n_emb, emb_dim = 2, 2, 7
    nrof_cat = [10, 12]
    n_steps, nrof_glu, nrof_out_classes = 3, 2, 3
    slice_ratio, output_size_ratio = 0.5, 1.0

    input_size = n_numeric + n_emb * emb_dim                      # 16
    output_size = int(input_size * output_size_ratio // 2 * 2)    # 16 (== input_size,
    #  required by the torch forward: mask * prior broadcast only works then)
    split_size = int(output_size // 2 * slice_ratio)              # 4
    dense_size = output_size // 2 - split_size                    # 4

    cfg = dict(n_numeric=n_numeric, n_emb=n_emb, emb_dim=emb_dim, nrof_cat=nrof_cat,
               n_steps=n_steps, nrof_glu=nrof_glu, nrof_out_classes=nrof_out_classes,
               input_size=input_size, output_size=output_size,
               split_size=split_size, dense_size=dense_size, relax_coef=1.0)

    key = jax.random.PRNGKey(0)
    kp, kn, k0, k1 = jax.random.split(key, 4)
    params = init_params(kp, cfg)

    B = 8
    numeric = jax.random.normal(kn, (B, n_numeric), jnp.float32)
    idx0 = jax.random.randint(k0, (B, 1), 0, nrof_cat[0], jnp.int32)
    idx1 = jax.random.randint(k1, (B, 1), 0, nrof_cat[1], jnp.int32)
    cat_idx = jnp.concatenate([idx0, idx1], axis=1)

    # TODO(synk): running_mean/running_var updates of BatchNorm1d (a training-time
    # side effect that does not affect the returned values) are not reproduced.
    out, mask = tabnet_forward(cfg, params, numeric, cat_idx)
    jax.block_until_ready((out, mask))
    assert out.shape == (B * nrof_out_classes,)
    assert mask.shape == (n_steps, B, output_size)
    print("KERNEL_OK")
</pallas_src>

<mosaic_0001>
module attributes {stable_mosaic.version = 11 : i64} {
  func.func @kernel(%arg0: memref<8x2xf32, #tpu.memory_space<vmem>>, %arg1: memref<8x2xi32, #tpu.memory_space<vmem>>, %arg2: memref<24x16xf32, #tpu.memory_space<vmem>>, %arg3: memref<1x16xf32, #tpu.memory_space<vmem>>, %arg4: memref<1x16xf32, #tpu.memory_space<vmem>>, %arg5: memref<16x16xf32, #tpu.memory_space<vmem>>, %arg6: memref<1x16xf32, #tpu.memory_space<vmem>>, %arg7: memref<1x16xf32, #tpu.memory_space<vmem>>, %arg8: memref<8x16xf32, #tpu.memory_space<vmem>>, %arg9: memref<1x16xf32, #tpu.memory_space<vmem>>, %arg10: memref<1x16xf32, #tpu.memory_space<vmem>>, %arg11: memref<8x16xf32, #tpu.memory_space<vmem>>, %arg12: memref<1x16xf32, #tpu.memory_space<vmem>>, %arg13: memref<1x16xf32, #tpu.memory_space<vmem>>, %arg14: memref<8x16xf32, #tpu.memory_space<vmem>>, %arg15: memref<1x16xf32, #tpu.memory_space<vmem>>, %arg16: memref<1x16xf32, #tpu.memory_space<vmem>>, %arg17: memref<8x16xf32, #tpu.memory_space<vmem>>, %arg18: memref<1x16xf32, #tpu.memory_space<vmem>>, %arg19: memref<1x16xf32, #tpu.memory_space<vmem>>, %arg20: memref<8x16xf32, #tpu.memory_space<vmem>>, %arg21: memref<1x16xf32, #tpu.memory_space<vmem>>, %arg22: memref<1x16xf32, #tpu.memory_space<vmem>>, %arg23: memref<8x16xf32, #tpu.memory_space<vmem>>, %arg24: memref<1x16xf32, #tpu.memory_space<vmem>>, %arg25: memref<1x16xf32, #tpu.memory_space<vmem>>, %arg26: memref<8x16xf32, #tpu.memory_space<vmem>>, %arg27: memref<1x16xf32, #tpu.memory_space<vmem>>, %arg28: memref<1x16xf32, #tpu.memory_space<vmem>>, %arg29: memref<8x16xf32, #tpu.memory_space<vmem>>, %arg30: memref<1x16xf32, #tpu.memory_space<vmem>>, %arg31: memref<1x16xf32, #tpu.memory_space<vmem>>, %arg32: memref<8x16xf32, #tpu.memory_space<vmem>>, %arg33: memref<1x16xf32, #tpu.memory_space<vmem>>, %arg34: memref<1x16xf32, #tpu.memory_space<vmem>>, %arg35: memref<4x16xf32, #tpu.memory_space<vmem>>, %arg36: memref<1x16xf32, #tpu.memory_space<vmem>>, %arg37: memref<1x16xf32, #tpu.memory_space<vmem>>, %arg38: memref<4x3xf32, #tpu.memory_space<vmem>>, %arg39: memref<1x3xf32, #tpu.memory_space<vmem>>, %arg40: memref<8x3xf32, #tpu.memory_space<vmem>>, %arg41: memref<3x8x16xf32, #tpu.memory_space<vmem>>) attributes {dimension_semantics = [], scalar_prefetch = 0 : i64, scratch_operands = 0 : i64, tpu.core_type = #tpu.core_type<tc>} {
    %0 = tpu.iota {dimensions = array<i32: 1>} : vector<8x24xi32>
    %c0 = arith.constant 0 : index
    %c0_0 = arith.constant 0 : index
    %1 = vector.load %arg0[%c0, %c0_0] : memref<8x2xf32, #tpu.memory_space<vmem>>, vector<8x2xf32>
    %c0_1 = arith.constant 0 : index
    %c0_2 = arith.constant 0 : index
    %2 = vector.load %arg1[%c0_1, %c0_2] : memref<8x2xi32, #tpu.memory_space<vmem>>, vector<8x2xi32>
    %cst = arith.constant 0.000000e+00 : f32
    %3 = vector.broadcast %cst : f32 to vector<8x24xf32>
    %c0_i32 = arith.constant 0 : i32
    %4 = vector.broadcast %c0_i32 : i32 to vector<8x24xi32>
    %5 = arith.cmpi eq, %0, %4 : vector<8x24xi32>
    %6 = vector.extract_strided_slice %1 {offsets = [0, 0], sizes = [8, 1], strides = [1, 1]} : vector<8x2xf32> to vector<8x1xf32>
    %cst_3 = arith.constant 0.000000e+00 : f32
    %7 = vector.shape_cast %6 : vector<8x1xf32> to vector<8x1xf32>
    %8 = vector.broadcast %7 : vector<8x1xf32> to vector<8x24xf32>
    %9 = vector.broadcast %cst_3 : f32 to vector<8x24xf32>
    %10 = arith.select %5, %8, %9 : vector<8x24xi1>, vector<8x24xf32>
    %11 = arith.addf %3, %10 : vector<8x24xf32>
    %c1_i32 = arith.constant 1 : i32
    %12 = vector.broadcast %c1_i32 : i32 to vector<8x24xi32>
    %13 = arith.cmpi eq, %0, %12 : vector<8x24xi32>
    %14 = vector.extract_strided_slice %1 {offsets = [0, 1], sizes = [8, 1], strides = [1, 1]} : vector<8x2xf32> to vector<8x1xf32>
    %cst_4 = arith.constant 0.000000e+00 : f32
    %15 = vector.shape_cast %14 : vector<8x1xf32> to vector<8x1xf32>
    %16 = vector.broadcast %15 : vector<8x1xf32> to vector<8x24xf32>
    %17 = vector.broadcast %cst_4 : f32 to vector<8x24xf32>
    %18 = arith.select %13, %16, %17 : vector<8x24xi1>, vector<8x24xf32>
    %19 = arith.addf %11, %18 : vector<8x24xf32>
    %20 = vector.extract_strided_slice %2 {offsets = [0, 0], sizes = [8, 1], strides = [1, 1]} : vector<8x2xi32> to vector<8x1xi32>
    %c2_i32 = arith.constant 2 : i32
    %21 = vector.broadcast %c2_i32 : i32 to vector<8x1xi32>
    %22 = arith.addi %20, %21 : vector<8x1xi32>
    %23 = vector.broadcast %22 : vector<8x1xi32> to vector<8x24xi32>
    %24 = arith.cmpi eq, %0, %23 : vector<8x24xi32>
    %25 = arith.extui %24 : vector<8x24xi1> to vector<8x24xi32>
    %26 = arith.sitofp %25 : vector<8x24xi32> to vector<8x24xf32>
    %27 = arith.addf %19, %26 : vector<8x24xf32>
    %28 = vector.extract_strided_slice %2 {offsets = [0, 1], sizes = [8, 1], strides = [1, 1]} : vector<8x2xi32> to vector<8x1xi32>
    %c12_i32 = arith.constant 12 : i32
    %29 = vector.broadcast %c12_i32 : i32 to vector<8x1xi32>
    %30 = arith.addi %28, %29 : vector<8x1xi32>
    %31 = vector.broadcast %30 : vector<8x1xi32> to vector<8x24xi32>
    %32 = arith.cmpi eq, %0, %31 : vector<8x24xi32>
    %33 = arith.extui %32 : vector<8x24xi1> to vector<8x24xi32>
    %34 = arith.sitofp %33 : vector<8x24xi32> to vector<8x24xf32>
    %35 = arith.addf %27, %34 : vector<8x24xf32>
    %c0_5 = arith.constant 0 : index
    %c0_6 = arith.constant 0 : index
    %36 = vector.load %arg2[%c0_5, %c0_6] : memref<24x16xf32, #tpu.memory_space<vmem>>, vector<24x16xf32>
    %cst_7 = arith.constant dense<0.000000e+00> : vector<8x16xf32>
    %37 = tpu.matmul %35, %36, %cst_7 {dimension_numbers = #tpu.dot_dimension_numbers<[1], [0], [0], [1], [0, 0, 1, 1], [], []>} : vector<8x24xf32>, vector<24x16xf32>, vector<8x16xf32> -> vector<8x16xf32>
    %c0_8 = arith.constant 0 : index
    %c0_9 = arith.constant 0 : index
    %38 = vector.load %arg3[%c0_8, %c0_9] : memref<1x16xf32, #tpu.memory_space<vmem>>, vector<1x16xf32>
    %c0_10 = arith.constant 0 : index
    %c0_11 = arith.constant 0 : index
    %39 = vector.load %arg4[%c0_10, %c0_11] : memref<1x16xf32, #tpu.memory_space<vmem>>, vector<1x16xf32>
    %cst_12 = arith.constant dense<0.000000e+00> : vector<16xf32>
    %40 = vector.multi_reduction <add>, %37, %cst_12 [0] : vector<8x16xf32> to vector<16xf32>
    %41 = vector.shape_cast %40 : vector<16xf32> to vector<1x16xf32>
    %cst_13 = arith.constant 8.000000e+00 : f32
    %42 = vector.broadcast %cst_13 : f32 to vector<1x16xf32>
    %43 = arith.divf %41, %42 : vector<1x16xf32>
    %44 = vector.broadcast %43 : vector<1x16xf32> to vector<8x16xf32>
    %45 = arith.subf %37, %44 : vector<8x16xf32>
    %46 = arith.mulf %45, %45 : vector<8x16xf32>
    %cst_14 = arith.constant dense<0.000000e+00> : vector<16xf32>
    %47 = vector.multi_reduction <add>, %46, %cst_14 [0] : vector<8x16xf32> to vector<16xf32>
    %48 = vector.shape_cast %47 : vector<16xf32> to vector<1x16xf32>
    %cst_15 = arith.constant 8.000000e+00 : f32
    %49 = vector.broadcast %cst_15 : f32 to vector<1x16xf32>
    %50 = arith.divf %48, %49 : vector<1x16xf32>
    %51 = vector.broadcast %43 : vector<1x16xf32> to vector<8x16xf32>
    %52 = arith.subf %37, %51 : vector<8x16xf32>
    %53 = vector.broadcast %38 : vector<1x16xf32> to vector<8x16xf32>
    %54 = arith.mulf %53, %52 : vector<8x16xf32>
    %cst_16 = arith.constant 9.99999974E-6 : f32
    %55 = vector.broadcast %cst_16 : f32 to vector<1x16xf32>
    %56 = arith.addf %50, %55 : vector<1x16xf32>
    %57 = math.rsqrt %56 : vector<1x16xf32>
    %58 = vector.broadcast %57 : vector<1x16xf32> to vector<8x16xf32>
    %59 = arith.mulf %54, %58 : vector<8x16xf32>
    %60 = vector.broadcast %39 : vector<1x16xf32> to vector<8x16xf32>
    %61 = arith.addf %59, %60 : vector<8x16xf32>
    %c0_17 = arith.constant 0 : index
    %c0_18 = arith.constant 0 : index
    %62 = vector.load %arg5[%c0_17, %c0_18] : memref<16x16xf32, #tpu.memory_space<vmem>>, vector<16x16xf32>
    %c0_19 = arith.constant 0 : index
    %c0_20 = arith.constant 0 : index
    %63 = vector.load %arg6[%c0_19, %c0_20] : memref<1x16xf32, #tpu.memory_space<vmem>>, vector<1x16xf32>
    %c0_21 = arith.constant 0 : index
    %c0_22 = arith.constant 0 : index
    %64 = vector.load %arg7[%c0_21, %c0_22] : memref<1x16xf32, #tpu.memory_space<vmem>>, vector<1x16xf32>
    %c0_23 = arith.constant 0 : index
    %c0_24 = arith.constant 0 : index
    %65 = vector.load %arg8[%c0_23, %c0_24] : memref<8x16xf32, #tpu.memory_space<vmem>>, vector<8x16xf32>
    %c0_25 = arith.constant 0 : index
    %c0_26 = arith.constant 0 : index
    %66 = vector.load %arg9[%c0_25, %c0_26] : memref<1x16xf32, #tpu.memory_space<vmem>>, vector<1x16xf32>
    %c0_27 = arith.constant 0 : index
    %c0_28 = arith.constant 0 : index
    %67 = vector.load %arg10[%c0_27, %c0_28] : memref<1x16xf32, #tpu.memory_space<vmem>>, vector<1x16xf32>
    %c0_29 = arith.constant 0 : index
    %c0_30 = arith.constant 0 : index
    %68 = vector.load %arg11[%c0_29, %c0_30] : memref<8x16xf32, #tpu.memory_space<vmem>>, vector<8x16xf32>
    %c0_31 = arith.constant 0 : index
    %c0_32 = arith.constant 0 : index
    %69 = vector.load %arg12[%c0_31, %c0_32] : memref<1x16xf32, #tpu.memory_space<vmem>>, vector<1x16xf32>
    %c0_33 = arith.constant 0 : index
    %c0_34 = arith.constant 0 : index
    %70 = vector.load %arg13[%c0_33, %c0_34] : memref<1x16xf32, #tpu.memory_space<vmem>>, vector<1x16xf32>
    %c0_35 = arith.constant 0 : index
    %c0_36 = arith.constant 0 : index
    %71 = vector.load %arg14[%c0_35, %c0_36] : memref<8x16xf32, #tpu.memory_space<vmem>>, vector<8x16xf32>
    %c0_37 = arith.constant 0 : index
    %c0_38 = arith.constant 0 : index
    %72 = vector.load %arg15[%c0_37, %c0_38] : memref<1x16xf32, #tpu.memory_space<vmem>>, vector<1x16xf32>
    %c0_39 = arith.constant 0 : index
    %c0_40 = arith.constant 0 : index
    %73 = vector.load %arg16[%c0_39, %c0_40] : memref<1x16xf32, #tpu.memory_space<vmem>>, vector<1x16xf32>
    %c0_41 = arith.constant 0 : index
    %c0_42 = arith.constant 0 : index
    %74 = vector.load %arg17[%c0_41, %c0_42] : memref<8x16xf32, #tpu.memory_space<vmem>>, vector<8x16xf32>
    %c0_43 = arith.constant 0 : index
    %c0_44 = arith.constant 0 : index
    %75 = vector.load %arg18[%c0_43, %c0_44] : memref<1x16xf32, #tpu.memory_space<vmem>>, vector<1x16xf32>
    %c0_45 = arith.constant 0 : index
    %c0_46 = arith.constant 0 : index
    %76 = vector.load %arg19[%c0_45, %c0_46] : memref<1x16xf32, #tpu.memory_space<vmem>>, vector<1x16xf32>
    %c0_47 = arith.constant 0 : index
    %c0_48 = arith.constant 0 : index
    %77 = vector.load %arg20[%c0_47, %c0_48] : memref<8x16xf32, #tpu.memory_space<vmem>>, vector<8x16xf32>
    %c0_49 = arith.constant 0 : index
    %c0_50 = arith.constant 0 : index
    %78 = vector.load %arg21[%c0_49, %c0_50] : memref<1x16xf32, #tpu.memory_space<vmem>>, vector<1x16xf32>
    %c0_51 = arith.constant 0 : index
    %c0_52 = arith.constant 0 : index
    %79 = vector.load %arg22[%c0_51, %c0_52] : memref<1x16xf32, #tpu.memory_space<vmem>>, vector<1x16xf32>
    %c0_53 = arith.constant 0 : index
    %c0_54 = arith.constant 0 : index
    %80 = vector.load %arg23[%c0_53, %c0_54] : memref<8x16xf32, #tpu.memory_space<vmem>>, vector<8x16xf32>
    %c0_55 = arith.constant 0 : index
    %c0_56 = arith.constant 0 : index
    %81 = vector.load %arg24[%c0_55, %c0_56] : memref<1x16xf32, #tpu.memory_space<vmem>>, vector<1x16xf32>
    %c0_57 = arith.constant 0 : index
    %c0_58 = arith.constant 0 : index
    %82 = vector.load %arg25[%c0_57, %c0_58] : memref<1x16xf32, #tpu.memory_space<vmem>>, vector<1x16xf32>
    %c0_59 = arith.constant 0 : index
    %c0_60 = arith.constant 0 : index
    %83 = vector.load %arg26[%c0_59, %c0_60] : memref<8x16xf32, #tpu.memory_space<vmem>>, vector<8x16xf32>
    %c0_61 = arith.constant 0 : index
    %c0_62 = arith.constant 0 : index
    %84 = vector.load %arg27[%c0_61, %c0_62] : memref<1x16xf32, #tpu.memory_space<vmem>>, vector<1x16xf32>
    %c0_63 = arith.constant 0 : index
    %c0_64 = arith.constant 0 : index
    %85 = vector.load %arg28[%c0_63, %c0_64] : memref<1x16xf32, #tpu.memory_space<vmem>>, vector<1x16xf32>
    %c0_65 = arith.constant 0 : index
    %c0_66 = arith.constant 0 : index
    %86 = vector.load %arg29[%c0_65, %c0_66] : memref<8x16xf32, #tpu.memory_space<vmem>>, vector<8x16xf32>
    %c0_67 = arith.constant 0 : index
    %c0_68 = arith.constant 0 : index
    %87 = vector.load %arg30[%c0_67, %c0_68] : memref<1x16xf32, #tpu.memory_space<vmem>>, vector<1x16xf32>
    %c0_69 = arith.constant 0 : index
    %c0_70 = arith.constant 0 : index
    %88 = vector.load %arg31[%c0_69, %c0_70] : memref<1x16xf32, #tpu.memory_space<vmem>>, vector<1x16xf32>
    %c0_71 = arith.constant 0 : index
    %c0_72 = arith.constant 0 : index
    %89 = vector.load %arg32[%c0_71, %c0_72] : memref<8x16xf32, #tpu.memory_space<vmem>>, vector<8x16xf32>
    %c0_73 = arith.constant 0 : index
    %c0_74 = arith.constant 0 : index
    %90 = vector.load %arg33[%c0_73, %c0_74] : memref<1x16xf32, #tpu.memory_space<vmem>>, vector<1x16xf32>
    %c0_75 = arith.constant 0 : index
    %c0_76 = arith.constant 0 : index
    %91 = vector.load %arg34[%c0_75, %c0_76] : memref<1x16xf32, #tpu.memory_space<vmem>>, vector<1x16xf32>
    %c0_77 = arith.constant 0 : index
    %c0_78 = arith.constant 0 : index
    %92 = vector.load %arg35[%c0_77, %c0_78] : memref<4x16xf32, #tpu.memory_space<vmem>>, vector<4x16xf32>
    %c0_79 = arith.constant 0 : index
    %c0_80 = arith.constant 0 : index
    %93 = vector.load %arg36[%c0_79, %c0_80] : memref<1x16xf32, #tpu.memory_space<vmem>>, vector<1x16xf32>
    %c0_81 = arith.constant 0 : index
    %c0_82 = arith.constant 0 : index
    %94 = vector.load %arg37[%c0_81, %c0_82] : memref<1x16xf32, #tpu.memory_space<vmem>>, vector<1x16xf32>
    %cst_83 = arith.constant 5.000000e-01 : f32
    %95 = math.sqrt %cst_83 : f32
    %cst_84 = arith.constant dense<0.000000e+00> : vector<8x16xf32>
    %96 = tpu.matmul %61, %62, %cst_84 {dimension_numbers = #tpu.dot_dimension_numbers<[1], [0], [0], [1], [0, 0, 1, 1], [], []>} : vector<8x16xf32>, vector<16x16xf32>, vector<8x16xf32> -> vector<8x16xf32>
    %cst_85 = arith.constant dense<0.000000e+00> : vector<16xf32>
    %97 = vector.multi_reduction <add>, %96, %cst_85 [0] : vector<8x16xf32> to vector<16xf32>
    %98 = vector.shape_cast %97 : vector<16xf32> to vector<1x16xf32>
    %cst_86 = arith.constant 8.000000e+00 : f32
    %99 = vector.broadcast %cst_86 : f32 to vector<1x16xf32>
    %100 = arith.divf %98, %99 : vector<1x16xf32>
    %101 = vector.broadcast %100 : vector<1x16xf32> to vector<8x16xf32>
    %102 = arith.subf %96, %101 : vector<8x16xf32>
    %103 = arith.mulf %102, %102 : vector<8x16xf32>
    %cst_87 = arith.constant dense<0.000000e+00> : vector<16xf32>
    %104 = vector.multi_reduction <add>, %103, %cst_87 [0] : vector<8x16xf32> to vector<16xf32>
    %105 = vector.shape_cast %104 : vector<16xf32> to vector<1x16xf32>
    %cst_88 = arith.constant 8.000000e+00 : f32
    %106 = vector.broadcast %cst_88 : f32 to vector<1x16xf32>
    %107 = arith.divf %105, %106 : vector<1x16xf32>
    %108 = vector.broadcast %100 : vector<1x16xf32> to vector<8x16xf32>
    %109 = arith.subf %96, %108 : vector<8x16xf32>
    %110 = vector.broadcast %63 : vector<1x16xf32> to vector<8x16xf32>
    %111 = arith.mulf %110, %109 : vector<8x16xf32>
    %cst_89 = arith.constant 9.99999974E-6 : f32
    %112 = vector.broadcast %cst_89 : f32 to vector<1x16xf32>
    %113 = arith.addf %107, %112 : vector<1x16xf32>
    %114 = math.rsqrt %113 : vector<1x16xf32>
    %115 = vector.broadcast %114 : vector<1x16xf32> to vector<8x16xf32>
    %116 = arith.mulf %111, %115 : vector<8x16xf32>
    %117 = vector.broadcast %64 : vector<1x16xf32> to vector<8x16xf32>
    %118 = arith.addf %116, %117 : vector<8x16xf32>
    %119 = vector.extract_strided_slice %118 {offsets = [0, 0], sizes = [8, 8], strides = [1, 1]} : vector<8x16xf32> to vector<8x8xf32>
    %120 = vector.extract_strided_slice %118 {offsets = [0, 8], sizes = [8, 8], strides = [1, 1]} : vector<8x16xf32> to vector<8x8xf32>
    %121 = arith.negf %120 : vector<8x8xf32>
    %122 = math.exp %121 : vector<8x8xf32>
    %cst_90 = arith.constant 1.000000e+00 : f32
    %123 = vector.broadcast %cst_90 : f32 to vector<8x8xf32>
    %124 = arith.addf %123, %122 : vector<8x8xf32>
    %125 = arith.divf %123, %124 : vector<8x8xf32>
    %126 = arith.mulf %119, %125 : vector<8x8xf32>
    %cst_91 = arith.constant dense<0.000000e+00> : vector<8x16xf32>
    %127 = tpu.matmul %126, %65, %cst_91 {dimension_numbers = #tpu.dot_dimension_numbers<[1], [0], [0], [1], [0, 0, 1, 1], [], []>} : vector<8x8xf32>, vector<8x16xf32>, vector<8x16xf32> -> vector<8x16xf32>
    %cst_92 = arith.constant dense<0.000000e+00> : vector<16xf32>
    %128 = vector.multi_reduction <add>, %127, %cst_92 [0] : vector<8x16xf32> to vector<16xf32>
    %129 = vector.shape_cast %128 : vector<16xf32> to vector<1x16xf32>
    %cst_93 = arith.constant 8.000000e+00 : f32
    %130 = vector.broadcast %cst_93 : f32 to vector<1x16xf32>
    %131 = arith.divf %129, %130 : vector<1x16xf32>
    %132 = vector.broadcast %131 : vector<1x16xf32> to vector<8x16xf32>
    %133 = arith.subf %127, %132 : vector<8x16xf32>
    %134 = arith.mulf %133, %133 : vector<8x16xf32>
    %cst_94 = arith.constant dense<0.000000e+00> : vector<16xf32>
    %135 = vector.multi_reduction <add>, %134, %cst_94 [0] : vector<8x16xf32> to vector<16xf32>
    %136 = vector.shape_cast %135 : vector<16xf32> to vector<1x16xf32>
    %cst_95 = arith.constant 8.000000e+00 : f32
    %137 = vector.broadcast %cst_95 : f32 to vector<1x16xf32>
    %138 = arith.divf %136, %137 : vector<1x16xf32>
    %139 = vector.broadcast %131 : vector<1x16xf32> to vector<8x16xf32>
    %140 = arith.subf %127, %139 : vector<8x16xf32>
    %141 = vector.broadcast %66 : vector<1x16xf32> to vector<8x16xf32>
    %142 = arith.mulf %141, %140 : vector<8x16xf32>
    %cst_96 = arith.constant 9.99999974E-6 : f32
    %143 = vector.broadcast %cst_96 : f32 to vector<1x16xf32>
    %144 = arith.addf %138, %143 : vector<1x16xf32>
    %145 = math.rsqrt %144 : vector<1x16xf32>
    %146 = vector.broadcast %145 : vector<1x16xf32> to vector<8x16xf32>
    %147 = arith.mulf %142, %146 : vector<8x16xf32>
    %148 = vector.broadcast %67 : vector<1x16xf32> to vector<8x16xf32>
    %149 = arith.addf %147, %148 : vector<8x16xf32>
    %150 = vector.extract_strided_slice %149 {offsets = [0, 0], sizes = [8, 8], strides = [1, 1]} : vector<8x16xf32> to vector<8x8xf32>
    %151 = vector.extract_strided_slice %149 {offsets = [0, 8], sizes = [8, 8], strides = [1, 1]} : vector<8x16xf32> to vector<8x8xf32>
    %152 = arith.negf %151 : vector<8x8xf32>
    %153 = math.exp %152 : vector<8x8xf32>
    %cst_97 = arith.constant 1.000000e+00 : f32
    %154 = vector.broadcast %cst_97 : f32 to vector<8x8xf32>
    %155 = arith.addf %154, %153 : vector<8x8xf32>
    %156 = arith.divf %154, %155 : vector<8x8xf32>
    %157 = arith.mulf %150, %156 : vector<8x8xf32>
    %158 = arith.addf %126, %157 : vector<8x8xf32>
    %159 = vector.broadcast %95 : f32 to vector<8x8xf32>
    %160 = arith.mulf %158, %159 : vector<8x8xf32>
    %cst_98 = arith.constant 5.000000e-01 : f32
    %161 = math.sqrt %cst_98 : f32
    %cst_99 = arith.constant dense<0.000000e+00> : vector<8x16xf32>
    %162 = tpu.matmul %160, %68, %cst_99 {dimension_numbers = #tpu.dot_dimension_numbers<[1], [0], [0], [1], [0, 0, 1, 1], [], []>} : vector<8x8xf32>, vector<8x16xf32>, vector<8x16xf32> -> vector<8x16xf32>
    %cst_100 = arith.constant dense<0.000000e+00> : vector<16xf32>
    %163 = vector.multi_reduction <add>, %162, %cst_100 [0] : vector<8x16xf32> to vector<16xf32>
    %164 = vector.shape_cast %163 : vector<16xf32> to vector<1x16xf32>
    %cst_101 = arith.constant 8.000000e+00 : f32
    %165 = vector.broadcast %cst_101 : f32 to vector<1x16xf32>
    %166 = arith.divf %164, %165 : vector<1x16xf32>
    %167 = vector.broadcast %166 : vector<1x16xf32> to vector<8x16xf32>
    %168 = arith.subf %162, %167 : vector<8x16xf32>
    %169 = arith.mulf %168, %168 : vector<8x16xf32>
    %cst_102 = arith.constant dense<0.000000e+00> : vector<16xf32>
    %170 = vector.multi_reduction <add>, %169, %cst_102 [0] : vector<8x16xf32> to vector<16xf32>
    %171 = vector.shape_cast %170 : vector<16xf32> to vector<1x16xf32>
    %cst_103 = arith.constant 8.000000e+00 : f32
    %172 = vector.broadcast %cst_103 : f32 to vector<1x16xf32>
    %173 = arith.divf %171, %172 : vector<1x16xf32>
    %174 = vector.broadcast %166 : vector<1x16xf32> to vector<8x16xf32>
    %175 = arith.subf %162, %174 : vector<8x16xf32>
    %176 = vector.broadcast %69 : vector<1x16xf32> to vector<8x16xf32>
    %177 = arith.mulf %176, %175 : vector<8x16xf32>
    %cst_104 = arith.constant 9.99999974E-6 : f32
    %178 = vector.broadcast %cst_104 : f32 to vector<1x16xf32>
    %179 = arith.addf %173, %178 : vector<1x16xf32>
    %180 = math.rsqrt %179 : vector<1x16xf32>
    %181 = vector.broadcast %180 : vector<1x16xf32> to vector<8x16xf32>
    %182 = arith.mulf %177, %181 : vector<8x16xf32>
    %183 = vector.broadcast %70 : vector<1x16xf32> to vector<8x16xf32>
    %184 = arith.addf %182, %183 : vector<8x16xf32>
    %185 = vector.extract_strided_slice %184 {offsets = [0, 0], sizes = [8, 8], strides = [1, 1]} : vector<8x16xf32> to vector<8x8xf32>
    %186 = vector.extract_strided_slice %184 {offsets = [0, 8], sizes = [8, 8], strides = [1, 1]} : vector<8x16xf32> to vector<8x8xf32>
    %187 = arith.negf %186 : vector<8x8xf32>
    %188 = math.exp %187 : vector<8x8xf32>
    %cst_105 = arith.constant 1.000000e+00 : f32
    %189 = vector.broadcast %cst_105 : f32 to vector<8x8xf32>
    %190 = arith.addf %189, %188 : vector<8x8xf32>
    %191 = arith.divf %189, %190 : vector<8x8xf32>
    %192 = arith.mulf %185, %191 : vector<8x8xf32>
    %cst_106 = arith.constant dense<0.000000e+00> : vector<8x16xf32>
    %193 = tpu.matmul %192, %71, %cst_106 {dimension_numbers = #tpu.dot_dimension_numbers<[1], [0], [0], [1], [0, 0, 1, 1], [], []>} : vector<8x8xf32>, vector<8x16xf32>, vector<8x16xf32> -> vector<8x16xf32>
    %cst_107 = arith.constant dense<0.000000e+00> : vector<16xf32>
    %194 = vector.multi_reduction <add>, %193, %cst_107 [0] : vector<8x16xf32> to vector<16xf32>
    %195 = vector.shape_cast %194 : vector<16xf32> to vector<1x16xf32>
    %cst_108 = arith.constant 8.000000e+00 : f32
    %196 = vector.broadcast %cst_108 : f32 to vector<1x16xf32>
    %197 = arith.divf %195, %196 : vector<1x16xf32>
    %198 = vector.broadcast %197 : vector<1x16xf32> to vector<8x16xf32>
    %199 = arith.subf %193, %198 : vector<8x16xf32>
    %200 = arith.mulf %199, %199 : vector<8x16xf32>
    %cst_109 = arith.constant dense<0.000000e+00> : vector<16xf32>
    %201 = vector.multi_reduction <add>, %200, %cst_109 [0] : vector<8x16xf32> to vector<16xf32>
    %202 = vector.shape_cast %201 : vector<16xf32> to vector<1x16xf32>
    %cst_110 = arith.constant 8.000000e+00 : f32
    %203 = vector.broadcast %cst_110 : f32 to vector<1x16xf32>
    %204 = arith.divf %202, %203 : vector<1x16xf32>
    %205 = vector.broadcast %197 : vector<1x16xf32> to vector<8x16xf32>
    %206 = arith.subf %193, %205 : vector<8x16xf32>
    %207 = vector.broadcast %72 : vector<1x16xf32> to vector<8x16xf32>
    %208 = arith.mulf %207, %206 : vector<8x16xf32>
    %cst_111 = arith.constant 9.99999974E-6 : f32
    %209 = vector.broadcast %cst_111 : f32 to vector<1x16xf32>
    %210 = arith.addf %204, %209 : vector<1x16xf32>
    %211 = math.rsqrt %210 : vector<1x16xf32>
    %212 = vector.broadcast %211 : vector<1x16xf32> to vector<8x16xf32>
    %213 = arith.mulf %208, %212 : vector<8x16xf32>
    %214 = vector.broadcast %73 : vector<1x16xf32> to vector<8x16xf32>
    %215 = arith.addf %213, %214 : vector<8x16xf32>
    %216 = vector.extract_strided_slice %215 {offsets = [0, 0], sizes = [8, 8], strides = [1, 1]} : vector<8x16xf32> to vector<8x8xf32>
    %217 = vector.extract_strided_slice %215 {offsets = [0, 8], sizes = [8, 8], strides = [1, 1]} : vector<8x16xf32> to vector<8x8xf32>
    %218 = arith.negf %217 : vector<8x8xf32>
    %219 = math.exp %218 : vector<8x8xf32>
    %cst_112 = arith.constant 1.000000e+00 : f32
    %220 = vector.broadcast %cst_112 : f32 to vector<8x8xf32>
    %221 = arith.addf %220, %219 : vector<8x8xf32>
    %222 = arith.divf %220, %221 : vector<8x8xf32>
    %223 = arith.mulf %216, %222 : vector<8x8xf32>
    %224 = arith.addf %192, %223 : vector<8x8xf32>
    %225 = vector.broadcast %161 : f32 to vector<8x8xf32>
    %226 = arith.mulf %224, %225 : vector<8x8xf32>
    %227 = vector.extract_strided_slice %226 {offsets = [0, 0], sizes = [8, 4], strides = [1, 1]} : vector<8x8xf32> to vector<8x4xf32>
    %cst_113 = arith.constant 1.000000e+00 : f32
    %228 = vector.broadcast %cst_113 : f32 to vector<8x16xf32>
    %cst_114 = arith.constant 0.000000e+00 : f32
    %229 = vector.broadcast %cst_114 : f32 to vector<8x4xf32>
    %cst_115 = arith.constant dense<0.000000e+00> : vector<8x16xf32>
    %230 = tpu.matmul %227, %92, %cst_115 {dimension_numbers = #tpu.dot_dimension_numbers<[1], [0], [0], [1], [0, 0, 1, 1], [], []>} : vector<8x4xf32>, vector<4x16xf32>, vector<8x16xf32> -> vector<8x16xf32>
    %cst_116 = arith.constant dense<0.000000e+00> : vector<16xf32>
    %231 = vector.multi_reduction <add>, %230, %cst_116 [0] : vector<8x16xf32> to vector<16xf32>
    %232 = vector.shape_cast %231 : vector<16xf32> to vector<1x16xf32>
    %cst_117 = arith.constant 8.000000e+00 : f32
    %233 = vector.broadcast %cst_117 : f32 to vector<1x16xf32>
    %234 = arith.divf %232, %233 : vector<1x16xf32>
    %235 = vector.broadcast %234 : vector<1x16xf32> to vector<8x16xf32>
    %236 = arith.subf %230, %235 : vector<8x16xf32>
    %237 = arith.mulf %236, %236 : vector<8x16xf32>
    %cst_118 = arith.constant dense<0.000000e+00> : vector<16xf32>
    %238 = vector.multi_reduction <add>, %237, %cst_118 [0] : vector<8x16xf32> to vector<16xf32>
    %239 = vector.shape_cast %238 : vector<16xf32> to vector<1x16xf32>
    %cst_119 = arith.constant 8.000000e+00 : f32
    %240 = vector.broadcast %cst_119 : f32 to vector<1x16xf32>
    %241 = arith.divf %239, %240 : vector<1x16xf32>
    %242 = vector.broadcast %234 : vector<1x16xf32> to vector<8x16xf32>
    %243 = arith.subf %230, %242 : vector<8x16xf32>
    %244 = vector.broadcast %93 : vector<1x16xf32> to vector<8x16xf32>
    %245 = arith.mulf %244, %243 : vector<8x16xf32>
    %cst_120 = arith.constant 9.99999974E-6 : f32
    %246 = vector.broadcast %cst_120 : f32 to vector<1x16xf32>
    %247 = arith.addf %241, %246 : vector<1x16xf32>
    %248 = math.rsqrt %247 : vector<1x16xf32>
    %249 = vector.broadcast %248 : vector<1x16xf32> to vector<8x16xf32>
    %250 = arith.mulf %245, %249 : vector<8x16xf32>
    %251 = vector.broadcast %94 : vector<1x16xf32> to vector<8x16xf32>
    %252 = arith.addf %250, %251 : vector<8x16xf32>
    %253 = arith.mulf %252, %228 : vector<8x16xf32>
    %254 = vector.shape_cast %253 : vector<8x16xf32> to vector<8x1x16xf32>
    %255 = vector.shape_cast %253 : vector<8x16xf32> to vector<8x16x1xf32>
    %256 = vector.broadcast %254 : vector<8x1x16xf32> to vector<8x16x16xf32>
    %257 = vector.broadcast %255 : vector<8x16x1xf32> to vector<8x16x16xf32>
    %258 = arith.cmpf oge, %256, %257 : vector<8x16x16xf32>
    %259 = arith.extui %258 : vector<8x16x16xi1> to vector<8x16x16xi32>
    %260 = arith.sitofp %259 : vector<8x16x16xi32> to vector<8x16x16xf32>
    %cst_121 = arith.constant dense<0.000000e+00> : vector<8x16xf32>
    %261 = vector.multi_reduction <add>, %260, %cst_121 [2] : vector<8x16x16xf32> to vector<8x16xf32>
    %262 = vector.shape_cast %253 : vector<8x16xf32> to vector<8x1x16xf32>
    %263 = vector.broadcast %262 : vector<8x1x16xf32> to vector<8x16x16xf32>
    %264 = arith.mulf %263, %260 : vector<8x16x16xf32>
    %cst_122 = arith.constant dense<0.000000e+00> : vector<8x16xf32>
    %265 = vector.multi_reduction <add>, %264, %cst_122 [2] : vector<8x16x16xf32> to vector<8x16xf32>
    %266 = arith.mulf %261, %253 : vector<8x16xf32>
    %cst_123 = arith.constant 1.000000e+00 : f32
    %267 = vector.broadcast %cst_123 : f32 to vector<8x16xf32>
    %268 = arith.addf %267, %266 : vector<8x16xf32>
    %269 = arith.cmpf ogt, %268, %265 : vector<8x16xf32>
    %cst_124 = arith.constant 1.000000e+00 : f32
    %270 = vector.broadcast %cst_124 : f32 to vector<8x16xf32>
    %271 = arith.subf %265, %270 : vector<8x16xf32>
    %272 = arith.divf %271, %261 : vector<8x16xf32>
    %cst_125 = arith.constant 0xFF800000 : f32
    %273 = vector.broadcast %cst_125 : f32 to vector<8x16xf32>
    %274 = arith.select %269, %272, %273 : vector<8x16xi1>, vector<8x16xf32>
    %cst_126 = arith.constant dense<0xFF800000> : vector<8xf32>
    %275 = vector.multi_reduction <maximumf>, %274, %cst_126 [1] : vector<8x16xf32> to vector<8xf32>
    %276 = vector.shape_cast %275 : vector<8xf32> to vector<8x1xf32>
    %277 = vector.broadcast %276 : vector<8x1xf32> to vector<8x16xf32>
    %278 = arith.subf %253, %277 : vector<8x16xf32>
    %cst_127 = arith.constant 0.000000e+00 : f32
    %279 = vector.broadcast %cst_127 : f32 to vector<8x16xf32>
    %280 = arith.maximumf %278, %279 : vector<8x16xf32>
    %cst_128 = arith.constant 1.000000e+00 : f32
    %281 = vector.broadcast %cst_128 : f32 to vector<8x16xf32>
    %282 = arith.subf %281, %280 : vector<8x16xf32>
    %283 = arith.mulf %228, %282 : vector<8x16xf32>
    %c0_129 = arith.constant 0 : index
    %c0_130 = arith.constant 0 : index
    %c0_131 = arith.constant 0 : index
    %284 = vector.load %arg41[%c0_129, %c0_130, %c0_131] : memref<3x8x16xf32, #tpu.memory_space<vmem>>, vector<1x8x16xf32>
    %285 = vector.shape_cast %284 : vector<1x8x16xf32> to vector<8x16xf32>
    %286 = vector.shape_cast %280 : vector<8x16xf32> to vector<1x8x16xf32>
    tpu.vector_store %arg41[%c0_129, %c0_130, %c0_131], %286 {strides = array<i32>} : memref<3x8x16xf32, #tpu.memory_space<vmem>>, vector<1x8x16xf32>,
    %cst_132 = arith.constant 5.000000e-01 : f32
    %287 = math.sqrt %cst_132 : f32
    %cst_133 = arith.constant dense<0.000000e+00> : vector<8x16xf32>
    %288 = tpu.matmul %280, %62, %cst_133 {dimension_numbers = #tpu.dot_dimension_numbers<[1], [0], [0], [1], [0, 0, 1, 1], [], []>} : vector<8x16xf32>, vector<16x16xf32>, vector<8x16xf32> -> vector<8x16xf32>
    %cst_134 = arith.constant dense<0.000000e+00> : vector<16xf32>
    %289 = vector.multi_reduction <add>, %288, %cst_134 [0] : vector<8x16xf32> to vector<16xf32>
    %290 = vector.shape_cast %289 : vector<16xf32> to vector<1x16xf32>
    %cst_135 = arith.constant 8.000000e+00 : f32
    %291 = vector.broadcast %cst_135 : f32 to vector<1x16xf32>
    %292 = arith.divf %290, %291 : vector<1x16xf32>
    %293 = vector.broadcast %292 : vector<1x16xf32> to vector<8x16xf32>
    %294 = arith.subf %288, %293 : vector<8x16xf32>
    %295 = arith.mulf %294, %294 : vector<8x16xf32>
    %cst_136 = arith.constant dense<0.000000e+00> : vector<16xf32>
    %296 = vector.multi_reduction <add>, %295, %cst_136 [0] : vector<8x16xf32> to vector<16xf32>
    %297 = vector.shape_cast %296 : vector<16xf32> to vector<1x16xf32>
    %cst_137 = arith.constant 8.000000e+00 : f32
    %298 = vector.broadcast %cst_137 : f32 to vector<1x16xf32>
    %299 = arith.divf %297, %298 : vector<1x16xf32>
    %300 = vector.broadcast %292 : vector<1x16xf32> to vector<8x16xf32>
    %301 = arith.subf %288, %300 : vector<8x16xf32>
    %302 = vector.broadcast %63 : vector<1x16xf32> to vector<8x16xf32>
    %303 = arith.mulf %302, %301 : vector<8x16xf32>
    %cst_138 = arith.constant 9.99999974E-6 : f32
    %304 = vector.broadcast %cst_138 : f32 to vector<1x16xf32>
    %305 = arith.addf %299, %304 : vector<1x16xf32>
    %306 = math.rsqrt %305 : vector<1x16xf32>
    %307 = vector.broadcast %306 : vector<1x16xf32> to vector<8x16xf32>
    %308 = arith.mulf %303, %307 : vector<8x16xf32>
    %309 = vector.broadcast %64 : vector<1x16xf32> to vector<8x16xf32>
    %310 = arith.addf %308, %309 : vector<8x16xf32>
    %311 = vector.extract_strided_slice %310 {offsets = [0, 0], sizes = [8, 8], strides = [1, 1]} : vector<8x16xf32> to vector<8x8xf32>
    %312 = vector.extract_strided_slice %310 {offsets = [0, 8], sizes = [8, 8], strides = [1, 1]} : vector<8x16xf32> to vector<8x8xf32>
    %313 = arith.negf %312 : vector<8x8xf32>
    %314 = math.exp %313 : vector<8x8xf32>
    %cst_139 = arith.constant 1.000000e+00 : f32
    %315 = vector.broadcast %cst_139 : f32 to vector<8x8xf32>
    %316 = arith.addf %315, %314 : vector<8x8xf32>
    %317 = arith.divf %315, %316 : vector<8x8xf32>
    %318 = arith.mulf %311, %317 : vector<8x8xf32>
    %cst_140 = arith.constant dense<0.000000e+00> : vector<8x16xf32>
    %319 = tpu.matmul %318, %65, %cst_140 {dimension_numbers = #tpu.dot_dimension_numbers<[1], [0], [0], [1], [0, 0, 1, 1], [], []>} : vector<8x8xf32>, vector<8x16xf32>, vector<8x16xf32> -> vector<8x16xf32>
    %cst_141 = arith.constant dense<0.000000e+00> : vector<16xf32>
    %320 = vector.multi_reduction <add>, %319, %cst_141 [0] : vector<8x16xf32> to vector<16xf32>
    %321 = vector.shape_cast %320 : vector<16xf32> to vector<1x16xf32>
    %cst_142 = arith.constant 8.000000e+00 : f32
    %322 = vector.broadcast %cst_142 : f32 to vector<1x16xf32>
    %323 = arith.divf %321, %322 : vector<1x16xf32>
    %324 = vector.broadcast %323 : vector<1x16xf32> to vector<8x16xf32>
    %325 = arith.subf %319, %324 : vector<8x16xf32>
    %326 = arith.mulf %325, %325 : vector<8x16xf32>
    %cst_143 = arith.constant dense<0.000000e+00> : vector<16xf32>
    %327 = vector.multi_reduction <add>, %326, %cst_143 [0] : vector<8x16xf32> to vector<16xf32>
    %328 = vector.shape_cast %327 : vector<16xf32> to vector<1x16xf32>
    %cst_144 = arith.constant 8.000000e+00 : f32
    %329 = vector.broadcast %cst_144 : f32 to vector<1x16xf32>
    %330 = arith.divf %328, %329 : vector<1x16xf32>
    %331 = vector.broadcast %323 : vector<1x16xf32> to vector<8x16xf32>
    %332 = arith.subf %319, %331 : vector<8x16xf32>
    %333 = vector.broadcast %66 : vector<1x16xf32> to vector<8x16xf32>
    %334 = arith.mulf %333, %332 : vector<8x16xf32>
    %cst_145 = arith.constant 9.99999974E-6 : f32
    %335 = vector.broadcast %cst_145 : f32 to vector<1x16xf32>
    %336 = arith.addf %330, %335 : vector<1x16xf32>
    %337 = math.rsqrt %336 : vector<1x16xf32>
    %338 = vector.broadcast %337 : vector<1x16xf32> to vector<8x16xf32>
    %339 = arith.mulf %334, %338 : vector<8x16xf32>
    %340 = vector.broadcast %67 : vector<1x16xf32> to vector<8x16xf32>
    %341 = arith.addf %339, %340 : vector<8x16xf32>
    %342 = vector.extract_strided_slice %341 {offsets = [0, 0], sizes = [8, 8], strides = [1, 1]} : vector<8x16xf32> to vector<8x8xf32>
    %343 = vector.extract_strided_slice %341 {offsets = [0, 8], sizes = [8, 8], strides = [1, 1]} : vector<8x16xf32> to vector<8x8xf32>
    %344 = arith.negf %343 : vector<8x8xf32>
    %345 = math.exp %344 : vector<8x8xf32>
    %cst_146 = arith.constant 1.000000e+00 : f32
    %346 = vector.broadcast %cst_146 : f32 to vector<8x8xf32>
    %347 = arith.addf %346, %345 : vector<8x8xf32>
    %348 = arith.divf %346, %347 : vector<8x8xf32>
    %349 = arith.mulf %342, %348 : vector<8x8xf32>
    %350 = arith.addf %318, %349 : vector<8x8xf32>
    %351 = vector.broadcast %287 : f32 to vector<8x8xf32>
    %352 = arith.mulf %350, %351 : vector<8x8xf32>
    %cst_147 = arith.constant 5.000000e-01 : f32
    %353 = math.sqrt %cst_147 : f32
    %cst_148 = arith.constant dense<0.000000e+00> : vector<8x16xf32>
    %354 = tpu.matmul %352, %74, %cst_148 {dimension_numbers = #tpu.dot_dimension_numbers<[1], [0], [0], [1], [0, 0, 1, 1], [], []>} : vector<8x8xf32>, vector<8x16xf32>, vector<8x16xf32> -> vector<8x16xf32>
    %cst_149 = arith.constant dense<0.000000e+00> : vector<16xf32>
    %355 = vector.multi_reduction <add>, %354, %cst_149 [0] : vector<8x16xf32> to vector<16xf32>
    %356 = vector.shape_cast %355 : vector<16xf32> to vector<1x16xf32>
    %cst_150 = arith.constant 8.000000e+00 : f32
    %357 = vector.broadcast %cst_150 : f32 to vector<1x16xf32>
    %358 = arith.divf %356, %357 : vector<1x16xf32>
    %359 = vector.broadcast %358 : vector<1x16xf32> to vector<8x16xf32>
    %360 = arith.subf %354, %359 : vector<8x16xf32>
    %361 = arith.mulf %360, %360 : vector<8x16xf32>
    %cst_151 = arith.constant dense<0.000000e+00> : vector<16xf32>
    %362 = vector.multi_reduction <add>, %361, %cst_151 [0] : vector<8x16xf32> to vector<16xf32>
    %363 = vector.shape_cast %362 : vector<16xf32> to vector<1x16xf32>
    %cst_152 = arith.constant 8.000000e+00 : f32
    %364 = vector.broadcast %cst_152 : f32 to vector<1x16xf32>
    %365 = arith.divf %363, %364 : vector<1x16xf32>
    %366 = vector.broadcast %358 : vector<1x16xf32> to vector<8x16xf32>
    %367 = arith.subf %354, %366 : vector<8x16xf32>
    %368 = vector.broadcast %75 : vector<1x16xf32> to vector<8x16xf32>
    %369 = arith.mulf %368, %367 : vector<8x16xf32>
    %cst_153 = arith.constant 9.99999974E-6 : f32
    %370 = vector.broadcast %cst_153 : f32 to vector<1x16xf32>
    %371 = arith.addf %365, %370 : vector<1x16xf32>
    %372 = math.rsqrt %371 : vector<1x16xf32>
    %373 = vector.broadcast %372 : vector<1x16xf32> to vector<8x16xf32>
    %374 = arith.mulf %369, %373 : vector<8x16xf32>
    %375 = vector.broadcast %76 : vector<1x16xf32> to vector<8x16xf32>
    %376 = arith.addf %374, %375 : vector<8x16xf32>
    %377 = vector.extract_strided_slice %376 {offsets = [0, 0], sizes = [8, 8], strides = [1, 1]} : vector<8x16xf32> to vector<8x8xf32>
    %378 = vector.extract_strided_slice %376 {offsets = [0, 8], sizes = [8, 8], strides = [1, 1]} : vector<8x16xf32> to vector<8x8xf32>
    %379 = arith.negf %378 : vector<8x8xf32>
    %380 = math.exp %379 : vector<8x8xf32>
    %cst_154 = arith.constant 1.000000e+00 : f32
    %381 = vector.broadcast %cst_154 : f32 to vector<8x8xf32>
    %382 = arith.addf %381, %380 : vector<8x8xf32>
    %383 = arith.divf %381, %382 : vector<8x8xf32>
    %384 = arith.mulf %377, %383 : vector<8x8xf32>
    %cst_155 = arith.constant dense<0.000000e+00> : vector<8x16xf32>
    %385 = tpu.matmul %384, %77, %cst_155 {dimension_numbers = #tpu.dot_dimension_numbers<[1], [0], [0], [1], [0, 0, 1, 1], [], []>} : vector<8x8xf32>, vector<8x16xf32>, vector<8x16xf32> -> vector<8x16xf32>
    %cst_156 = arith.constant dense<0.000000e+00> : vector<16xf32>
    %386 = vector.multi_reduction <add>, %385, %cst_156 [0] : vector<8x16xf32> to vector<16xf32>
    %387 = vector.shape_cast %386 : vector<16xf32> to vector<1x16xf32>
    %cst_157 = arith.constant 8.000000e+00 : f32
    %388 = vector.broadcast %cst_157 : f32 to vector<1x16xf32>
    %389 = arith.divf %387, %388 : vector<1x16xf32>
    %390 = vector.broadcast %389 : vector<1x16xf32> to vector<8x16xf32>
    %391 = arith.subf %385, %390 : vector<8x16xf32>
    %392 = arith.mulf %391, %391 : vector<8x16xf32>
    %cst_158 = arith.constant dense<0.000000e+00> : vector<16xf32>
    %393 = vector.multi_reduction <add>, %392, %cst_158 [0] : vector<8x16xf32> to vector<16xf32>
    %394 = vector.shape_cast %393 : vector<16xf32> to vector<1x16xf32>
    %cst_159 = arith.constant 8.000000e+00 : f32
    %395 = vector.broadcast %cst_159 : f32 to vector<1x16xf32>
    %396 = arith.divf %394, %395 : vector<1x16xf32>
    %397 = vector.broadcast %389 : vector<1x16xf32> to vector<8x16xf32>
    %398 = arith.subf %385, %397 : vector<8x16xf32>
    %399 = vector.broadcast %78 : vector<1x16xf32> to vector<8x16xf32>
    %400 = arith.mulf %399, %398 : vector<8x16xf32>
    %cst_160 = arith.constant 9.99999974E-6 : f32
    %401 = vector.broadcast %cst_160 : f32 to vector<1x16xf32>
    %402 = arith.addf %396, %401 : vector<1x16xf32>
    %403 = math.rsqrt %402 : vector<1x16xf32>
    %404 = vector.broadcast %403 : vector<1x16xf32> to vector<8x16xf32>
    %405 = arith.mulf %400, %404 : vector<8x16xf32>
    %406 = vector.broadcast %79 : vector<1x16xf32> to vector<8x16xf32>
    %407 = arith.addf %405, %406 : vector<8x16xf32>
    %408 = vector.extract_strided_slice %407 {offsets = [0, 0], sizes = [8, 8], strides = [1, 1]} : vector<8x16xf32> to vector<8x8xf32>
    %409 = vector.extract_strided_slice %407 {offsets = [0, 8], sizes = [8, 8], strides = [1, 1]} : vector<8x16xf32> to vector<8x8xf32>
    %410 = arith.negf %409 : vector<8x8xf32>
    %411 = math.exp %410 : vector<8x8xf32>
    %cst_161 = arith.constant 1.000000e+00 : f32
    %412 = vector.broadcast %cst_161 : f32 to vector<8x8xf32>
    %413 = arith.addf %412, %411 : vector<8x8xf32>
    %414 = arith.divf %412, %413 : vector<8x8xf32>
    %415 = arith.mulf %408, %414 : vector<8x8xf32>
    %416 = arith.addf %384, %415 : vector<8x8xf32>
    %417 = vector.broadcast %353 : f32 to vector<8x8xf32>
    %418 = arith.mulf %416, %417 : vector<8x8xf32>
    %419 = vector.extract_strided_slice %418 {offsets = [0, 0], sizes = [8, 4], strides = [1, 1]} : vector<8x8xf32> to vector<8x4xf32>
    %420 = vector.extract_strided_slice %418 {offsets = [0, 4], sizes = [8, 4], strides = [1, 1]} : vector<8x8xf32> to vector<8x4xf32>
    %cst_162 = arith.constant 0.000000e+00 : f32
    %421 = vector.broadcast %cst_162 : f32 to vector<8x4xf32>
    %422 = arith.maximumf %420, %421 : vector<8x4xf32>
    %423 = arith.addf %229, %422 : vector<8x4xf32>
    %cst_163 = arith.constant dense<0.000000e+00> : vector<8x16xf32>
    %424 = tpu.matmul %419, %92, %cst_163 {dimension_numbers = #tpu.dot_dimension_numbers<[1], [0], [0], [1], [0, 0, 1, 1], [], []>} : vector<8x4xf32>, vector<4x16xf32>, vector<8x16xf32> -> vector<8x16xf32>
    %cst_164 = arith.constant dense<0.000000e+00> : vector<16xf32>
    %425 = vector.multi_reduction <add>, %424, %cst_164 [0] : vector<8x16xf32> to vector<16xf32>
    %426 = vector.shape_cast %425 : vector<16xf32> to vector<1x16xf32>
    %cst_165 = arith.constant 8.000000e+00 : f32
    %427 = vector.broadcast %cst_165 : f32 to vector<1x16xf32>
    %428 = arith.divf %426, %427 : vector<1x16xf32>
    %429 = vector.broadcast %428 : vector<1x16xf32> to vector<8x16xf32>
    %430 = arith.subf %424, %429 : vector<8x16xf32>
    %431 = arith.mulf %430, %430 : vector<8x16xf32>
    %cst_166 = arith.constant dense<0.000000e+00> : vector<16xf32>
    %432 = vector.multi_reduction <add>, %431, %cst_166 [0] : vector<8x16xf32> to vector<16xf32>
    %433 = vector.shape_cast %432 : vector<16xf32> to vector<1x16xf32>
    %cst_167 = arith.constant 8.000000e+00 : f32
    %434 = vector.broadcast %cst_167 : f32 to vector<1x16xf32>
    %435 = arith.divf %433, %434 : vector<1x16xf32>
    %436 = vector.broadcast %428 : vector<1x16xf32> to vector<8x16xf32>
    %437 = arith.subf %424, %436 : vector<8x16xf32>
    %438 = vector.broadcast %93 : vector<1x16xf32> to vector<8x16xf32>
    %439 = arith.mulf %438, %437 : vector<8x16xf32>
    %cst_168 = arith.constant 9.99999974E-6 : f32
    %440 = vector.broadcast %cst_168 : f32 to vector<1x16xf32>
    %441 = arith.addf %435, %440 : vector<1x16xf32>
    %442 = math.rsqrt %441 : vector<1x16xf32>
    %443 = vector.broadcast %442 : vector<1x16xf32> to vector<8x16xf32>
    %444 = arith.mulf %439, %443 : vector<8x16xf32>
    %445 = vector.broadcast %94 : vector<1x16xf32> to vector<8x16xf32>
    %446 = arith.addf %444, %445 : vector<8x16xf32>
    %447 = arith.mulf %446, %283 : vector<8x16xf32>
    %448 = vector.shape_cast %447 : vector<8x16xf32> to vector<8x1x16xf32>
    %449 = vector.shape_cast %447 : vector<8x16xf32> to vector<8x16x1xf32>
    %450 = vector.broadcast %448 : vector<8x1x16xf32> to vector<8x16x16xf32>
    %451 = vector.broadcast %449 : vector<8x16x1xf32> to vector<8x16x16xf32>
    %452 = arith.cmpf oge, %450, %451 : vector<8x16x16xf32>
    %453 = arith.extui %452 : vector<8x16x16xi1> to vector<8x16x16xi32>
    %454 = arith.sitofp %453 : vector<8x16x16xi32> to vector<8x16x16xf32>
    %cst_169 = arith.constant dense<0.000000e+00> : vector<8x16xf32>
    %455 = vector.multi_reduction <add>, %454, %cst_169 [2] : vector<8x16x16xf32> to vector<8x16xf32>
    %456 = vector.shape_cast %447 : vector<8x16xf32> to vector<8x1x16xf32>
    %457 = vector.broadcast %456 : vector<8x1x16xf32> to vector<8x16x16xf32>
    %458 = arith.mulf %457, %454 : vector<8x16x16xf32>
    %cst_170 = arith.constant dense<0.000000e+00> : vector<8x16xf32>
    %459 = vector.multi_reduction <add>, %458, %cst_170 [2] : vector<8x16x16xf32> to vector<8x16xf32>
    %460 = arith.mulf %455, %447 : vector<8x16xf32>
    %cst_171 = arith.constant 1.000000e+00 : f32
    %461 = vector.broadcast %cst_171 : f32 to vector<8x16xf32>
    %462 = arith.addf %461, %460 : vector<8x16xf32>
    %463 = arith.cmpf ogt, %462, %459 : vector<8x16xf32>
    %cst_172 = arith.constant 1.000000e+00 : f32
    %464 = vector.broadcast %cst_172 : f32 to vector<8x16xf32>
    %465 = arith.subf %459, %464 : vector<8x16xf32>
    %466 = arith.divf %465, %455 : vector<8x16xf32>
    %cst_173 = arith.constant 0xFF800000 : f32
    %467 = vector.broadcast %cst_173 : f32 to vector<8x16xf32>
    %468 = arith.select %463, %466, %467 : vector<8x16xi1>, vector<8x16xf32>
    %cst_174 = arith.constant dense<0xFF800000> : vector<8xf32>
    %469 = vector.multi_reduction <maximumf>, %468, %cst_174 [1] : vector<8x16xf32> to vector<8xf32>
    %470 = vector.shape_cast %469 : vector<8xf32> to vector<8x1xf32>
    %471 = vector.broadcast %470 : vector<8x1xf32> to vector<8x16xf32>
    %472 = arith.subf %447, %471 : vector<8x16xf32>
    %cst_175 = arith.constant 0.000000e+00 : f32
    %473 = vector.broadcast %cst_175 : f32 to vector<8x16xf32>
    %474 = arith.maximumf %472, %473 : vector<8x16xf32>
    %cst_176 = arith.constant 1.000000e+00 : f32
    %475 = vector.broadcast %cst_176 : f32 to vector<8x16xf32>
    %476 = arith.subf %475, %474 : vector<8x16xf32>
    %477 = arith.mulf %283, %476 : vector<8x16xf32>
    %c1 = arith.constant 1 : index
    %c0_177 = arith.constant 0 : index
    %c0_178 = arith.constant 0 : index
    %478 = vector.load %arg41[%c1, %c0_177, %c0_178] : memref<3x8x16xf32, #tpu.memory_space<vmem>>, vector<1x8x16xf32>
    %479 = vector.shape_cast %478 : vector<1x8x16xf32> to vector<8x16xf32>
    %480 = vector.shape_cast %474 : vector<8x16xf32> to vector<1x8x16xf32>
    tpu.vector_store %arg41[%c1, %c0_177, %c0_178], %480 {strides = array<i32>} : memref<3x8x16xf32, #tpu.memory_space<vmem>>, vector<1x8x16xf32>,
    %cst_179 = arith.constant 5.000000e-01 : f32
    %481 = math.sqrt %cst_179 : f32
    %cst_180 = arith.constant dense<0.000000e+00> : vector<8x16xf32>
    %482 = tpu.matmul %474, %62, %cst_180 {dimension_numbers = #tpu.dot_dimension_numbers<[1], [0], [0], [1], [0, 0, 1, 1], [], []>} : vector<8x16xf32>, vector<16x16xf32>, vector<8x16xf32> -> vector<8x16xf32>
    %cst_181 = arith.constant dense<0.000000e+00> : vector<16xf32>
    %483 = vector.multi_reduction <add>, %482, %cst_181 [0] : vector<8x16xf32> to vector<16xf32>
    %484 = vector.shape_cast %483 : vector<16xf32> to vector<1x16xf32>
    %cst_182 = arith.constant 8.000000e+00 : f32
    %485 = vector.broadcast %cst_182 : f32 to vector<1x16xf32>
    %486 = arith.divf %484, %485 : vector<1x16xf32>
    %487 = vector.broadcast %486 : vector<1x16xf32> to vector<8x16xf32>
    %488 = arith.subf %482, %487 : vector<8x16xf32>
    %489 = arith.mulf %488, %488 : vector<8x16xf32>
    %cst_183 = arith.constant dense<0.000000e+00> : vector<16xf32>
    %490 = vector.multi_reduction <add>, %489, %cst_183 [0] : vector<8x16xf32> to vector<16xf32>
    %491 = vector.shape_cast %490 : vector<16xf32> to vector<1x16xf32>
    %cst_184 = arith.constant 8.000000e+00 : f32
    %492 = vector.broadcast %cst_184 : f32 to vector<1x16xf32>
    %493 = arith.divf %491, %492 : vector<1x16xf32>
    %494 = vector.broadcast %486 : vector<1x16xf32> to vector<8x16xf32>
    %495 = arith.subf %482, %494 : vector<8x16xf32>
    %496 = vector.broadcast %63 : vector<1x16xf32> to vector<8x16xf32>
    %497 = arith.mulf %496, %495 : vector<8x16xf32>
    %cst_185 = arith.constant 9.99999974E-6 : f32
    %498 = vector.broadcast %cst_185 : f32 to vector<1x16xf32>
    %499 = arith.addf %493, %498 : vector<1x16xf32>
    %500 = math.rsqrt %499 : vector<1x16xf32>
    %501 = vector.broadcast %500 : vector<1x16xf32> to vector<8x16xf32>
    %502 = arith.mulf %497, %501 : vector<8x16xf32>
    %503 = vector.broadcast %64 : vector<1x16xf32> to vector<8x16xf32>
    %504 = arith.addf %502, %503 : vector<8x16xf32>
    %505 = vector.extract_strided_slice %504 {offsets = [0, 0], sizes = [8, 8], strides = [1, 1]} : vector<8x16xf32> to vector<8x8xf32>
    %506 = vector.extract_strided_slice %504 {offsets = [0, 8], sizes = [8, 8], strides = [1, 1]} : vector<8x16xf32> to vector<8x8xf32>
    %507 = arith.negf %506 : vector<8x8xf32>
    %508 = math.exp %507 : vector<8x8xf32>
    %cst_186 = arith.constant 1.000000e+00 : f32
    %509 = vector.broadcast %cst_186 : f32 to vector<8x8xf32>
    %510 = arith.addf %509, %508 : vector<8x8xf32>
    %511 = arith.divf %509, %510 : vector<8x8xf32>
    %512 = arith.mulf %505, %511 : vector<8x8xf32>
    %cst_187 = arith.constant dense<0.000000e+00> : vector<8x16xf32>
    %513 = tpu.matmul %512, %65, %cst_187 {dimension_numbers = #tpu.dot_dimension_numbers<[1], [0], [0], [1], [0, 0, 1, 1], [], []>} : vector<8x8xf32>, vector<8x16xf32>, vector<8x16xf32> -> vector<8x16xf32>
    %cst_188 = arith.constant dense<0.000000e+00> : vector<16xf32>
    %514 = vector.multi_reduction <add>, %513, %cst_188 [0] : vector<8x16xf32> to vector<16xf32>
    %515 = vector.shape_cast %514 : vector<16xf32> to vector<1x16xf32>
    %cst_189 = arith.constant 8.000000e+00 : f32
    %516 = vector.broadcast %cst_189 : f32 to vector<1x16xf32>
    %517 = arith.divf %515, %516 : vector<1x16xf32>
    %518 = vector.broadcast %517 : vector<1x16xf32> to vector<8x16xf32>
    %519 = arith.subf %513, %518 : vector<8x16xf32>
    %520 = arith.mulf %519, %519 : vector<8x16xf32>
    %cst_190 = arith.constant dense<0.000000e+00> : vector<16xf32>
    %521 = vector.multi_reduction <add>, %520, %cst_190 [0] : vector<8x16xf32> to vector<16xf32>
    %522 = vector.shape_cast %521 : vector<16xf32> to vector<1x16xf32>
    %cst_191 = arith.constant 8.000000e+00 : f32
    %523 = vector.broadcast %cst_191 : f32 to vector<1x16xf32>
    %524 = arith.divf %522, %523 : vector<1x16xf32>
    %525 = vector.broadcast %517 : vector<1x16xf32> to vector<8x16xf32>
    %526 = arith.subf %513, %525 : vector<8x16xf32>
    %527 = vector.broadcast %66 : vector<1x16xf32> to vector<8x16xf32>
    %528 = arith.mulf %527, %526 : vector<8x16xf32>
    %cst_192 = arith.constant 9.99999974E-6 : f32
    %529 = vector.broadcast %cst_192 : f32 to vector<1x16xf32>
    %530 = arith.addf %524, %529 : vector<1x16xf32>
    %531 = math.rsqrt %530 : vector<1x16xf32>
    %532 = vector.broadcast %531 : vector<1x16xf32> to vector<8x16xf32>
    %533 = arith.mulf %528, %532 : vector<8x16xf32>
    %534 = vector.broadcast %67 : vector<1x16xf32> to vector<8x16xf32>
    %535 = arith.addf %533, %534 : vector<8x16xf32>
    %536 = vector.extract_strided_slice %535 {offsets = [0, 0], sizes = [8, 8], strides = [1, 1]} : vector<8x16xf32> to vector<8x8xf32>
    %537 = vector.extract_strided_slice %535 {offsets = [0, 8], sizes = [8, 8], strides = [1, 1]} : vector<8x16xf32> to vector<8x8xf32>
    %538 = arith.negf %537 : vector<8x8xf32>
    %539 = math.exp %538 : vector<8x8xf32>
    %cst_193 = arith.constant 1.000000e+00 : f32
    %540 = vector.broadcast %cst_193 : f32 to vector<8x8xf32>
    %541 = arith.addf %540, %539 : vector<8x8xf32>
    %542 = arith.divf %540, %541 : vector<8x8xf32>
    %543 = arith.mulf %536, %542 : vector<8x8xf32>
    %544 = arith.addf %512, %543 : vector<8x8xf32>
    %545 = vector.broadcast %481 : f32 to vector<8x8xf32>
    %546 = arith.mulf %544, %545 : vector<8x8xf32>
    %cst_194 = arith.constant 5.000000e-01 : f32
    %547 = math.sqrt %cst_194 : f32
    %cst_195 = arith.constant dense<0.000000e+00> : vector<8x16xf32>
    %548 = tpu.matmul %546, %80, %cst_195 {dimension_numbers = #tpu.dot_dimension_numbers<[1], [0], [0], [1], [0, 0, 1, 1], [], []>} : vector<8x8xf32>, vector<8x16xf32>, vector<8x16xf32> -> vector<8x16xf32>
    %cst_196 = arith.constant dense<0.000000e+00> : vector<16xf32>
    %549 = vector.multi_reduction <add>, %548, %cst_196 [0] : vector<8x16xf32> to vector<16xf32>
    %550 = vector.shape_cast %549 : vector<16xf32> to vector<1x16xf32>
    %cst_197 = arith.constant 8.000000e+00 : f32
    %551 = vector.broadcast %cst_197 : f32 to vector<1x16xf32>
    %552 = arith.divf %550, %551 : vector<1x16xf32>
    %553 = vector.broadcast %552 : vector<1x16xf32> to vector<8x16xf32>
    %554 = arith.subf %548, %553 : vector<8x16xf32>
    %555 = arith.mulf %554, %554 : vector<8x16xf32>
    %cst_198 = arith.constant dense<0.000000e+00> : vector<16xf32>
    %556 = vector.multi_reduction <add>, %555, %cst_198 [0] : vector<8x16xf32> to vector<16xf32>
    %557 = vector.shape_cast %556 : vector<16xf32> to vector<1x16xf32>
    %cst_199 = arith.constant 8.000000e+00 : f32
    %558 = vector.broadcast %cst_199 : f32 to vector<1x16xf32>
    %559 = arith.divf %557, %558 : vector<1x16xf32>
    %560 = vector.broadcast %552 : vector<1x16xf32> to vector<8x16xf32>
    %561 = arith.subf %548, %560 : vector<8x16xf32>
    %562 = vector.broadcast %81 : vector<1x16xf32> to vector<8x16xf32>
    %563 = arith.mulf %562, %561 : vector<8x16xf32>
    %cst_200 = arith.constant 9.99999974E-6 : f32
    %564 = vector.broadcast %cst_200 : f32 to vector<1x16xf32>
    %565 = arith.addf %559, %564 : vector<1x16xf32>
    %566 = math.rsqrt %565 : vector<1x16xf32>
    %567 = vector.broadcast %566 : vector<1x16xf32> to vector<8x16xf32>
    %568 = arith.mulf %563, %567 : vector<8x16xf32>
    %569 = vector.broadcast %82 : vector<1x16xf32> to vector<8x16xf32>
    %570 = arith.addf %568, %569 : vector<8x16xf32>
    %571 = vector.extract_strided_slice %570 {offsets = [0, 0], sizes = [8, 8], strides = [1, 1]} : vector<8x16xf32> to vector<8x8xf32>
    %572 = vector.extract_strided_slice %570 {offsets = [0, 8], sizes = [8, 8], strides = [1, 1]} : vector<8x16xf32> to vector<8x8xf32>
    %573 = arith.negf %572 : vector<8x8xf32>
    %574 = math.exp %573 : vector<8x8xf32>
    %cst_201 = arith.constant 1.000000e+00 : f32
    %575 = vector.broadcast %cst_201 : f32 to vector<8x8xf32>
    %576 = arith.addf %575, %574 : vector<8x8xf32>
    %577 = arith.divf %575, %576 : vector<8x8xf32>
    %578 = arith.mulf %571, %577 : vector<8x8xf32>
    %cst_202 = arith.constant dense<0.000000e+00> : vector<8x16xf32>
    %579 = tpu.matmul %578, %83, %cst_202 {dimension_numbers = #tpu.dot_dimension_numbers<[1], [0], [0], [1], [0, 0, 1, 1], [], []>} : vector<8x8xf32>, vector<8x16xf32>, vector<8x16xf32> -> vector<8x16xf32>
    %cst_203 = arith.constant dense<0.000000e+00> : vector<16xf32>
    %580 = vector.multi_reduction <add>, %579, %cst_203 [0] : vector<8x16xf32> to vector<16xf32>
    %581 = vector.shape_cast %580 : vector<16xf32> to vector<1x16xf32>
    %cst_204 = arith.constant 8.000000e+00 : f32
    %582 = vector.broadcast %cst_204 : f32 to vector<1x16xf32>
    %583 = arith.divf %581, %582 : vector<1x16xf32>
    %584 = vector.broadcast %583 : vector<1x16xf32> to vector<8x16xf32>
    %585 = arith.subf %579, %584 : vector<8x16xf32>
    %586 = arith.mulf %585, %585 : vector<8x16xf32>
    %cst_205 = arith.constant dense<0.000000e+00> : vector<16xf32>
    %587 = vector.multi_reduction <add>, %586, %cst_205 [0] : vector<8x16xf32> to vector<16xf32>
    %588 = vector.shape_cast %587 : vector<16xf32> to vector<1x16xf32>
    %cst_206 = arith.constant 8.000000e+00 : f32
    %589 = vector.broadcast %cst_206 : f32 to vector<1x16xf32>
    %590 = arith.divf %588, %589 : vector<1x16xf32>
    %591 = vector.broadcast %583 : vector<1x16xf32> to vector<8x16xf32>
    %592 = arith.subf %579, %591 : vector<8x16xf32>
    %593 = vector.broadcast %84 : vector<1x16xf32> to vector<8x16xf32>
    %594 = arith.mulf %593, %592 : vector<8x16xf32>
    %cst_207 = arith.constant 9.99999974E-6 : f32
    %595 = vector.broadcast %cst_207 : f32 to vector<1x16xf32>
    %596 = arith.addf %590, %595 : vector<1x16xf32>
    %597 = math.rsqrt %596 : vector<1x16xf32>
    %598 = vector.broadcast %597 : vector<1x16xf32> to vector<8x16xf32>
    %599 = arith.mulf %594, %598 : vector<8x16xf32>
    %600 = vector.broadcast %85 : vector<1x16xf32> to vector<8x16xf32>
    %601 = arith.addf %599, %600 : vector<8x16xf32>
    %602 = vector.extract_strided_slice %601 {offsets = [0, 0], sizes = [8, 8], strides = [1, 1]} : vector<8x16xf32> to vector<8x8xf32>
    %603 = vector.extract_strided_slice %601 {offsets = [0, 8], sizes = [8, 8], strides = [1, 1]} : vector<8x16xf32> to vector<8x8xf32>
    %604 = arith.negf %603 : vector<8x8xf32>
    %605 = math.exp %604 : vector<8x8xf32>
    %cst_208 = arith.constant 1.000000e+00 : f32
    %606 = vector.broadcast %cst_208 : f32 to vector<8x8xf32>
    %607 = arith.addf %606, %605 : vector<8x8xf32>
    %608 = arith.divf %606, %607 : vector<8x8xf32>
    %609 = arith.mulf %602, %608 : vector<8x8xf32>
    %610 = arith.addf %578, %609 : vector<8x8xf32>
    %611 = vector.broadcast %547 : f32 to vector<8x8xf32>
    %612 = arith.mulf %610, %611 : vector<8x8xf32>
    %613 = vector.extract_strided_slice %612 {offsets = [0, 0], sizes = [8, 4], strides = [1, 1]} : vector<8x8xf32> to vector<8x4xf32>
    %614 = vector.extract_strided_slice %612 {offsets = [0, 4], sizes = [8, 4], strides = [1, 1]} : vector<8x8xf32> to vector<8x4xf32>
    %cst_209 = arith.constant 0.000000e+00 : f32
    %615 = vector.broadcast %cst_209 : f32 to vector<8x4xf32>
    %616 = arith.maximumf %614, %615 : vector<8x4xf32>
    %617 = arith.addf %423, %616 : vector<8x4xf32>
    %cst_210 = arith.constant dense<0.000000e+00> : vector<8x16xf32>
    %618 = tpu.matmul %613, %92, %cst_210 {dimension_numbers = #tpu.dot_dimension_numbers<[1], [0], [0], [1], [0, 0, 1, 1], [], []>} : vector<8x4xf32>, vector<4x16xf32>, vector<8x16xf32> -> vector<8x16xf32>
    %cst_211 = arith.constant dense<0.000000e+00> : vector<16xf32>
    %619 = vector.multi_reduction <add>, %618, %cst_211 [0] : vector<8x16xf32> to vector<16xf32>
    %620 = vector.shape_cast %619 : vector<16xf32> to vector<1x16xf32>
    %cst_212 = arith.constant 8.000000e+00 : f32
    %621 = vector.broadcast %cst_212 : f32 to vector<1x16xf32>
    %622 = arith.divf %620, %621 : vector<1x16xf32>
    %623 = vector.broadcast %622 : vector<1x16xf32> to vector<8x16xf32>
    %624 = arith.subf %618, %623 : vector<8x16xf32>
    %625 = arith.mulf %624, %624 : vector<8x16xf32>
    %cst_213 = arith.constant dense<0.000000e+00> : vector<16xf32>
    %626 = vector.multi_reduction <add>, %625, %cst_213 [0] : vector<8x16xf32> to vector<16xf32>
    %627 = vector.shape_cast %626 : vector<16xf32> to vector<1x16xf32>
    %cst_214 = arith.constant 8.000000e+00 : f32
    %628 = vector.broadcast %cst_214 : f32 to vector<1x16xf32>
    %629 = arith.divf %627, %628 : vector<1x16xf32>
    %630 = vector.broadcast %622 : vector<1x16xf32> to vector<8x16xf32>
    %631 = arith.subf %618, %630 : vector<8x16xf32>
    %632 = vector.broadcast %93 : vector<1x16xf32> to vector<8x16xf32>
    %633 = arith.mulf %632, %631 : vector<8x16xf32>
    %cst_215 = arith.constant 9.99999974E-6 : f32
    %634 = vector.broadcast %cst_215 : f32 to vector<1x16xf32>
    %635 = arith.addf %629, %634 : vector<1x16xf32>
    %636 = math.rsqrt %635 : vector<1x16xf32>
    %637 = vector.broadcast %636 : vector<1x16xf32> to vector<8x16xf32>
    %638 = arith.mulf %633, %637 : vector<8x16xf32>
    %639 = vector.broadcast %94 : vector<1x16xf32> to vector<8x16xf32>
    %640 = arith.addf %638, %639 : vector<8x16xf32>
    %641 = arith.mulf %640, %477 : vector<8x16xf32>
    %642 = vector.shape_cast %641 : vector<8x16xf32> to vector<8x1x16xf32>
    %643 = vector.shape_cast %641 : vector<8x16xf32> to vector<8x16x1xf32>
    %644 = vector.broadcast %642 : vector<8x1x16xf32> to vector<8x16x16xf32>
    %645 = vector.broadcast %643 : vector<8x16x1xf32> to vector<8x16x16xf32>
    %646 = arith.cmpf oge, %644, %645 : vector<8x16x16xf32>
    %647 = arith.extui %646 : vector<8x16x16xi1> to vector<8x16x16xi32>
    %648 = arith.sitofp %647 : vector<8x16x16xi32> to vector<8x16x16xf32>
    %cst_216 = arith.constant dense<0.000000e+00> : vector<8x16xf32>
    %649 = vector.multi_reduction <add>, %648, %cst_216 [2] : vector<8x16x16xf32> to vector<8x16xf32>
    %650 = vector.shape_cast %641 : vector<8x16xf32> to vector<8x1x16xf32>
    %651 = vector.broadcast %650 : vector<8x1x16xf32> to vector<8x16x16xf32>
    %652 = arith.mulf %651, %648 : vector<8x16x16xf32>
    %cst_217 = arith.constant dense<0.000000e+00> : vector<8x16xf32>
    %653 = vector.multi_reduction <add>, %652, %cst_217 [2] : vector<8x16x16xf32> to vector<8x16xf32>
    %654 = arith.mulf %649, %641 : vector<8x16xf32>
    %cst_218 = arith.constant 1.000000e+00 : f32
    %655 = vector.broadcast %cst_218 : f32 to vector<8x16xf32>
    %656 = arith.addf %655, %654 : vector<8x16xf32>
    %657 = arith.cmpf ogt, %656, %653 : vector<8x16xf32>
    %cst_219 = arith.constant 1.000000e+00 : f32
    %658 = vector.broadcast %cst_219 : f32 to vector<8x16xf32>
    %659 = arith.subf %653, %658 : vector<8x16xf32>
    %660 = arith.divf %659, %649 : vector<8x16xf32>
    %cst_220 = arith.constant 0xFF800000 : f32
    %661 = vector.broadcast %cst_220 : f32 to vector<8x16xf32>
    %662 = arith.select %657, %660, %661 : vector<8x16xi1>, vector<8x16xf32>
    %cst_221 = arith.constant dense<0xFF800000> : vector<8xf32>
    %663 = vector.multi_reduction <maximumf>, %662, %cst_221 [1] : vector<8x16xf32> to vector<8xf32>
    %664 = vector.shape_cast %663 : vector<8xf32> to vector<8x1xf32>
    %665 = vector.broadcast %664 : vector<8x1xf32> to vector<8x16xf32>
    %666 = arith.subf %641, %665 : vector<8x16xf32>
    %cst_222 = arith.constant 0.000000e+00 : f32
    %667 = vector.broadcast %cst_222 : f32 to vector<8x16xf32>
    %668 = arith.maximumf %666, %667 : vector<8x16xf32>
    %c2 = arith.constant 2 : index
    %c0_223 = arith.constant 0 : index
    %c0_224 = arith.constant 0 : index
    %669 = vector.load %arg41[%c2, %c0_223, %c0_224] : memref<3x8x16xf32, #tpu.memory_space<vmem>>, vector<1x8x16xf32>
    %670 = vector.shape_cast %669 : vector<1x8x16xf32> to vector<8x16xf32>
    %671 = vector.shape_cast %668 : vector<8x16xf32> to vector<1x8x16xf32>
    tpu.vector_store %arg41[%c2, %c0_223, %c0_224], %671 {strides = array<i32>} : memref<3x8x16xf32, #tpu.memory_space<vmem>>, vector<1x8x16xf32>,
    %cst_225 = arith.constant 5.000000e-01 : f32
    %672 = math.sqrt %cst_225 : f32
    %cst_226 = arith.constant dense<0.000000e+00> : vector<8x16xf32>
    %673 = tpu.matmul %668, %62, %cst_226 {dimension_numbers = #tpu.dot_dimension_numbers<[1], [0], [0], [1], [0, 0, 1, 1], [], []>} : vector<8x16xf32>, vector<16x16xf32>, vector<8x16xf32> -> vector<8x16xf32>
    %cst_227 = arith.constant dense<0.000000e+00> : vector<16xf32>
    %674 = vector.multi_reduction <add>, %673, %cst_227 [0] : vector<8x16xf32> to vector<16xf32>
    %675 = vector.shape_cast %674 : vector<16xf32> to vector<1x16xf32>
    %cst_228 = arith.constant 8.000000e+00 : f32
    %676 = vector.broadcast %cst_228 : f32 to vector<1x16xf32>
    %677 = arith.divf %675, %676 : vector<1x16xf32>
    %678 = vector.broadcast %677 : vector<1x16xf32> to vector<8x16xf32>
    %679 = arith.subf %673, %678 : vector<8x16xf32>
    %680 = arith.mulf %679, %679 : vector<8x16xf32>
    %cst_229 = arith.constant dense<0.000000e+00> : vector<16xf32>
    %681 = vector.multi_reduction <add>, %680, %cst_229 [0] : vector<8x16xf32> to vector<16xf32>
    %682 = vector.shape_cast %681 : vector<16xf32> to vector<1x16xf32>
    %cst_230 = arith.constant 8.000000e+00 : f32
    %683 = vector.broadcast %cst_230 : f32 to vector<1x16xf32>
    %684 = arith.divf %682, %683 : vector<1x16xf32>
    %685 = vector.broadcast %677 : vector<1x16xf32> to vector<8x16xf32>
    %686 = arith.subf %673, %685 : vector<8x16xf32>
    %687 = vector.broadcast %63 : vector<1x16xf32> to vector<8x16xf32>
    %688 = arith.mulf %687, %686 : vector<8x16xf32>
    %cst_231 = arith.constant 9.99999974E-6 : f32
    %689 = vector.broadcast %cst_231 : f32 to vector<1x16xf32>
    %690 = arith.addf %684, %689 : vector<1x16xf32>
    %691 = math.rsqrt %690 : vector<1x16xf32>
    %692 = vector.broadcast %691 : vector<1x16xf32> to vector<8x16xf32>
    %693 = arith.mulf %688, %692 : vector<8x16xf32>
    %694 = vector.broadcast %64 : vector<1x16xf32> to vector<8x16xf32>
    %695 = arith.addf %693, %694 : vector<8x16xf32>
    %696 = vector.extract_strided_slice %695 {offsets = [0, 0], sizes = [8, 8], strides = [1, 1]} : vector<8x16xf32> to vector<8x8xf32>
    %697 = vector.extract_strided_slice %695 {offsets = [0, 8], sizes = [8, 8], strides = [1, 1]} : vector<8x16xf32> to vector<8x8xf32>
    %698 = arith.negf %697 : vector<8x8xf32>
    %699 = math.exp %698 : vector<8x8xf32>
    %cst_232 = arith.constant 1.000000e+00 : f32
    %700 = vector.broadcast %cst_232 : f32 to vector<8x8xf32>
    %701 = arith.addf %700, %699 : vector<8x8xf32>
    %702 = arith.divf %700, %701 : vector<8x8xf32>
    %703 = arith.mulf %696, %702 : vector<8x8xf32>
    %cst_233 = arith.constant dense<0.000000e+00> : vector<8x16xf32>
    %704 = tpu.matmul %703, %65, %cst_233 {dimension_numbers = #tpu.dot_dimension_numbers<[1], [0], [0], [1], [0, 0, 1, 1], [], []>} : vector<8x8xf32>, vector<8x16xf32>, vector<8x16xf32> -> vector<8x16xf32>
    %cst_234 = arith.constant dense<0.000000e+00> : vector<16xf32>
    %705 = vector.multi_reduction <add>, %704, %cst_234 [0] : vector<8x16xf32> to vector<16xf32>
    %706 = vector.shape_cast %705 : vector<16xf32> to vector<1x16xf32>
    %cst_235 = arith.constant 8.000000e+00 : f32
    %707 = vector.broadcast %cst_235 : f32 to vector<1x16xf32>
    %708 = arith.divf %706, %707 : vector<1x16xf32>
    %709 = vector.broadcast %708 : vector<1x16xf32> to vector<8x16xf32>
    %710 = arith.subf %704, %709 : vector<8x16xf32>
    %711 = arith.mulf %710, %710 : vector<8x16xf32>
    %cst_236 = arith.constant dense<0.000000e+00> : vector<16xf32>
    %712 = vector.multi_reduction <add>, %711, %cst_236 [0] : vector<8x16xf32> to vector<16xf32>
    %713 = vector.shape_cast %712 : vector<16xf32> to vector<1x16xf32>
    %cst_237 = arith.constant 8.000000e+00 : f32
    %714 = vector.broadcast %cst_237 : f32 to vector<1x16xf32>
    %715 = arith.divf %713, %714 : vector<1x16xf32>
    %716 = vector.broadcast %708 : vector<1x16xf32> to vector<8x16xf32>
    %717 = arith.subf %704, %716 : vector<8x16xf32>
    %718 = vector.broadcast %66 : vector<1x16xf32> to vector<8x16xf32>
    %719 = arith.mulf %718, %717 : vector<8x16xf32>
    %cst_238 = arith.constant 9.99999974E-6 : f32
    %720 = vector.broadcast %cst_238 : f32 to vector<1x16xf32>
    %721 = arith.addf %715, %720 : vector<1x16xf32>
    %722 = math.rsqrt %721 : vector<1x16xf32>
    %723 = vector.broadcast %722 : vector<1x16xf32> to vector<8x16xf32>
    %724 = arith.mulf %719, %723 : vector<8x16xf32>
    %725 = vector.broadcast %67 : vector<1x16xf32> to vector<8x16xf32>
    %726 = arith.addf %724, %725 : vector<8x16xf32>
    %727 = vector.extract_strided_slice %726 {offsets = [0, 0], sizes = [8, 8], strides = [1, 1]} : vector<8x16xf32> to vector<8x8xf32>
    %728 = vector.extract_strided_slice %726 {offsets = [0, 8], sizes = [8, 8], strides = [1, 1]} : vector<8x16xf32> to vector<8x8xf32>
    %729 = arith.negf %728 : vector<8x8xf32>
    %730 = math.exp %729 : vector<8x8xf32>
    %cst_239 = arith.constant 1.000000e+00 : f32
    %731 = vector.broadcast %cst_239 : f32 to vector<8x8xf32>
    %732 = arith.addf %731, %730 : vector<8x8xf32>
    %733 = arith.divf %731, %732 : vector<8x8xf32>
    %734 = arith.mulf %727, %733 : vector<8x8xf32>
    %735 = arith.addf %703, %734 : vector<8x8xf32>
    %736 = vector.broadcast %672 : f32 to vector<8x8xf32>
    %737 = arith.mulf %735, %736 : vector<8x8xf32>
    %cst_240 = arith.constant 5.000000e-01 : f32
    %738 = math.sqrt %cst_240 : f32
    %cst_241 = arith.constant dense<0.000000e+00> : vector<8x16xf32>
    %739 = tpu.matmul %737, %86, %cst_241 {dimension_numbers = #tpu.dot_dimension_numbers<[1], [0], [0], [1], [0, 0, 1, 1], [], []>} : vector<8x8xf32>, vector<8x16xf32>, vector<8x16xf32> -> vector<8x16xf32>
    %cst_242 = arith.constant dense<0.000000e+00> : vector<16xf32>
    %740 = vector.multi_reduction <add>, %739, %cst_242 [0] : vector<8x16xf32> to vector<16xf32>
    %741 = vector.shape_cast %740 : vector<16xf32> to vector<1x16xf32>
    %cst_243 = arith.constant 8.000000e+00 : f32
    %742 = vector.broadcast %cst_243 : f32 to vector<1x16xf32>
    %743 = arith.divf %741, %742 : vector<1x16xf32>
    %744 = vector.broadcast %743 : vector<1x16xf32> to vector<8x16xf32>
    %745 = arith.subf %739, %744 : vector<8x16xf32>
    %746 = arith.mulf %745, %745 : vector<8x16xf32>
    %cst_244 = arith.constant dense<0.000000e+00> : vector<16xf32>
    %747 = vector.multi_reduction <add>, %746, %cst_244 [0] : vector<8x16xf32> to vector<16xf32>
    %748 = vector.shape_cast %747 : vector<16xf32> to vector<1x16xf32>
    %cst_245 = arith.constant 8.000000e+00 : f32
    %749 = vector.broadcast %cst_245 : f32 to vector<1x16xf32>
    %750 = arith.divf %748, %749 : vector<1x16xf32>
    %751 = vector.broadcast %743 : vector<1x16xf32> to vector<8x16xf32>
    %752 = arith.subf %739, %751 : vector<8x16xf32>
    %753 = vector.broadcast %87 : vector<1x16xf32> to vector<8x16xf32>
    %754 = arith.mulf %753, %752 : vector<8x16xf32>
    %cst_246 = arith.constant 9.99999974E-6 : f32
    %755 = vector.broadcast %cst_246 : f32 to vector<1x16xf32>
    %756 = arith.addf %750, %755 : vector<1x16xf32>
    %757 = math.rsqrt %756 : vector<1x16xf32>
    %758 = vector.broadcast %757 : vector<1x16xf32> to vector<8x16xf32>
    %759 = arith.mulf %754, %758 : vector<8x16xf32>
    %760 = vector.broadcast %88 : vector<1x16xf32> to vector<8x16xf32>
    %761 = arith.addf %759, %760 : vector<8x16xf32>
    %762 = vector.extract_strided_slice %761 {offsets = [0, 0], sizes = [8, 8], strides = [1, 1]} : vector<8x16xf32> to vector<8x8xf32>
    %763 = vector.extract_strided_slice %761 {offsets = [0, 8], sizes = [8, 8], strides = [1, 1]} : vector<8x16xf32> to vector<8x8xf32>
    %764 = arith.negf %763 : vector<8x8xf32>
    %765 = math.exp %764 : vector<8x8xf32>
    %cst_247 = arith.constant 1.000000e+00 : f32
    %766 = vector.broadcast %cst_247 : f32 to vector<8x8xf32>
    %767 = arith.addf %766, %765 : vector<8x8xf32>
    %768 = arith.divf %766, %767 : vector<8x8xf32>
    %769 = arith.mulf %762, %768 : vector<8x8xf32>
    %cst_248 = arith.constant dense<0.000000e+00> : vector<8x16xf32>
    %770 = tpu.matmul %769, %89, %cst_248 {dimension_numbers = #tpu.dot_dimension_numbers<[1], [0], [0], [1], [0, 0, 1, 1], [], []>} : vector<8x8xf32>, vector<8x16xf32>, vector<8x16xf32> -> vector<8x16xf32>
    %cst_249 = arith.constant dense<0.000000e+00> : vector<16xf32>
    %771 = vector.multi_reduction <add>, %770, %cst_249 [0] : vector<8x16xf32> to vector<16xf32>
    %772 = vector.shape_cast %771 : vector<16xf32> to vector<1x16xf32>
    %cst_250 = arith.constant 8.000000e+00 : f32
    %773 = vector.broadcast %cst_250 : f32 to vector<1x16xf32>
    %774 = arith.divf %772, %773 : vector<1x16xf32>
    %775 = vector.broadcast %774 : vector<1x16xf32> to vector<8x16xf32>
    %776 = arith.subf %770, %775 : vector<8x16xf32>
    %777 = arith.mulf %776, %776 : vector<8x16xf32>
    %cst_251 = arith.constant dense<0.000000e+00> : vector<16xf32>
    %778 = vector.multi_reduction <add>, %777, %cst_251 [0] : vector<8x16xf32> to vector<16xf32>
    %779 = vector.shape_cast %778 : vector<16xf32> to vector<1x16xf32>
    %cst_252 = arith.constant 8.000000e+00 : f32
    %780 = vector.broadcast %cst_252 : f32 to vector<1x16xf32>
    %781 = arith.divf %779, %780 : vector<1x16xf32>
    %782 = vector.broadcast %774 : vector<1x16xf32> to vector<8x16xf32>
    %783 = arith.subf %770, %782 : vector<8x16xf32>
    %784 = vector.broadcast %90 : vector<1x16xf32> to vector<8x16xf32>
    %785 = arith.mulf %784, %783 : vector<8x16xf32>
    %cst_253 = arith.constant 9.99999974E-6 : f32
    %786 = vector.broadcast %cst_253 : f32 to vector<1x16xf32>
    %787 = arith.addf %781, %786 : vector<1x16xf32>
    %788 = math.rsqrt %787 : vector<1x16xf32>
    %789 = vector.broadcast %788 : vector<1x16xf32> to vector<8x16xf32>
    %790 = arith.mulf %785, %789 : vector<8x16xf32>
    %791 = vector.broadcast %91 : vector<1x16xf32> to vector<8x16xf32>
    %792 = arith.addf %790, %791 : vector<8x16xf32>
    %793 = vector.extract_strided_slice %792 {offsets = [0, 0], sizes = [8, 8], strides = [1, 1]} : vector<8x16xf32> to vector<8x8xf32>
    %794 = vector.extract_strided_slice %792 {offsets = [0, 8], sizes = [8, 8], strides = [1, 1]} : vector<8x16xf32> to vector<8x8xf32>
    %795 = arith.negf %794 : vector<8x8xf32>
    %796 = math.exp %795 : vector<8x8xf32>
    %cst_254 = arith.constant 1.000000e+00 : f32
    %797 = vector.broadcast %cst_254 : f32 to vector<8x8xf32>
    %798 = arith.addf %797, %796 : vector<8x8xf32>
    %799 = arith.divf %797, %798 : vector<8x8xf32>
    %800 = arith.mulf %793, %799 : vector<8x8xf32>
    %801 = arith.addf %769, %800 : vector<8x8xf32>
    %802 = vector.broadcast %738 : f32 to vector<8x8xf32>
    %803 = arith.mulf %801, %802 : vector<8x8xf32>
    %804 = vector.extract_strided_slice %803 {offsets = [0, 4], sizes = [8, 4], strides = [1, 1]} : vector<8x8xf32> to vector<8x4xf32>
    %cst_255 = arith.constant 0.000000e+00 : f32
    %805 = vector.broadcast %cst_255 : f32 to vector<8x4xf32>
    %806 = arith.maximumf %804, %805 : vector<8x4xf32>
    %807 = arith.addf %617, %806 : vector<8x4xf32>
    %c0_256 = arith.constant 0 : index
    %c0_257 = arith.constant 0 : index
    %808 = vector.load %arg38[%c0_256, %c0_257] : memref<4x3xf32, #tpu.memory_space<vmem>>, vector<4x3xf32>
    %cst_258 = arith.constant dense<0.000000e+00> : vector<8x3xf32>
    %809 = tpu.matmul %807, %808, %cst_258 {dimension_numbers = #tpu.dot_dimension_numbers<[1], [0], [0], [1], [0, 0, 1, 1], [], []>} : vector<8x4xf32>, vector<4x3xf32>, vector<8x3xf32> -> vector<8x3xf32>
    %c0_259 = arith.constant 0 : index
    %c0_260 = arith.constant 0 : index
    %810 = vector.load %arg39[%c0_259, %c0_260] : memref<1x3xf32, #tpu.memory_space<vmem>>, vector<1x3xf32>
    %811 = vector.broadcast %810 : vector<1x3xf32> to vector<8x3xf32>
    %812 = arith.addf %809, %811 : vector<8x3xf32>
    %c0_261 = arith.constant 0 : index
    %c0_262 = arith.constant 0 : index
    %813 = vector.load %arg40[%c0_261, %c0_262] : memref<8x3xf32, #tpu.memory_space<vmem>>, vector<8x3xf32>
    tpu.vector_store %arg40[%c0_261, %c0_262], %812 {strides = array<i32>} : memref<8x3xf32, #tpu.memory_space<vmem>>, vector<8x3xf32>,
    return
  }
}

</mosaic_0001>

<bundles_post_ra>
// kernel: tpu_custom_call.1
= control target key start
LH: loop header
LB: loop body
LE: loop exit
PB: predicated region body
PF: predicated region fallthrough
CT: control target
= control target key end

     0   :  { %s5692_s6 = smov 1   ;;  %s5693_s10 = smov 2   ;;  %s7047_s0 = inlined_call_operand.smem [shape: u32[42], index: -1, kind: input, shape index: {}] }
   0x1   :  { %s5759_s5 = sld [smem:[%s7047_s0]]   ;;  %s5694_s14 = smov 3  }
   0x2   :  { %s5764_s9 = sld [smem:[%s7047_s0 + %s5692_s6]]   ;;  %s5695_s18 = smov 4  }
   0x3   :  { %s5769_s13 = sld [smem:[%s7047_s0 + %s5693_s10]]   ;;  %s5696_s22 = smov 5  }
   0x4   :  { %s5774_s17 = sld [smem:[%s7047_s0 + %s5694_s14]]   ;;  %s5697_s26 = smov 6  }
   0x5   :  { %s5779_s21 = sld [smem:[%s7047_s0 + %s5695_s18]]   ;;  %s5698_s30 = smov 7  }
   0x6   :  { %s5784_s25 = sld [smem:[%s7047_s0 + %s5696_s22]]   ;;  %s5699_s4 = smov 8  }
   0x7   :  { %s5789_s29 = sld [smem:[%s7047_s0 + %s5697_s26]]   ;;  %s5700_s10 = smov 9  }
   0x8   :  { %s5794_s3 = sld [smem:[%s7047_s0 + %s5698_s30]]   ;;  %s5701_s15 = smov 10  }
   0x9   :  { %s5799_s8 = sld [smem:[%s7047_s0 + %s5699_s4]]   ;;  %s5702_s20 = smov 11  }
   0xa   :  { %s5804_s14 = sld [smem:[%s7047_s0 + %s5700_s10]]   ;;  %s5703_s26 = smov 12  }
   0xb   :  { %s5809_s19 = sld [smem:[%s7047_s0 + %s5701_s15]]   ;;  %s5704_s1 = smov 13  }
   0xc   :  { %s5814_s24 = sld [smem:[%s7047_s0 + %s5702_s20]]   ;;  %s5705_s7 = smov 14  }
   0xd   :  { %s5819_s30 = sld [smem:[%s7047_s0 + %s5703_s26]]   ;;  %s5706_s15 = smov 15  }
   0xe   :  { %s5824_s6 = sld [smem:[%s7047_s0 + %s5704_s1]]   ;;  %s5707_s22 = smov 16  }
   0xf   :  { %s5829_s12 = sld [smem:[%s7047_s0 + %s5705_s7]]   ;;  %s5708_s28 = smov 17  }
  0x10   :  { %s5834_s20 = sld [smem:[%s7047_s0 + %s5706_s15]]   ;;  %s5709_s7 = smov 18  }
  0x11   :  { %s5839_s27 = sld [smem:[%s7047_s0 + %s5707_s22]]   ;;  %s5710_s15 = smov 19  }
  0x12   :  { %s5844_s4 = sld [smem:[%s7047_s0 + %s5708_s28]]   ;;  %s5711_s22 = smov 20  }
  0x13   :  { %s5712_s28 = smov 21  }
  0x15   :  { %7058 = sst [smem:[#allocation20_spill]] %s5829_s12 }
  0x16   :  { %7059 = sst [smem:[#allocation21_spill]] %s5834_s20 }
  0x17   :  { %7060 = sst [smem:[#allocation22_spill]] %s5839_s27 }
  0x18   :  { %7061 = sst [smem:[#allocation23_spill]] %s5844_s4 }
  0x19   :  { %s5849_s12 = sld [smem:[%s7047_s0 + %s5709_s7]]   ;;  %s5713_s7 = smov 22  }
  0x1a   :  { %s5854_s20 = sld [smem:[%s7047_s0 + %s5710_s15]]   ;;  %s5714_s15 = smov 23  }
  0x1b   :  { %s5859_s27 = sld [smem:[%s7047_s0 + %s5711_s22]]   ;;  %s5715_s22 = smov 24  }
  0x1c   :  { %s5864_s4 = sld [smem:[%s7047_s0 + %s5712_s28]]   ;;  %s5716_s28 = smov 25  }
  0x1f   :  { %7062 = sst [smem:[#allocation24_spill]] %s5849_s12 }
  0x20   :  { %7063 = sst [smem:[#allocation25_spill]] %s5854_s20 }
  0x21   :  { %7064 = sst [smem:[#allocation26_spill]] %s5859_s27 }
  0x22   :  { %7065 = sst [smem:[#allocation27_spill]] %s5864_s4 }
  0x23   :  { %s5869_s12 = sld [smem:[%s7047_s0 + %s5713_s7]]   ;;  %s5717_s7 = smov 26  }
  0x24   :  { %s5874_s20 = sld [smem:[%s7047_s0 + %s5714_s15]]   ;;  %s5718_s15 = smov 27  }
  0x25   :  { %s5879_s27 = sld [smem:[%s7047_s0 + %s5715_s22]]   ;;  %s5719_s22 = smov 28  }
  0x26   :  { %s5884_s4 = sld [smem:[%s7047_s0 + %s5716_s28]]   ;;  %s5720_s28 = smov 29  }
  0x29   :  { %7066 = sst [smem:[#allocation28_spill]] %s5869_s12 }
  0x2a   :  { %7067 = sst [smem:[#allocation29_spill]] %s5874_s20 }
  0x2b   :  { %7068 = sst [smem:[#allocation30_spill]] %s5879_s27 }
  0x2c   :  { %7069 = sst [smem:[#allocation31_spill]] %s5884_s4 }
  0x2d   :  { %s5889_s12 = sld [smem:[%s7047_s0 + %s5717_s7]]   ;;  %s5721_s7 = smov 30  }
  0x2e   :  { %s5894_s20 = sld [smem:[%s7047_s0 + %s5718_s15]]   ;;  %s5722_s15 = smov 31  }
  0x2f   :  { %s5899_s27 = sld [smem:[%s7047_s0 + %s5719_s22]]   ;;  %s5723_s22 = smov 32  }
  0x30   :  { %s5904_s4 = sld [smem:[%s7047_s0 + %s5720_s28]]   ;;  %s5724_s28 = smov 33  }
  0x33   :  { %7070 = sst [smem:[#allocation32_spill]] %s5889_s12 }
  0x34   :  { %7071 = sst [smem:[#allocation33_spill]] %s5894_s20 }
  0x35   :  { %7072 = sst [smem:[#allocation34_spill]] %s5899_s27 }
  0x36   :  { %7073 = sst [smem:[#allocation35_spill]] %s5904_s4 }
  0x37   :  { %s5909_s12 = sld [smem:[%s7047_s0 + %s5721_s7]]   ;;  %s5725_s7 = smov 34  }
  0x38   :  { %s5914_s20 = sld [smem:[%s7047_s0 + %s5722_s15]]   ;;  %s5726_s15 = smov 35  }
  0x39   :  { %s5919_s27 = sld [smem:[%s7047_s0 + %s5723_s22]]   ;;  %s5727_s22 = smov 36  }
  0x3a   :  { %s5924_s4 = sld [smem:[%s7047_s0 + %s5724_s28]]   ;;  %s5728_s28 = smov 37  }
  0x3d   :  { %7074 = sst [smem:[#allocation36_spill]] %s5909_s12 }
  0x3e   :  { %7075 = sst [smem:[#allocation37_spill]] %s5914_s20 }
  0x3f   :  { %7076 = sst [smem:[#allocation38_spill]] %s5919_s27 }
  0x40   :  { %7077 = sst [smem:[#allocation39_spill]] %s5924_s4 }
  0x41   :  { %s5929_s12 = sld [smem:[%s7047_s0 + %s5725_s7]]   ;;  %s5729_s7 = smov 38  }
  0x42   :  { %s5934_s20 = sld [smem:[%s7047_s0 + %s5726_s15]]   ;;  %s5730_s15 = smov 39  }
  0x43   :  { %s5939_s27 = sld [smem:[%s7047_s0 + %s5727_s22]]   ;;  %s5731_s22 = smov 40  }
  0x44   :  { %s5944_s4 = sld [smem:[%s7047_s0 + %s5728_s28]]   ;;  %s5732_s28 = smov 41  }
  0x47   :  { %7078 = sst [smem:[#allocation40_spill]] %s5929_s12 }
  0x48   :  { %7079 = sst [smem:[#allocation41_spill]] %s5934_s20 }
  0x49   :  { %7080 = sst [smem:[#allocation42_spill]] %s5939_s27 }
  0x4a   :  { %7081 = sst [smem:[#allocation43_spill]] %s5944_s4 }
  0x4b   :  { %s5949_s12 = sld [smem:[%s7047_s0 + %s5729_s7]]  }
  0x4c   :  { %s5954_s20 = sld [smem:[%s7047_s0 + %s5730_s15]]  }
  0x4d   :  { %s5959_s27 = sld [smem:[%s7047_s0 + %s5731_s22]]  }
  0x4e   :  { %s5964_s4 = sld [smem:[%s7047_s0 + %s5732_s28]]  }
  0x4f   :  { %89 = vsyncpa [#allocation3], 0 }
  0x50   :  { %90 = vsyncpa [#allocation6], 0 }
  0x51   :  { %91 = vsyncpa [#allocation9], 0 }
  0x52   :  { %92 = vsyncpa [#allocation12], 0 }
  0x53   :  { %93 = vsyncpa [#allocation4], 0  ;;  %s5733_s7 = smov [#allocation5]   ;;  %s5734_s11 = smov [#allocation8]  }
  0x54   :  { %s120_s10 = sshll.u32 %s5733_s7, 4  ;;  %s142_s15 = sshll.u32 %s5734_s11, 4  ;;  %s121_s10 = int_to_ptr.vmem [resolvable:$true] %s120_s10  ;;  %s143_s15 = int_to_ptr.vmem [resolvable:$true] %s142_s15 }
  0x55   :  { %s5506_s16 = scalar_lea.hbm %s5789_s29, 16 }
  0x56   :  { %p5507_p0 = scmp.ne.s32.totalorder %s5789_s29, %s5506_s16  ;;  %p5510_p1 = scmp.lt.u32.totalorder %s5506_s16, %s5789_s29 }
  0x58   :  { %p5512_p2 = pnand %p5510_p1, %p5507_p0 }
  0x5a   :  { %5515 = shalt.err (!%p5512_p2)
}
  0x5b   :  { %s5516_s0 = scalar_lea.vmem %s121_s10, 16  ;;  %s5520_s18 = scalar_lea.vmem %s121_s10, 32 }
  0x5c   :  { %p5517_p3 = scmp.ne.s32.totalorder %s121_s10, %s5516_s0  ;;  %p5521_p4 = scmp.lt.s32.totalorder %s121_s10, %s121_s10 }
  0x5d   :  { %p5522_p5 = scmp.lt.s32.totalorder %s5520_s18, %s5516_s0 }
  0x5f   :  { %p5523_p6 = por %p5522_p5, %p5521_p4 }
  0x61   :  { %p5524_p7 = pnand %p5523_p6, %p5517_p3 }
  0x63   :  { %5527 = shalt.err (!%p5524_p7)
}
  0x64   :  { %123 = dma.hbm_to_vmem [thread:$0]  %s5789_s29, 16, %s121_s10, [#allocation6]  }
  0x65   :  { %s5528_s22 = scalar_lea.hbm %s5804_s14, 16 }
  0x66   :  { %p5529_p8 = scmp.ne.s32.totalorder %s5804_s14, %s5528_s22  ;;  %p5532_p9 = scmp.lt.u32.totalorder %s5528_s22, %s5804_s14 }
  0x68   :  { %p5534_p10 = pnand %p5532_p9, %p5529_p8 }
  0x6a   :  { %5537 = shalt.err (!%p5534_p10)
}
  0x6b   :  { %s5538_s23 = scalar_lea.vmem %s143_s15, 16  ;;  %s5542_s26 = scalar_lea.vmem %s143_s15, 32 }
  0x6c   :  { %p5539_p11 = scmp.ne.s32.totalorder %s143_s15, %s5538_s23  ;;  %p5543_p12 = scmp.lt.s32.totalorder %s143_s15, %s143_s15 }
  0x6d   :  { %p5544_p13 = scmp.lt.s32.totalorder %s5542_s26, %s5538_s23 }
  0x6f   :  { %p5545_p0 = por %p5544_p13, %p5543_p12 }
  0x71   :  { %p5546_p1 = pnand %p5545_p0, %p5539_p11 }
  0x73   :  { %5549 = shalt.err (!%p5546_p1)
}
  0x74   :  { %145 = dma.hbm_to_vmem [thread:$0]  %s5804_s14, 16, %s143_s15, [#allocation9]  }
  0x75   :  { %s5735_s28 = smov [#allocation11]   ;;  %s5736_s1 = smov [#allocation2]  }
  0x76   :  { %s164_s29 = sshll.u32 %s5735_s28, 4  ;;  %s108_s2 = sshll.u32 %s5736_s1, 4  ;;  %s165_s29 = int_to_ptr.vmem [resolvable:$true] %s164_s29  ;;  %s109_s2 = int_to_ptr.vmem [resolvable:$true] %s108_s2 }
  0x77   :  { %s5550_s7 = scalar_lea.hbm %s5819_s30, 16 }
  0x78   :  { %p5551_p2 = scmp.ne.s32.totalorder %s5819_s30, %s5550_s7  ;;  %p5554_p3 = scmp.lt.u32.totalorder %s5550_s7, %s5819_s30 }
  0x7a   :  { %p5556_p4 = pnand %p5554_p3, %p5551_p2 }
  0x7c   :  { %5559 = shalt.err (!%p5556_p4)
}
  0x7d   :  { %s5560_s10 = scalar_lea.vmem %s165_s29, 16  ;;  %s5564_s11 = scalar_lea.vmem %s165_s29, 32 }
  0x7e   :  { %p5561_p5 = scmp.ne.s32.totalorder %s165_s29, %s5560_s10  ;;  %p5565_p6 = scmp.lt.s32.totalorder %s165_s29, %s165_s29 }
  0x7f   :  { %p5566_p7 = scmp.lt.s32.totalorder %s5564_s11, %s5560_s10 }
  0x81   :  { %p5567_p8 = por %p5566_p7, %p5565_p6 }
  0x83   :  { %p5568_p9 = pnand %p5567_p8, %p5561_p5 }
  0x85   :  { %5571 = shalt.err (!%p5568_p9)
}
  0x86   :  { %167 = dma.hbm_to_vmem [thread:$0]  %s5819_s30, 16, %s165_s29, [#allocation12]  }
  0x87   :  { %s5572_s14 = scalar_lea.hbm %s5779_s21, 16 }
  0x88   :  { %p5573_p10 = scmp.ne.s32.totalorder %s5779_s21, %s5572_s14  ;;  %p5576_p11 = scmp.lt.u32.totalorder %s5572_s14, %s5779_s21 }
  0x8a   :  { %p5578_p12 = pnand %p5576_p11, %p5573_p10 }
  0x8c   :  { %5581 = shalt.err (!%p5578_p12)
}
  0x8d   :  { %s5582_s15 = scalar_lea.vmem %s109_s2, 16  ;;  %s5586_s16 = scalar_lea.vmem %s109_s2, 32 }
  0x8e   :  { %p5583_p13 = scmp.ne.s32.totalorder %s109_s2, %s5582_s15  ;;  %p5587_p0 = scmp.lt.s32.totalorder %s109_s2, %s109_s2 }
  0x8f   :  { %p5588_p1 = scmp.lt.s32.totalorder %s5586_s16, %s5582_s15 }
  0x91   :  { %p5589_p2 = por %p5588_p1, %p5587_p0 }
  0x93   :  { %p5590_p3 = pnand %p5589_p2, %p5583_p13 }
  0x95   :  { %5593 = shalt.err (!%p5590_p3)
}
  0x96   :  { %111 = dma.hbm_to_vmem [thread:$0]  %s5779_s21, 16, %s109_s2, [#allocation3]  }
  0x97   :  { %s5737_s0 = smov [#allocation7]   ;;  %s5738_s18 = smov [#allocation10]  }
  0x98   :  { %s130_s30 = sshll.u32 %s5737_s0, 4  ;;  %s152_s22 = sshll.u32 %s5738_s18, 4  ;;  %s131_s30 = int_to_ptr.vmem [resolvable:$true] %s130_s30  ;;  %s153_s22 = int_to_ptr.vmem [resolvable:$true] %s152_s22 }
  0x99   :  { %s5594_s23 = scalar_lea.hbm %s5794_s3, 16 }
  0x9a   :  { %p5595_p4 = scmp.ne.s32.totalorder %s5794_s3, %s5594_s23  ;;  %p5598_p5 = scmp.lt.u32.totalorder %s5594_s23, %s5794_s3 }
  0x9c   :  { %p5600_p6 = pnand %p5598_p5, %p5595_p4 }
  0x9e   :  { %5603 = shalt.err (!%p5600_p6)
}
  0x9f   :  { %s5604_s26 = scalar_lea.vmem %s131_s30, 16  ;;  %s5608_s28 = scalar_lea.vmem %s131_s30, 32 }
  0xa0   :  { %p5605_p7 = scmp.ne.s32.totalorder %s131_s30, %s5604_s26  ;;  %p5609_p8 = scmp.lt.s32.totalorder %s131_s30, %s131_s30 }
  0xa1   :  { %p5610_p9 = scmp.lt.s32.totalorder %s5608_s28, %s5604_s26 }
  0xa3   :  { %p5611_p10 = por %p5610_p9, %p5609_p8 }
  0xa5   :  { %p5612_p11 = pnand %p5611_p10, %p5605_p7 }
  0xa7   :  { %5615 = shalt.err (!%p5612_p11)
}
  0xa8   :  { %133 = dma.hbm_to_vmem [thread:$0]  %s5794_s3, 16, %s131_s30, [#allocation6]  }
  0xa9   :  { %s5616_s21 = scalar_lea.hbm %s5809_s19, 16 }
  0xaa   :  { %p5617_p12 = scmp.ne.s32.totalorder %s5809_s19, %s5616_s21  ;;  %p5620_p13 = scmp.lt.u32.totalorder %s5616_s21, %s5809_s19 }
  0xac   :  { %p5622_p0 = pnand %p5620_p13, %p5617_p12 }
  0xae   :  { %5625 = shalt.err (!%p5622_p0)
}
  0xaf   :  { %s5626_s29 = scalar_lea.vmem %s153_s22, 16  ;;  %s5630_s1 = scalar_lea.vmem %s153_s22, 32 }
  0xb0   :  { %p5627_p1 = scmp.ne.s32.totalorder %s153_s22, %s5626_s29  ;;  %p5631_p2 = scmp.lt.s32.totalorder %s153_s22, %s153_s22 }
  0xb1   :  { %p5632_p3 = scmp.lt.s32.totalorder %s5630_s1, %s5626_s29 }
  0xb3   :  { %p5633_p4 = por %p5632_p3, %p5631_p2 }
  0xb5   :  { %p5634_p5 = pnand %p5633_p4, %p5627_p1 }
  0xb7   :  { %5637 = shalt.err (!%p5634_p5)
}
  0xb8   :  { %155 = dma.hbm_to_vmem [thread:$0]  %s5809_s19, 16, %s153_s22, [#allocation9]  }
  0xb9   :  { %s5739_s2 = smov [#allocation13]   ;;  %s5638_s7 = scalar_lea.hbm %s5824_s6, 16 }
  0xba   :  { %s174_s3 = sshll.u32 %s5739_s2, 4  ;;  %p5639_p6 = scmp.ne.s32.totalorder %s5824_s6, %s5638_s7  ;;  %s175_s3 = int_to_ptr.vmem [resolvable:$true] %s174_s3 }
  0xbb   :  { %p5642_p7 = scmp.lt.u32.totalorder %s5638_s7, %s5824_s6 }
  0xbd   :  { %p5644_p8 = pnand %p5642_p7, %p5639_p6 }
  0xbf   :  { %5647 = shalt.err (!%p5644_p8)
}
  0xc0   :  { %s5648_s10 = scalar_lea.vmem %s175_s3, 16  ;;  %s5652_s11 = scalar_lea.vmem %s175_s3, 32 }
  0xc1   :  { %p5649_p9 = scmp.ne.s32.totalorder %s175_s3, %s5648_s10  ;;  %p5653_p10 = scmp.lt.s32.totalorder %s175_s3, %s175_s3 }
  0xc2   :  { %p5654_p11 = scmp.lt.s32.totalorder %s5652_s11, %s5648_s10 }
  0xc4   :  { %p5655_p12 = por %p5654_p11, %p5653_p10 }
  0xc6   :  { %p5656_p13 = pnand %p5655_p12, %p5649_p9 }
  0xc8   :  { %5659 = shalt.err (!%p5656_p13)
}
  0xc9   :  { %177 = dma.hbm_to_vmem [thread:$0]  %s5824_s6, 16, %s175_s3, [#allocation12]  }
  0xca   :  { %5682 = dma.done.wait [#allocation3], 16  }
  0xcb   :  { %5683 = vsyncadd [#allocation3], 4294967280 }
  0xcc   :  { %5684 = dma.done.wait [#allocation6], 32  }
  0xcd   :  { %5685 = vsyncadd [#allocation6], 4294967264 }
  0xce   :  { %5686 = dma.done.wait [#allocation9], 32  }
  0xcf   :  { %5687 = vsyncadd [#allocation9], 4294967264 }
  0xd0   :  { %5688 = dma.done.wait [#allocation12], 32  }
  0xd1   :  { %5689 = vsyncadd [#allocation12], 4294967264  ;;  %v5740_v0 = vmov 0   ;;  %v253_v1 = vld [vmem:[%s5759_s5] sm:$0xff]  ;;  %v5741_v5 = vmov 1   ;;  %v287_v7 = vld [vmem:[%s5769_s13 + $0x8] sm:$0xff]  ;;  %v251_v12 = vlaneseq }
  0xd2   :  { %5280 = vset.pattern.permute.xlu0 %v5740_v0  ;;  %5282 = vset.pattern.permute.xlu1 %v5740_v0  ;;  %v254_v2 = vld [vmem:[%s5764_s9] sm:$0xff]  ;;  %v7053_v9 = vmov 0.0|0.0   ;;  %v7054_v10 = vmov 0.0   ;;  %v288_v11 = vld [vmem:[%s5769_s13 + $0x10] sm:$0xff]  ;;  %vm5744_vm0 = vmmov 0   ;;  %vm289_vm5 = vcmask 195584  }
  0xd3   :  { %258 = vperm.xlu0 %5280, %v253_v1   ;;  %v270_v3 = vadd.s32 2, %v254_v2  ;;  %v278_v4 = vadd.s32 12, %v254_v2  ;;  %v286_v6 = vld [vmem:[%s5769_s13] sm:$0xff]  ;;  %5206 = vmatprep.subr.bf16.mxu0 %v7053_v9  ;;  %v6008_v13 = vand.u32 127, %v251_v12  ;;  %v403_v26 = vld [vmem:[%s5784_s25 + $0x8] sm:$0xff]  ;;  %vm365_vm6 = vcmask 130048  }
  0xd4   :  { %v5207_v8 = vpack.c.bf16 %v287_v7, %v286_v6  ;;  %5209 = vmatprep.subr.bf16.mxu1 %v7053_v9  ;;  %5095 = vmatprep.mubr.msk.f32.mxu0 %vm5744_vm0, %v7054_v10  ;;  %v402_v25 = vld [vmem:[%s5784_s25] sm:$0xff]  ;;  %v4881_v52 = vld [vmem:[#allocation2] ss:$0 sm:$0xff]  ;;  %s5745_s5 = smov 120   ;;  %vm555_vm7 = vcmask 64512   ;;  %s7082_s9 = sld [smem:[#allocation20_spill]] }
  0xd5   :  { %272 = vperm.xlu1 %5282, %v270_v3   ;;  %5102 = vmatprep.mubr.msk.f32.mxu1 %vm5744_vm0, %v7054_v10  ;;  %vm255_vm1 = vcmp.eq.s32.totalorder %v6008_v13, 0  ;;  %vm263_vm2 = vcmp.eq.s32.totalorder %v6008_v13, 1  ;;  %v6020_v27 = vpack.c.bf16 %v403_v26, %v402_v25  ;;  %v4880_v49 = vld [vmem:[%s5774_s17] ss:$0 sm:$0xff]  ;;  %s7083_s13 = sld [smem:[#allocation21_spill]]  ;;  %s7084_s17 = sld [smem:[#allocation22_spill]] }
  0xd6   :  { %5208 = vmatpush3.bf16.msra.mxu0 %v5207_v8  ;;  %v6031_v55 = vld [vmem:[%s5799_s8] sm:$0xff]  ;;  %s7085_s25 = sld [smem:[#allocation41_spill]]  ;;  %vm921_vm8 = vcmask 1043456   ;;  %vm7051_vm9 = vcmask 31744   ;;  %s7086_s19 = sld [smem:[#allocation42_spill]] }
  0xd7   :  { %5281 = vset.pattern.permute.xlu0 %v5741_v5  ;;  %5093 = vmatprep.subr.mxu0 %v7054_v10  ;;  %s7089_s6 = sld [smem:[#allocation23_spill]]  ;;  %s7090_s14 = sld [smem:[#allocation26_spill]] }
  0xd8   :  { %265 = vperm.xlu0 %5281, %v253_v1   ;;  %5211 = vmatpush3.bf16.msra.mxu1 %v6020_v27  ;;  %s7091_s15 = sld [smem:[#allocation24_spill]]  ;;  %s7092_s16 = sld [smem:[#allocation25_spill]] }
  0xd9   :  { %5283 = vset.pattern.permute.xlu1 %v5741_v5  ;;  %5105 = vmatprep.subr.mxu1 %v7054_v10  ;;  %s7093_s0 = sld [smem:[#allocation27_spill]]  ;;  %s7094_s30 = sld [smem:[#allocation28_spill]] }
  0xda   :  { %280 = vperm.xlu1 %5283, %v278_v4   ;;  %5094 = vmatpush3.msra.mxu0 %v288_v11  ;;  %s7096_s18 = sld [smem:[#allocation29_spill]]  ;;  %s7097_s22 = sld [smem:[#allocation32_spill]] }
  0xdb   :  { %5110 = vmatprep.subr.mxu0 %v7054_v10  ;;  %s7099_s23 = sld [smem:[#allocation30_spill]]  ;;  %s7100_s26 = sld [smem:[#allocation31_spill]] }
  0xdc   :  { %5285 = vset.pattern.permute.xlu0 %v5740_v0  ;;  %s7101_s28 = sld [smem:[#allocation33_spill]]  ;;  %s7102_s21 = sld [smem:[#allocation34_spill]] }
  0xdd   :  { %s7107_s29 = sld [smem:[#allocation38_spill]]  ;;  %s7108_s1 = sld [smem:[#allocation36_spill]] }
  0xde   :  { %5284 = vset.pattern.permute.xlu1 %v5740_v0  ;;  %s7109_s2 = sld [smem:[#allocation37_spill]]  ;;  %s7110_s3 = sld [smem:[#allocation39_spill]] }
  0xdf   :  { %s7111_s7 = sld [smem:[#allocation40_spill]]  ;;  %s5747_s10 = smov 124  }
  0xe0   :  { %s5748_s11 = smov [#allocation14]  }
 0x152   :  { %v259_v14 = vpop.permute.xlu0 %258 }
 0x153   :  { %v261_v17 = vsel %vm255_vm1, %v259_v14, 0.0 }
 0x154   :  { %v273_v15 = vpop.permute.xlu1 %272 }
 0x155   :  { %vm274_vm3 = vcmp.eq.s32.totalorder %v6008_v13, %v273_v15 }
 0x156   :  { %v4877_v21 = vsel %vm274_vm3, 1.0, %v7054_v10 }
 0x157   :  { %v266_v16 = vpop.permute.xlu0 %265 }
 0x158   :  { %v268_v18 = vsel %vm263_vm2, %v266_v16, 0.0 }
 0x159   :  { %v269_v19 = vadd.f32 %v268_v18, %v261_v17  ;;  %v281_v20 = vpop.permute.xlu1 %280  ;;  %v4883_v17 = vld [vmem:[#allocation5] ss:$0 sm:$0xff] }
 0x15a   :  { %vm282_vm4 = vcmp.eq.s32.totalorder %v6008_v13, %v281_v20  ;;  %v4884_v20 = vld [vmem:[#allocation7] ss:$0 sm:$0xff] }
 0x15b   :  { %v277_v22 = vadd.f32 %v4877_v21, %v269_v19  ;;  %v4878_v23 = vsel %vm282_vm4, 1.0, %v7054_v10 }
 0x15d   :  { %v285_v24 = vadd.f32 %v4878_v23, %v277_v22 }
 0x15f   :  { %5096 = vmatmul.mubr.msk.f32.vlgmr.msra.gmra.mrb[0].mxu0 %vm289_vm5, %v285_v24 }
 0x160   :  { %5112 = vmatprep.mubr.msk.f32.mxu0 %vm5744_vm0, %v7054_v10 }
 0x232   :  { %v359_v28 = vpop.f32.mrb[0].mxu0 }
 0x233   :  { %v366_v29 = vsel %vm365_vm6, %v359_v28, 0.0  ;;  %v5097_v30 = vpop.f32.mrb[1].mxu0 }
 0x234   :  { %v367_v31 = vrot.slane %v366_v29, 4 }
 0x236   :  { %v368_v32 = vadd.f32 %v367_v31, %v366_v29 }
 0x238   :  { %v369_v33 = vrot.slane %v368_v32, 2 }
 0x23a   :  { %v370_v34 = vadd.f32 %v369_v33, %v368_v32 }
 0x23c   :  { %v371_v35 = vrot.slane %v370_v34, 1 }
 0x23e   :  { %v372_v36 = vadd.f32 %v371_v35, %v370_v34 }
 0x240   :  { %v374_v37 = vmul.f32 0.125, %v372_v36 }
 0x242   :  { %v375_v38 = vsub.f32 %v359_v28, %v374_v37 }
 0x244   :  { %v376_v39 = vmul.f32 %v375_v38, %v375_v38  ;;  %v391_v50 = vmul.f32 %v4880_v49, %v375_v38 }
 0x246   :  { %v377_v40 = vsel %vm365_vm6, %v376_v39, 0.0 }
 0x247   :  { %v378_v41 = vrot.slane %v377_v40, 4 }
 0x249   :  { %v379_v42 = vadd.f32 %v378_v41, %v377_v40 }
 0x24b   :  { %v380_v43 = vrot.slane %v379_v42, 2 }
 0x24d   :  { %v381_v44 = vadd.f32 %v380_v43, %v379_v42 }
 0x24f   :  { %v382_v45 = vrot.slane %v381_v44, 1 }
 0x251   :  { %v383_v46 = vadd.f32 %v382_v45, %v381_v44 }
 0x253   :  { %v384_v47 = vmul.f32 0.125, %v383_v46 }
 0x255   :  { %v392_v48 = vadd.f32 1e-05, %v384_v47 }
 0x257   :  { %5286 = vrsqrt.f32 %v392_v48 }
 0x261   :  { %v5287_v51 = vpop.eup %5286 }
 0x262   :  { %v394_v53 = vmul.f32 %v5287_v51, %v391_v50  ;;  %v4887_v51 = vld [vmem:[#allocation8] ss:$0 sm:$0xff] }
 0x264   :  { %v401_v54 = vadd.f32 %v4881_v52, %v394_v53 }
 0x266   :  { %5103 = vmatmul.mubr.msk.f32.vlgmr.msra.gmra.mrb[0].mxu1 %vm365_vm6, %v401_v54  ;;  %v4888_v54 = vld [vmem:[#allocation10] ss:$0 sm:$0xff] }
 0x267   :  { %5107 = vmatprep.mubr.msk.f32.mxu1 %vm5744_vm0, %v7054_v10  ;;  %5106 = vmatpush3.msra.mxu1 %v6031_v55 }
 0x268   :  { %5115 = vmatprep.subr.mxu1 %v7054_v10 }
 0x339   :  { %v505_v56 = vpop.f32.mrb[0].mxu1 }
 0x33a   :  { %v509_v57 = vsel %vm365_vm6, %v505_v56, 0.0  ;;  %v5104_v58 = vpop.f32.mrb[1].mxu1 }
 0x33b   :  { %v510_v59 = vrot.slane %v509_v57, 4 }
 0x33d   :  { %v511_v60 = vadd.f32 %v510_v59, %v509_v57 }
 0x33f   :  { %v512_v61 = vrot.slane %v511_v60, 2 }
 0x341   :  { %v513_v62 = vadd.f32 %v512_v61, %v511_v60  ;;  %v409_v61 = vld [vmem:[%s5814_s24] sm:$0xff]  ;;  %s7087_s24 = sld [smem:[#allocation43_spill]] }
 0x342   :  { %5111 = vmatpush3.msra.mxu0 %v409_v61 }
 0x343   :  { %v514_v63 = vrot.slane %v513_v62, 1  ;;  %5120 = vmatprep.subr.mxu0 %v7054_v10 }
 0x345   :  { %v515_v0 = vadd.f32 %v514_v63, %v513_v62 }
 0x347   :  { %v516_v1 = vmul.f32 0.125, %v515_v0 }
 0x349   :  { %v517_v2 = vsub.f32 %v505_v56, %v516_v1 }
 0x34b   :  { %v518_v3 = vmul.f32 %v517_v2, %v517_v2  ;;  %v533_v18 = vmul.f32 %v4883_v17, %v517_v2 }
 0x34d   :  { %v519_v4 = vsel %vm365_vm6, %v518_v3, 0.0  ;;  %v412_v3 = vld [vmem:[%s7082_s9] sm:$0xff]  ;;  %s4819_s9 = sshll.u32 %s5748_s11, 4  ;;  %s4820_s9 = int_to_ptr.vmem [resolvable:$true] %s4819_s9 }
 0x34e   :  { %v520_v5 = vrot.slane %v519_v4, 4  ;;  %p5665_p1 = scmp.lt.s32.totalorder %s4820_s9, %s4820_s9 }
 0x350   :  { %v521_v6 = vadd.f32 %v520_v5, %v519_v4 }
 0x352   :  { %v522_v7 = vrot.slane %v521_v6, 2 }
 0x354   :  { %v523_v8 = vadd.f32 %v522_v7, %v521_v6 }
 0x356   :  { %v524_v11 = vrot.slane %v523_v8, 1 }
 0x358   :  { %v525_v14 = vadd.f32 %v524_v11, %v523_v8 }
 0x35a   :  { %v526_v15 = vmul.f32 0.125, %v525_v14 }
 0x35c   :  { %v534_v16 = vadd.f32 1e-05, %v526_v15 }
 0x35e   :  { %5288 = vrsqrt.f32 %v534_v16 }
 0x368   :  { %v5289_v19 = vpop.eup %5288 }
 0x369   :  { %v536_v21 = vmul.f32 %v5289_v19, %v533_v18 }
 0x36b   :  { %v543_v22 = vadd.f32 %v4884_v20, %v536_v21 }
 0x36d   :  { %v4885_v23 = vmul.f32 -1.442695, %v543_v22 }
 0x36f   :  { %5290 = vpow2.f32 %v4885_v23 }
 0x379   :  { %v5291_v24 = vpop.eup %5290 }
 0x37a   :  { %v547_v25 = vadd.f32 1.0, %v5291_v24 }
 0x37c   :  { %5292 = vrcp.f32 %v547_v25 }
 0x386   :  { %v5293_v26 = vpop.eup %5292 }
 0x387   :  { %551 = vrot.lane.b32.xlu1 %v5293_v26, %s5745_s5 }
 0x3f9   :  { %v552_v28 = vpop.permute.xlu1 %551 }
 0x3fa   :  { %v554_v29 = vmul.f32 %v552_v28, %v543_v22 }
 0x3fc   :  { %5108 = vmatmul.mubr.msk.f32.vlgmr.msra.gmra.mrb[2].mxu1 %vm555_vm7, %v554_v29 }
 0x3fd   :  { %5117 = vmatprep.mubr.msk.f32.mxu1 %vm5744_vm0, %v7054_v10  ;;  %5116 = vmatpush3.msra.mxu1 %v412_v3  ;;  %v4896_v3 = vld [vmem:[%s7084_s17] ss:$0 sm:$0xff] }
 0x3fe   :  { %5212 = vmatprep.subr.bf16.mxu1 %v7053_v9 }
 0x4cf   :  { %v625_v30 = vpop.f32.mrb[2].mxu1 }
 0x4d0   :  { %v629_v31 = vsel %vm365_vm6, %v625_v30, 0.0  ;;  %v5109_v32 = vpop.f32.mrb[3].mxu1 }
 0x4d1   :  { %v630_v33 = vrot.slane %v629_v31, 4 }
 0x4d3   :  { %v631_v34 = vadd.f32 %v630_v33, %v629_v31  ;;  %v4892_v33 = vld [vmem:[#allocation13] ss:$0 sm:$0xff] }
 0x4d5   :  { %v632_v35 = vrot.slane %v631_v34, 2 }
 0x4d7   :  { %v633_v36 = vadd.f32 %v632_v35, %v631_v34 }
 0x4d9   :  { %v634_v37 = vrot.slane %v633_v36, 1 }
 0x4db   :  { %v635_v38 = vadd.f32 %v634_v37, %v633_v36 }
 0x4dd   :  { %v636_v39 = vmul.f32 0.125, %v635_v38 }
 0x4df   :  { %v637_v40 = vsub.f32 %v625_v30, %v636_v39  ;;  %v4891_v30 = vld [vmem:[#allocation11] ss:$0 sm:$0xff] }
 0x4e1   :  { %v638_v41 = vmul.f32 %v637_v40, %v637_v40  ;;  %v653_v52 = vmul.f32 %v4887_v51, %v637_v40 }
 0x4e3   :  { %v639_v42 = vsel %vm365_vm6, %v638_v41, 0.0 }
 0x4e4   :  { %v640_v43 = vrot.slane %v639_v42, 4 }
 0x4e6   :  { %v641_v44 = vadd.f32 %v640_v43, %v639_v42 }
 0x4e8   :  { %v642_v45 = vrot.slane %v641_v44, 2 }
 0x4ea   :  { %v643_v46 = vadd.f32 %v642_v45, %v641_v44 }
 0x4ec   :  { %v644_v47 = vrot.slane %v643_v46, 1 }
 0x4ee   :  { %v645_v48 = vadd.f32 %v644_v47, %v643_v46 }
 0x4f0   :  { %v646_v49 = vmul.f32 0.125, %v645_v48 }
 0x4f2   :  { %v654_v50 = vadd.f32 1e-05, %v646_v49 }
 0x4f4   :  { %5294 = vrsqrt.f32 %v654_v50 }
 0x4fe   :  { %v5295_v53 = vpop.eup %5294 }
 0x4ff   :  { %v656_v56 = vmul.f32 %v5295_v53, %v653_v52 }
 0x501   :  { %v663_v57 = vadd.f32 %v4888_v54, %v656_v56 }
 0x503   :  { %v4889_v58 = vmul.f32 -1.442695, %v663_v57 }
 0x505   :  { %5296 = vpow2.f32 %v4889_v58 }
 0x50f   :  { %v5297_v59 = vpop.eup %5296 }
 0x510   :  { %v667_v60 = vadd.f32 1.0, %v5297_v59 }
 0x512   :  { %5298 = vrcp.f32 %v667_v60 }
 0x51c   :  { %v5299_v62 = vpop.eup %5298 }
 0x51d   :  { %671 = vrot.lane.b32.xlu0 %v5299_v62, %s5745_s5 }
 0x58f   :  { %v672_v63 = vpop.permute.xlu0 %671 }
 0x590   :  { %v674_v0 = vmul.f32 %v672_v63, %v663_v57 }
 0x592   :  { %v675_v1 = vadd.f32 %v674_v0, %v554_v29  ;;  %v4895_v0 = vld [vmem:[%s7083_s13] ss:$0 sm:$0xff] }
 0x594   :  { %v676_v2 = vmul.f32 0.70710677, %v675_v1 }
 0x596   :  { %5113 = vmatmul.mubr.msk.f32.vlgmr.msra.gmra.mrb[2].mxu0 %vm555_vm7, %v676_v2 }
 0x597   :  { %5122 = vmatprep.mubr.msk.f32.mxu0 %vm5744_vm0, %v7054_v10 }
 0x669   :  { %v746_v4 = vpop.f32.mrb[2].mxu0 }
 0x66a   :  { %v750_v5 = vsel %vm365_vm6, %v746_v4, 0.0  ;;  %v5114_v6 = vpop.f32.mrb[3].mxu0 }
 0x66b   :  { %v751_v7 = vrot.slane %v750_v5, 4 }
 0x66d   :  { %v752_v8 = vadd.f32 %v751_v7, %v750_v5 }
 0x66f   :  { %v753_v11 = vrot.slane %v752_v8, 2 }
 0x671   :  { %v754_v14 = vadd.f32 %v753_v11, %v752_v8  ;;  %v433_v11 = vld [vmem:[%s7085_s25] sm:$0xf] }
 0x672   :  { %5121 = vmatpush3.msk.msra.mxu0 %vm921_vm8, %v433_v11 }
 0x673   :  { %v755_v15 = vrot.slane %v754_v14, 1  ;;  %5132 = vmatprep.subr.mxu0 %v7054_v10 }
 0x675   :  { %v756_v16 = vadd.f32 %v755_v15, %v754_v14 }
 0x677   :  { %v757_v17 = vmul.f32 0.125, %v756_v16 }
 0x679   :  { %v758_v18 = vsub.f32 %v746_v4, %v757_v17 }
 0x67b   :  { %v759_v19 = vmul.f32 %v758_v18, %v758_v18  ;;  %v774_v31 = vmul.f32 %v4891_v30, %v758_v18 }
 0x67d   :  { %v760_v20 = vsel %vm365_vm6, %v759_v19, 0.0 }
 0x67e   :  { %v761_v21 = vrot.slane %v760_v20, 4 }
 0x680   :  { %v762_v22 = vadd.f32 %v761_v21, %v760_v20 }
 0x682   :  { %v763_v23 = vrot.slane %v762_v22, 2 }
 0x684   :  { %v764_v24 = vadd.f32 %v763_v23, %v762_v22 }
 0x686   :  { %v765_v25 = vrot.slane %v764_v24, 1 }
 0x688   :  { %v766_v26 = vadd.f32 %v765_v25, %v764_v24 }
 0x68a   :  { %v767_v28 = vmul.f32 0.125, %v766_v26 }
 0x68c   :  { %v775_v29 = vadd.f32 1e-05, %v767_v28 }
 0x68e   :  { %5300 = vrsqrt.f32 %v775_v29 }
 0x698   :  { %v5301_v32 = vpop.eup %5300 }
 0x699   :  { %v777_v34 = vmul.f32 %v5301_v32, %v774_v31 }
 0x69b   :  { %v784_v35 = vadd.f32 %v4892_v33, %v777_v34 }
 0x69d   :  { %v4893_v36 = vmul.f32 -1.442695, %v784_v35 }
 0x69f   :  { %5302 = vpow2.f32 %v4893_v36 }
 0x6a9   :  { %v5303_v37 = vpop.eup %5302 }
 0x6aa   :  { %v788_v38 = vadd.f32 1.0, %v5303_v37 }
 0x6ac   :  { %5304 = vrcp.f32 %v788_v38 }
 0x6b6   :  { %v5305_v39 = vpop.eup %5304 }
 0x6b7   :  { %792 = vrot.lane.b32.xlu1 %v5305_v39, %s5745_s5 }
 0x729   :  { %v793_v40 = vpop.permute.xlu1 %792 }
 0x72a   :  { %v795_v41 = vmul.f32 %v793_v40, %v784_v35  ;;  %v4900_v40 = vld [vmem:[%s7086_s19] ss:$0 sm:$0xff] }
 0x72c   :  { %5118 = vmatmul.mubr.msk.f32.vlgmr.msra.gmra.mrb[4].mxu1 %vm555_vm7, %v795_v41 }
 0x72d   :  { %5214 = vmatpush3.bf16.msra.mxu1 %v6020_v27  ;;  %5129 = vmatprep.mubr.msk.f32.mxu1 %vm5744_vm0, %v7054_v10 }
 0x72e   :  { %5137 = vmatprep.subr.mxu1 %v7054_v10 }
 0x7ff   :  { %v865_v42 = vpop.f32.mrb[4].mxu1 }
 0x800   :  { %v869_v43 = vsel %vm365_vm6, %v865_v42, 0.0  ;;  %v5119_v44 = vpop.f32.mrb[5].mxu1 }
 0x801   :  { %v870_v45 = vrot.slane %v869_v43, 4  ;;  %v4901_v44 = vld [vmem:[%s7087_s24] ss:$0 sm:$0xff] }
 0x803   :  { %v871_v46 = vadd.f32 %v870_v45, %v869_v43 }
 0x805   :  { %v872_v47 = vrot.slane %v871_v46, 2 }
 0x807   :  { %v873_v48 = vadd.f32 %v872_v47, %v871_v46 }
 0x809   :  { %v874_v49 = vrot.slane %v873_v48, 1 }
 0x80b   :  { %v875_v50 = vadd.f32 %v874_v49, %v873_v48 }
 0x80d   :  { %v876_v51 = vmul.f32 0.125, %v875_v50 }
 0x80f   :  { %v877_v52 = vsub.f32 %v865_v42, %v876_v51 }
 0x811   :  { %v878_v53 = vmul.f32 %v877_v52, %v877_v52  ;;  %v893_v1 = vmul.f32 %v4895_v0, %v877_v52 }
 0x813   :  { %v879_v54 = vsel %vm365_vm6, %v878_v53, 0.0 }
 0x814   :  { %v880_v56 = vrot.slane %v879_v54, 4 }
 0x816   :  { %v881_v57 = vadd.f32 %v880_v56, %v879_v54 }
 0x818   :  { %v882_v58 = vrot.slane %v881_v57, 2 }
 0x81a   :  { %v883_v59 = vadd.f32 %v882_v58, %v881_v57 }
 0x81c   :  { %v884_v60 = vrot.slane %v883_v59, 1 }
 0x81e   :  { %v885_v61 = vadd.f32 %v884_v60, %v883_v59 }
 0x820   :  { %v886_v62 = vmul.f32 0.125, %v885_v61 }
 0x822   :  { %v894_v63 = vadd.f32 1e-05, %v886_v62 }
 0x824   :  { %5306 = vrsqrt.f32 %v894_v63  ;;  %v5746_v63 = vmov 1966171168  }
 0x825   :  { %v1033_v0 = vunpack.c.l.s4 %v5746_v63 }
 0x82e   :  { %v5307_v2 = vpop.eup %5306 }
 0x82f   :  { %v896_v4 = vmul.f32 %v5307_v2, %v893_v1  ;;  %v1034_v1 = vunpack.c.0.s8 %v1033_v0 }
 0x831   :  { %v903_v5 = vadd.f32 %v4896_v3, %v896_v4 }
 0x833   :  { %v4897_v6 = vmul.f32 -1.442695, %v903_v5 }
 0x835   :  { %5308 = vpow2.f32 %v4897_v6 }
 0x83f   :  { %v5309_v7 = vpop.eup %5308 }
 0x840   :  { %v907_v8 = vadd.f32 1.0, %v5309_v7 }
 0x842   :  { %5310 = vrcp.f32 %v907_v8 }
 0x84c   :  { %v5311_v14 = vpop.eup %5310 }
 0x84d   :  { %911 = vrot.lane.b32.xlu0 %v5311_v14, %s5745_s5 }
 0x8bf   :  { %v912_v15 = vpop.permute.xlu0 %911 }
 0x8c0   :  { %v914_v16 = vmul.f32 %v912_v15, %v903_v5 }
 0x8c2   :  { %v915_v17 = vadd.f32 %v914_v16, %v795_v41  ;;  %v6076_v41 = vshrl.u32 %v251_v12, 7 }
 0x8c4   :  { %v916_v18 = vmul.f32 0.70710677, %v915_v17  ;;  %v6080_v45 = vsub.s32 0, %v6076_v41  ;;  %v6087_v49 = vsub.s32 1, %v6076_v41  ;;  %v6092_v50 = vsub.s32 2, %v6076_v41 }
 0x8c5   :  { %v6097_v52 = vsub.s32 3, %v6076_v41  ;;  %v6102_v54 = vsub.s32 4, %v6076_v41  ;;  %v6107_v57 = vsub.s32 5, %v6076_v41  ;;  %v6112_v59 = vsub.s32 6, %v6076_v41 }
 0x8c6   :  { %5123 = vmatmul.mubr.msk.f32.vlgmr.msra.gmra.mrb[4].mxu0 %vm7051_vm9, %v916_v18  ;;  %v6117_v61 = vsub.s32 7, %v6076_v41  ;;  %v6126_v2 = vsub.s32 %v1034_v1, %v6076_v41 }
 0x8c7   :  { %5133 = vmatpush3.msra.mxu0 %v6031_v55  ;;  %5134 = vmatprep.mubr.msk.f32.mxu0 %vm5744_vm0, %v7054_v10 }
 0x8c8   :  { %5142 = vmatprep.subr.mxu0 %v7054_v10  ;;  %7088 = vst [vmem:[#allocation44_spill] sm:$0xff] %v6126_v2 }
 0x999   :  { %v991_v19 = vpop.f32.mrb[4].mxu0 }
 0x99a   :  { %v995_v20 = vsel %vm365_vm6, %v991_v19, 0.0  ;;  %v5124_v21 = vpop.f32.mrb[5].mxu0 }
 0x99b   :  { %v996_v22 = vrot.slane %v995_v20, 4 }
 0x99d   :  { %v997_v23 = vadd.f32 %v996_v22, %v995_v20 }
 0x99f   :  { %v998_v24 = vrot.slane %v997_v23, 2 }
 0x9a1   :  { %v999_v25 = vadd.f32 %v998_v24, %v997_v23 }
 0x9a3   :  { %v1000_v26 = vrot.slane %v999_v25, 1 }
 0x9a5   :  { %v1001_v28 = vadd.f32 %v1000_v26, %v999_v25 }
 0x9a7   :  { %v1002_v29 = vmul.f32 0.125, %v1001_v28 }
 0x9a9   :  { %v1003_v30 = vsub.f32 %v991_v19, %v1002_v29 }
 0x9ab   :  { %v1004_v55 = vmul.f32 %v1003_v30, %v1003_v30  ;;  %v1019_v42 = vmul.f32 %v4900_v40, %v1003_v30 }
 0x9ad   :  { %v1005_v31 = vsel %vm365_vm6, %v1004_v55, 0.0 }
 0x9ae   :  { %v1006_v32 = vrot.slane %v1005_v31, 4 }
 0x9b0   :  { %v1007_v33 = vadd.f32 %v1006_v32, %v1005_v31 }
 0x9b2   :  { %v1008_v34 = vrot.slane %v1007_v33, 2 }
 0x9b4   :  { %v1009_v35 = vadd.f32 %v1008_v34, %v1007_v33 }
 0x9b6   :  { %v1010_v36 = vrot.slane %v1009_v35, 1 }
 0x9b8   :  { %v1011_v37 = vadd.f32 %v1010_v36, %v1009_v35 }
 0x9ba   :  { %v1012_v38 = vmul.f32 0.125, %v1011_v37 }
 0x9bc   :  { %v1020_v39 = vadd.f32 1e-05, %v1012_v38 }
 0x9be   :  { %5312 = vrsqrt.f32 %v1020_v39 }
 0x9c8   :  { %v5313_v43 = vpop.eup %5312 }
 0x9c9   :  { %v1022_v46 = vmul.f32 %v5313_v43, %v1019_v42 }
 0x9cb   :  { %v6082_v47 = vadd.f32 %v4901_v44, %v1022_v46 }
 0x9cd   :  { %v1083_v48 = vrot.slane %v6082_v47, %v6080_v45  ;;  %v1094_v12 = vrot.slane %v6082_v47, %v6087_v49  ;;  %v1105_v51 = vrot.slane %v6082_v47, %v6092_v50  ;;  %v1116_v53 = vrot.slane %v6082_v47, %v6097_v52 }
 0x9ce   :  { %v1127_v56 = vrot.slane %v6082_v47, %v6102_v54  ;;  %v1138_v58 = vrot.slane %v6082_v47, %v6107_v57  ;;  %v1149_v60 = vrot.slane %v6082_v47, %v6112_v59  ;;  %v6121_v62 = vrot.slane %v6082_v47, %v6117_v61 }
 0x9cf   :  { %1089 = vbcast.lane.b32.xlu0 %v1083_v48, 264  ;;  %1085 = vbcast.lane.b32.xlu1 %v1083_v48, 256  ;;  %v1038_v3 = vrot.slane %v6082_v47, %v6126_v2  ;;  %v1031_v16 = vcombine.high %v6082_v47, %v6082_v47 }
 0x9d1   :  { %v1054_v4 = vrot.slane %v1038_v3, %v6126_v2  ;;  %v1046_v5 = vcombine.high %v1038_v3, %v1038_v3  ;;  %v1045_v25 = vrot.slane %v1031_v16, %v6126_v2 }
 0x9d3   :  { %1100 = vbcast.lane.b32.xlu0 %v1094_v12, 264  ;;  %1096 = vbcast.lane.b32.xlu1 %v1094_v12, 256  ;;  %v6132_v6 = vrot.slane %v1054_v4, %v6080_v45  ;;  %v1068_v7 = vrot.slane %v1046_v5, %v6126_v2  ;;  %v1076_v20 = vcombine.high %v1054_v4, %v1054_v4 }
 0x9d4   :  { %v1061_v34 = vrot.slane %v1045_v25, %v6126_v2  ;;  %v1047_v38 = vcombine.high %v1045_v25, %v1045_v25 }
 0x9d5   :  { %v6146_v17 = vrot.slane %v1068_v7, %v6080_v45  ;;  %v6162_v26 = vrot.slane %v1076_v20, %v6080_v45  ;;  %v1078_v30 = vcombine.high %v1068_v7, %v1068_v7 }
 0x9d6   :  { %v6193_v44 = vrot.slane %v1061_v34, %v6080_v45  ;;  %v1077_v1 = vcombine.high %v1061_v34, %v1061_v34 }
 0x9d7   :  { %1111 = vbcast.lane.b32.xlu0 %v1105_v51, 264  ;;  %1107 = vbcast.lane.b32.xlu1 %v1105_v51, 256  ;;  %v6178_v35 = vrot.slane %v1078_v30, %v6080_v45 }
 0x9db   :  { %1122 = vbcast.lane.b32.xlu0 %v1116_v53, 264  ;;  %1118 = vbcast.lane.b32.xlu1 %v1116_v53, 256 }
 0x9df   :  { %1133 = vbcast.lane.b32.xlu0 %v1127_v56, 264  ;;  %1129 = vbcast.lane.b32.xlu1 %v1127_v56, 256 }
 0x9e3   :  { %1144 = vbcast.lane.b32.xlu0 %v1138_v58, 264  ;;  %1140 = vbcast.lane.b32.xlu1 %v1138_v58, 256 }
 0x9e7   :  { %1155 = vbcast.lane.b32.xlu0 %v1149_v60, 264  ;;  %1151 = vbcast.lane.b32.xlu1 %v1149_v60, 256 }
 0x9eb   :  { %1166 = vbcast.lane.b32.xlu0 %v6121_v62, 264  ;;  %1162 = vbcast.lane.b32.xlu1 %v6121_v62, 256 }
 0x9ef   :  { %1373 = vbcast.lane.b32.xlu0 %v1083_v48, 256  ;;  %1377 = vbcast.lane.b32.xlu1 %v1083_v48, 264 }
 0x9f3   :  { %1388 = vbcast.lane.b32.xlu0 %v1094_v12, 264  ;;  %1384 = vbcast.lane.b32.xlu1 %v1094_v12, 256  ;;  %v1075_v12 = vrot.slane %v1047_v38, %v6126_v2 }
 0x9f7   :  { %1399 = vbcast.lane.b32.xlu0 %v1105_v51, 264  ;;  %1395 = vbcast.lane.b32.xlu1 %v1105_v51, 256 }
 0x9fb   :  { %1410 = vbcast.lane.b32.xlu0 %v1116_v53, 264  ;;  %1406 = vbcast.lane.b32.xlu1 %v1116_v53, 256 }
 0x9ff   :  { %1421 = vbcast.lane.b32.xlu0 %v1127_v56, 264  ;;  %1417 = vbcast.lane.b32.xlu1 %v1127_v56, 256 }
 0xa03   :  { %1432 = vbcast.lane.b32.xlu0 %v1138_v58, 264  ;;  %1428 = vbcast.lane.b32.xlu1 %v1138_v58, 256 }
 0xa07   :  { %1443 = vbcast.lane.b32.xlu0 %v1149_v60, 264  ;;  %1439 = vbcast.lane.b32.xlu1 %v1149_v60, 256  ;;  %v6209_v60 = vrot.slane %v1075_v12, %v6080_v45 }
 0xa41   :  { %v1090_v8 = vpop.permute.xlu0 %1089  ;;  %v1086_v11 = vpop.permute.xlu1 %1085 }
 0xa42   :  { %vm1209_vm10 = vcmp.ge.f32.partialorder %v6132_v6, %v1090_v8  ;;  %vm1208_vm11 = vcmp.ge.f32.partialorder %v6132_v6, %v1086_v11  ;;  %v1195_v8 = vrot.slane %v1077_v1, %v6080_v45 }
 0xa43   :  { %v6138_v14 = vsel %vm1209_vm10, 1.0, %v7054_v10  ;;  %v6141_v15 = vsel %vm1208_vm11, 1.0, %v7054_v10 }
 0xa44   :  { %v1259_v18 = vsel %vm365_vm6, %v6138_v14, 0.0  ;;  %v1256_v19 = vsel %vm365_vm6, %v6141_v15, 0.0  ;;  %v1305_v38 = vmul.f32 %v6138_v14, %v6132_v6 }
 0xa45   :  { %v1101_v21 = vpop.permute.xlu0 %1100  ;;  %v1097_v22 = vpop.permute.xlu1 %1096  ;;  %1260 = vadd.xlane.f32.xlu0 %v1259_v18  ;;  %1257 = vadd.xlane.f32.xlu1 %v1256_v19  ;;  %v1079_v18 = vcombine.high %v1075_v12, %v1075_v12 }
 0xa46   :  { %vm1211_vm12 = vcmp.ge.f32.partialorder %v6146_v17, %v1101_v21  ;;  %vm1210_vm13 = vcmp.ge.f32.partialorder %v6146_v17, %v1097_v22 }
 0xa47   :  { %v6155_v23 = vsel %vm1211_vm12, 1.0, %v7054_v10  ;;  %v6158_v24 = vsel %vm1210_vm13, 1.0, %v7054_v10  ;;  %v1199_v25 = vrot.slane %v1079_v18, %v6080_v45 }
 0xa48   :  { %v1265_v28 = vsel %vm365_vm6, %v6155_v23, 0.0  ;;  %v1262_v29 = vsel %vm365_vm6, %v6158_v24, 0.0  ;;  %v1306_v12 = vmul.f32 %v6158_v24, %v6146_v17 }
 0xa49   :  { %v1112_v55 = vpop.permute.xlu0 %1111  ;;  %v1108_v31 = vpop.permute.xlu1 %1107  ;;  %1266 = vadd.xlane.f32.xlu1 %v1265_v28  ;;  %1263 = vadd.xlane.f32.xlu0 %v1262_v29 }
 0xa4a   :  { %vm1213_vm14 = vcmp.ge.f32.partialorder %v6162_v26, %v1112_v55  ;;  %vm1212_vm15 = vcmp.ge.f32.partialorder %v6162_v26, %v1108_v31  ;;  %v1326_v14 = vsel %vm365_vm6, %v1306_v12, 0.0 }
 0xa4b   :  { %v6171_v32 = vsel %vm1213_vm14, 1.0, %v7054_v10  ;;  %v6174_v33 = vsel %vm1212_vm15, 1.0, %v7054_v10 }
 0xa4c   :  { %v1271_v36 = vsel %vm365_vm6, %v6171_v32, 0.0  ;;  %v1268_v37 = vsel %vm365_vm6, %v6174_v33, 0.0 }
 0xa4d   :  { %v1123_v39 = vpop.permute.xlu0 %1122  ;;  %v1119_v40 = vpop.permute.xlu1 %1118  ;;  %1272 = vadd.xlane.f32.xlu1 %v1271_v36  ;;  %1269 = vadd.xlane.f32.xlu0 %v1268_v37 }
 0xa4e   :  { %vm1215_vm1 = vcmp.ge.f32.partialorder %v6178_v35, %v1123_v39  ;;  %vm1214_vm2 = vcmp.ge.f32.partialorder %v6178_v35, %v1119_v40  ;;  %v1304_v39 = vmul.f32 %v6141_v15, %v6132_v6  ;;  %v1323_v40 = vsel %vm365_vm6, %v1305_v38, 0.0 }
 0xa4f   :  { %v6187_v42 = vsel %vm1215_vm1, 1.0, %v7054_v10  ;;  %v6190_v43 = vsel %vm1214_vm2, 1.0, %v7054_v10  ;;  %v1309_v6 = vmul.f32 %v6171_v32, %v6162_v26  ;;  %v1308_v15 = vmul.f32 %v6174_v33, %v6162_v26 }
 0xa50   :  { %v1277_v46 = vsel %vm365_vm6, %v6187_v42, 0.0  ;;  %v1274_v48 = vsel %vm365_vm6, %v6190_v43, 0.0  ;;  %v1310_v24 = vmul.f32 %v6190_v43, %v6178_v35 }
 0xa51   :  { %v1134_v51 = vpop.permute.xlu0 %1133  ;;  %v1130_v53 = vpop.permute.xlu1 %1129  ;;  %1278 = vadd.xlane.f32.xlu1 %v1277_v46  ;;  %1275 = vadd.xlane.f32.xlu0 %v1274_v48  ;;  %v1320_v46 = vsel %vm365_vm6, %v1304_v39, 0.0  ;;  %v1307_v48 = vmul.f32 %v6155_v23, %v6146_v17  ;;  %v1332_v23 = vsel %vm365_vm6, %v1308_v15, 0.0  ;;  %v1311_v17 = vmul.f32 %v6187_v42, %v6178_v35 }
 0xa52   :  { %vm1217_vm3 = vcmp.ge.f32.partialorder %v6193_v44, %v1134_v51  ;;  %vm1216_vm4 = vcmp.ge.f32.partialorder %v6193_v44, %v1130_v53  ;;  %v1335_v53 = vsel %vm365_vm6, %v1309_v6, 0.0  ;;  %v1338_v32 = vsel %vm365_vm6, %v1310_v24, 0.0 }
 0xa53   :  { %v6203_v56 = vsel %vm1217_vm3, 1.0, %v7054_v10  ;;  %v6206_v58 = vsel %vm1216_vm4, 1.0, %v7054_v10  ;;  %v1329_v51 = vsel %vm365_vm6, %v1307_v48, 0.0 }
 0xa54   :  { %v1283_v63 = vsel %vm365_vm6, %v6203_v56, 0.0  ;;  %v1280_v0 = vsel %vm365_vm6, %v6206_v58, 0.0  ;;  %v1313_v26 = vmul.f32 %v6203_v56, %v6193_v44  ;;  %v1312_v33 = vmul.f32 %v6206_v58, %v6193_v44 }
 0xa55   :  { %v1145_v3 = vpop.permute.xlu0 %1144  ;;  %v1141_v4 = vpop.permute.xlu1 %1140  ;;  %1284 = vadd.xlane.f32.xlu1 %v1283_v63  ;;  %1281 = vadd.xlane.f32.xlu0 %v1280_v0  ;;  %v1341_v63 = vsel %vm365_vm6, %v1311_v17, 0.0 }
 0xa56   :  { %vm1219_vm5 = vcmp.ge.f32.partialorder %v6209_v60, %v1145_v3  ;;  %vm1218_vm10 = vcmp.ge.f32.partialorder %v6209_v60, %v1141_v4  ;;  %v1347_v0 = vsel %vm365_vm6, %v1313_v26, 0.0  ;;  %v1344_v42 = vsel %vm365_vm6, %v1312_v33, 0.0 }
 0xa57   :  { %v4913_v5 = vsel %vm1219_vm5, 1.0, %v7054_v10  ;;  %v4912_v7 = vsel %vm1218_vm10, 1.0, %v7054_v10 }
 0xa58   :  { %v1289_v11 = vsel %vm365_vm6, %v4913_v5, 0.0  ;;  %v1286_v16 = vsel %vm365_vm6, %v4912_v7, 0.0  ;;  %v1315_v35 = vmul.f32 %v4913_v5, %v6209_v60  ;;  %v1314_v43 = vmul.f32 %v4912_v7, %v6209_v60 }
 0xa59   :  { %v1156_v19 = vpop.permute.xlu0 %1155  ;;  %v1152_v20 = vpop.permute.xlu1 %1151  ;;  %1290 = vadd.xlane.f32.xlu1 %v1289_v11  ;;  %1287 = vadd.xlane.f32.xlu0 %v1286_v16 }
 0xa5a   :  { %vm1221_vm11 = vcmp.ge.f32.partialorder %v1195_v8, %v1156_v19  ;;  %vm1220_vm12 = vcmp.ge.f32.partialorder %v1195_v8, %v1152_v20  ;;  %v1353_v1 = vsel %vm365_vm6, %v1315_v35, 0.0  ;;  %v1350_v3 = vsel %vm365_vm6, %v1314_v43, 0.0 }
 0xa5b   :  { %v4915_v21 = vsel %vm1221_vm11, 1.0, %v7054_v10  ;;  %v4914_v22 = vsel %vm1220_vm12, 1.0, %v7054_v10 }
 0xa5c   :  { %v1295_v28 = vsel %vm365_vm6, %v4915_v21, 0.0  ;;  %v1292_v29 = vsel %vm365_vm6, %v4914_v22, 0.0  ;;  %v1317_v56 = vmul.f32 %v4915_v21, %v1195_v8  ;;  %v1316_v4 = vmul.f32 %v4914_v22, %v1195_v8 }
 0xa5d   :  { %v1167_v30 = vpop.permute.xlu0 %1166  ;;  %v1163_v55 = vpop.permute.xlu1 %1162  ;;  %1296 = vadd.xlane.f32.xlu1 %v1295_v28  ;;  %1293 = vadd.xlane.f32.xlu0 %v1292_v29 }
 0xa5e   :  { %vm1223_vm13 = vcmp.ge.f32.partialorder %v1199_v25, %v1167_v30  ;;  %vm1222_vm14 = vcmp.ge.f32.partialorder %v1199_v25, %v1163_v55  ;;  %v1359_v44 = vsel %vm365_vm6, %v1317_v56, 0.0  ;;  %v1356_v58 = vsel %vm365_vm6, %v1316_v4, 0.0 }
 0xa5f   :  { %v4917_v31 = vsel %vm1223_vm13, 1.0, %v7054_v10  ;;  %v4916_v34 = vsel %vm1222_vm14, 1.0, %v7054_v10 }
 0xa60   :  { %v1301_v36 = vsel %vm365_vm6, %v4917_v31, 0.0  ;;  %v1298_v37 = vsel %vm365_vm6, %v4916_v34, 0.0  ;;  %v1319_v11 = vmul.f32 %v4917_v31, %v1199_v25  ;;  %v1318_v16 = vmul.f32 %v4916_v34, %v1199_v25 }
 0xa61   :  { %1302 = vadd.xlane.f32.xlu1 %v1301_v36  ;;  %1299 = vadd.xlane.f32.xlu0 %v1298_v37  ;;  %v1374_v7 = vpop.permute.xlu0 %1373  ;;  %v1378_v8 = vpop.permute.xlu1 %1377 }
 0xa62   :  { %v1365_v60 = vsel %vm365_vm6, %v1319_v11, 0.0  ;;  %v1362_v5 = vsel %vm365_vm6, %v1318_v16, 0.0 }
 0xa65   :  { %1324 = vadd.xlane.f32.xlu1 %v1323_v40  ;;  %1321 = vadd.xlane.f32.xlu0 %v1320_v46  ;;  %v1389_v18 = vpop.permute.xlu0 %1388  ;;  %v1385_v19 = vpop.permute.xlu1 %1384 }
 0xa69   :  { %1330 = vadd.xlane.f32.xlu1 %v1329_v51  ;;  %1327 = vadd.xlane.f32.xlu0 %v1326_v14  ;;  %v1400_v20 = vpop.permute.xlu0 %1399  ;;  %v1396_v21 = vpop.permute.xlu1 %1395 }
 0xa6d   :  { %1336 = vadd.xlane.f32.xlu1 %v1335_v53  ;;  %1333 = vadd.xlane.f32.xlu0 %v1332_v23  ;;  %v6271_v22 = vpop.permute.xlu0 %1410  ;;  %v6273_v25 = vpop.permute.xlu1 %1406 }
 0xa71   :  { %1342 = vadd.xlane.f32.xlu1 %v1341_v63  ;;  %1339 = vadd.xlane.f32.xlu0 %v1338_v32  ;;  %v6275_v28 = vpop.permute.xlu0 %1421  ;;  %v6277_v29 = vpop.permute.xlu1 %1417 }
 0xa75   :  { %1348 = vadd.xlane.f32.xlu1 %v1347_v0  ;;  %1345 = vadd.xlane.f32.xlu0 %v1344_v42  ;;  %v6279_v30 = vpop.permute.xlu0 %1432  ;;  %v6281_v55 = vpop.permute.xlu1 %1428 }
 0xa79   :  { %1354 = vadd.xlane.f32.xlu1 %v1353_v1  ;;  %1351 = vadd.xlane.f32.xlu0 %v1350_v3  ;;  %v6283_v31 = vpop.permute.xlu0 %1443 }
 0xa7d   :  { %1360 = vadd.xlane.f32.xlu1 %v1359_v44  ;;  %1357 = vadd.xlane.f32.xlu0 %v1356_v58 }
 0xa81   :  { %1366 = vadd.xlane.f32.xlu1 %v1365_v60  ;;  %1363 = vadd.xlane.f32.xlu0 %v1362_v5 }
 0xa92   :  { %1450 = vbcast.lane.b32.xlu1 %v6121_v62, 256 }
 0xa97   :  { %1454 = vbcast.lane.b32.xlu0 %v6121_v62, 264  ;;  %v6285_v62 = vpop.permute.xlu1 %1439 }
 0xad2   :  { %v1261_v34 = vpop.xlane.xlu0 %1260  ;;  %v1258_v36 = vpop.xlane.xlu1 %1257 }
 0xad3   :  { %5314 = vrcp.f32 %v1261_v34  ;;  %v1473_v24 = vmul.f32 %v1378_v8, %v1261_v34  ;;  %v1472_v63 = vmul.f32 %v1374_v7, %v1258_v36 }
 0xad4   :  { %5316 = vrcp.f32 %v1258_v36 }
 0xad5   :  { %v1489_v43 = vadd.f32 1.0, %v1473_v24  ;;  %v1488_v1 = vadd.f32 1.0, %v1472_v63 }
 0xad6   :  { %v1267_v37 = vpop.xlane.xlu1 %1266  ;;  %v1264_v38 = vpop.xlane.xlu0 %1263 }
 0xad7   :  { %5318 = vrcp.f32 %v1264_v38  ;;  %v1474_v3 = vmul.f32 %v1385_v19, %v1264_v38  ;;  %v1475_v8 = vmul.f32 %v1389_v18, %v1267_v37 }
 0xad8   :  { %5320 = vrcp.f32 %v1267_v37 }
 0xad9   :  { %v1490_v34 = vadd.f32 1.0, %v1474_v3 }
 0xada   :  { %v1273_v39 = vpop.xlane.xlu1 %1272  ;;  %v1270_v40 = vpop.xlane.xlu0 %1269 }
 0xadb   :  { %5322 = vrcp.f32 %v1270_v40  ;;  %v1476_v36 = vmul.f32 %v1396_v21, %v1270_v40  ;;  %v1477_v19 = vmul.f32 %v1400_v20, %v1273_v39  ;;  %v1491_v21 = vadd.f32 1.0, %v1475_v8 }
 0xadc   :  { %5324 = vrcp.f32 %v1273_v39 }
 0xadd   :  { %v5315_v33 = vpop.eup %5314  ;;  %v1492_v40 = vadd.f32 1.0, %v1476_v36  ;;  %v1493_v39 = vadd.f32 1.0, %v1477_v19 }
 0xade   :  { %v6287_v46 = vpop.xlane.xlu1 %1278  ;;  %v1276_v48 = vpop.xlane.xlu0 %1275 }
 0xadf   :  { %v5317_v35 = vpop.eup %5316  ;;  %5326 = vrcp.f32 %v1276_v48 }
 0xae0   :  { %5328 = vrcp.f32 %v6287_v46 }
 0xae1   :  { %v5319_v7 = vpop.eup %5318 }
 0xae2   :  { %v6289_v12 = vpop.xlane.xlu1 %1284  ;;  %v6291_v51 = vpop.xlane.xlu0 %1281 }
 0xae3   :  { %5330 = vrcp.f32 %v6289_v12  ;;  %v5321_v24 = vpop.eup %5320 }
 0xae4   :  { %5332 = vrcp.f32 %v6291_v51 }
 0xae5   :  { %v5323_v37 = vpop.eup %5322 }
 0xae6   :  { %v6293_v14 = vpop.xlane.xlu1 %1290  ;;  %v6295_v6 = vpop.xlane.xlu0 %1287 }
 0xae7   :  { %v5325_v20 = vpop.eup %5324  ;;  %5334 = vrcp.f32 %v6295_v6 }
 0xae8   :  { %5336 = vrcp.f32 %v6293_v14 }
 0xaea   :  { %v6297_v15 = vpop.xlane.xlu1 %1296  ;;  %v6299_v53 = vpop.xlane.xlu0 %1293 }
 0xaeb   :  { %5338 = vrcp.f32 %v6299_v53 }
 0xaec   :  { %5340 = vrcp.f32 %v6297_v15 }
 0xaee   :  { %v6301_v23 = vpop.xlane.xlu1 %1302  ;;  %v6303_v17 = vpop.xlane.xlu0 %1299 }
 0xaef   :  { %5342 = vrcp.f32 %v6301_v23 }
 0xaf0   :  { %5344 = vrcp.f32 %v6303_v17 }
 0xaf2   :  { %v1325_v32 = vpop.xlane.xlu1 %1324  ;;  %v1322_v26 = vpop.xlane.xlu0 %1321 }
 0xaf3   :  { %v4919_v0 = vadd.f32 -1.0, %v1325_v32  ;;  %v4918_v42 = vadd.f32 -1.0, %v1322_v26  ;;  %vm1505_vm15 = vcmp.gt.f32.partialorder %v1489_v43, %v1325_v32  ;;  %vm1504_vm1 = vcmp.gt.f32.partialorder %v1488_v1, %v1322_v26 }
 0xaf5   :  { %v1539_v56 = vmul.f32 %v5315_v33, %v4919_v0  ;;  %v1537_v4 = vmul.f32 %v5317_v35, %v4918_v42  ;;  %v1478_v42 = vmul.f32 %v6273_v25, %v1276_v48  ;;  %v1480_v48 = vmul.f32 %v6277_v29, %v6291_v51 }
 0xaf6   :  { %v1331_v44 = vpop.xlane.xlu1 %1330  ;;  %v1328_v58 = vpop.xlane.xlu0 %1327 }
 0xaf7   :  { %v4921_v11 = vadd.f32 -1.0, %v1331_v44  ;;  %v4920_v16 = vadd.f32 -1.0, %v1328_v58  ;;  %v1569_v60 = vsel %vm1505_vm15, %v1539_v56, -inf  ;;  %v1568_v5 = vsel %vm1504_vm1, %v1537_v4, -inf }
 0xaf8   :  { %1604 = vperm.xlu0 %5285, %v1569_v60   ;;  %1601 = vperm.xlu1 %5284, %v1568_v5   ;;  %vm1506_vm2 = vcmp.gt.f32.partialorder %v1490_v34, %v1328_v58  ;;  %vm1507_vm3 = vcmp.gt.f32.partialorder %v1491_v21, %v1331_v44  ;;  %v1479_v60 = vmul.f32 %v6271_v22, %v6287_v46  ;;  %v1494_v25 = vadd.f32 1.0, %v1478_v42 }
 0xaf9   :  { %v1541_v38 = vmul.f32 %v5319_v7, %v4920_v16  ;;  %v1543_v18 = vmul.f32 %v5321_v24, %v4921_v11  ;;  %v5327_v16 = vpop.eup %5326  ;;  %v1481_v7 = vmul.f32 %v6275_v28, %v6289_v12 }
 0xafa   :  { %v1337_v63 = vpop.xlane.xlu1 %1336  ;;  %v1334_v32 = vpop.xlane.xlu0 %1333  ;;  %v1495_v24 = vadd.f32 1.0, %v1479_v60 }
 0xafb   :  { %v4923_v26 = vadd.f32 -1.0, %v1337_v63  ;;  %v4922_v33 = vadd.f32 -1.0, %v1334_v32  ;;  %v1570_v0 = vsel %vm1506_vm2, %v1541_v38, -inf  ;;  %vm1508_vm4 = vcmp.gt.f32.partialorder %v1492_v40, %v1334_v32  ;;  %v5329_v5 = vpop.eup %5328 }
 0xafc   :  { %1607 = vperm.xlu1 %5284, %v1570_v0   ;;  %v1571_v58 = vsel %vm1507_vm3, %v1543_v18, -inf  ;;  %vm1509_vm5 = vcmp.gt.f32.partialorder %v1493_v39, %v1337_v63  ;;  %v5331_v22 = vpop.eup %5330  ;;  %v1496_v32 = vadd.f32 1.0, %v1480_v48  ;;  %v1482_v63 = vmul.f32 %v6281_v55, %v6295_v6 }
 0xafd   :  { %v1545_v35 = vmul.f32 %v5323_v37, %v4922_v33  ;;  %v1547_v3 = vmul.f32 %v5325_v20, %v4923_v26  ;;  %v5333_v38 = vpop.eup %5332  ;;  %v1497_v12 = vadd.f32 1.0, %v1481_v7  ;;  %v1483_v20 = vmul.f32 %v6279_v30, %v6293_v14 }
 0xafe   :  { %v1343_v43 = vpop.xlane.xlu1 %1342  ;;  %v1340_v1 = vpop.xlane.xlu0 %1339  ;;  %v1498_v55 = vadd.f32 1.0, %v1482_v63  ;;  %v1484_v6 = vmul.f32 %v6285_v62, %v6299_v53  ;;  %v1485_v62 = vmul.f32 %v6283_v31, %v6297_v15 }
 0xaff   :  { %v4925_v56 = vadd.f32 -1.0, %v1343_v43  ;;  %v4924_v4 = vadd.f32 -1.0, %v1340_v1  ;;  %v1572_v11 = vsel %vm1508_vm4, %v1545_v35, -inf  ;;  %v1573_v36 = vsel %vm1509_vm5, %v1547_v3, -inf  ;;  %v5335_v42 = vpop.eup %5334 }
 0xb00   :  { %1610 = vperm.xlu1 %5284, %v1571_v58   ;;  %1613 = vperm.xlu0 %5285, %v1572_v11   ;;  %vm1510_vm10 = vcmp.gt.f32.partialorder %v1494_v25, %v1340_v1  ;;  %vm1511_vm11 = vcmp.gt.f32.partialorder %v1495_v24, %v1343_v43  ;;  %v5337_v35 = vpop.eup %5336  ;;  %v1499_v11 = vadd.f32 1.0, %v1483_v20  ;;  %v1500_v53 = vadd.f32 1.0, %v1484_v6 }
 0xb01   :  { %v1549_v44 = vmul.f32 %v5327_v16, %v4924_v4  ;;  %v1551_v51 = vmul.f32 %v5329_v5, %v4925_v56  ;;  %v5339_v58 = vpop.eup %5338  ;;  %vm1657_vm5 = vcmask 130112  }
 0xb02   :  { %v1349_v8 = vpop.xlane.xlu1 %1348  ;;  %v1346_v34 = vpop.xlane.xlu0 %1345 }
 0xb03   :  { %v4927_v46 = vadd.f32 -1.0, %v1349_v8  ;;  %v4926_v19 = vadd.f32 -1.0, %v1346_v34  ;;  %v1574_v29 = vsel %vm1510_vm10, %v1549_v44, -inf  ;;  %vm1512_vm12 = vcmp.gt.f32.partialorder %v1496_v32, %v1346_v34  ;;  %v5341_v60 = vpop.eup %5340 }
 0xb04   :  { %1616 = vperm.xlu1 %5284, %v1573_v36   ;;  %1619 = vperm.xlu0 %5285, %v1574_v29   ;;  %v1575_v21 = vsel %vm1511_vm11, %v1551_v51, -inf  ;;  %vm1513_vm13 = vcmp.gt.f32.partialorder %v1497_v12, %v1349_v8  ;;  %v1501_v8 = vadd.f32 1.0, %v1485_v62  ;;  %v5343_v31 = vpop.eup %5342  ;;  %vm1722_vm10 = vcmask 1041409  }
 0xb05   :  { %v1553_v28 = vmul.f32 %v5333_v38, %v4926_v19  ;;  %v1555_v0 = vmul.f32 %v5331_v22, %v4927_v46  ;;  %v5345_v51 = vpop.eup %5344  ;;  %vm1724_vm11 = vcmask 1042434  }
 0xb06   :  { %v1355_v26 = vpop.xlane.xlu1 %1354  ;;  %v1352_v33 = vpop.xlane.xlu0 %1351 }
 0xb07   :  { %v4929_v18 = vadd.f32 -1.0, %v1355_v26  ;;  %v4928_v37 = vadd.f32 -1.0, %v1352_v33  ;;  %v1576_v40 = vsel %vm1512_vm12, %v1553_v28, -inf  ;;  %v1577_v3 = vsel %vm1513_vm13, %v1555_v0, -inf }
 0xb08   :  { %1622 = vperm.xlu1 %5284, %v1575_v21   ;;  %1625 = vperm.xlu0 %5285, %v1576_v40   ;;  %vm1514_vm14 = vcmp.gt.f32.partialorder %v1498_v55, %v1352_v33  ;;  %vm1515_vm15 = vcmp.gt.f32.partialorder %v1499_v11, %v1355_v26  ;;  %v6334_v55 = vsub.s32 %v6008_v13, %v6076_v41  ;;  %vm1726_vm12 = vcmask 1043459  }
 0xb09   :  { %v1557_v39 = vmul.f32 %v5335_v42, %v4928_v37  ;;  %v1559_v14 = vmul.f32 %v5337_v35, %v4929_v18  ;;  %v1652_v42 = vadd.s32 4294967288, %v6008_v13  ;;  %vm1728_vm13 = vcmask 1044484  }
 0xb0a   :  { %v1361_v43 = vpop.xlane.xlu1 %1360  ;;  %v1358_v1 = vpop.xlane.xlu0 %1357 }
 0xb0b   :  { %v4931_v56 = vadd.f32 -1.0, %v1361_v43  ;;  %v4930_v4 = vadd.f32 -1.0, %v1358_v1  ;;  %v1578_v30 = vsel %vm1514_vm14, %v1557_v39, -inf  ;;  %vm1516_vm1 = vcmp.gt.f32.partialorder %v1500_v53, %v1358_v1 }
 0xb0c   :  { %1628 = vperm.xlu1 %5284, %v1577_v3   ;;  %1631 = vperm.xlu0 %5285, %v1578_v30   ;;  %v1579_v44 = vsel %vm1515_vm15, %v1559_v14, -inf  ;;  %vm1517_vm2 = vcmp.gt.f32.partialorder %v1501_v8, %v1361_v43  ;;  %v6337_v6 = vsub.s32 %v1652_v42, %v6076_v41  ;;  %vm1730_vm14 = vcmask 1045509  }
 0xb0d   :  { %v1561_v16 = vmul.f32 %v5339_v58, %v4930_v4  ;;  %v1563_v7 = vmul.f32 %v5341_v60, %v4931_v56  ;;  %vm1732_vm15 = vcmask 1046534  }
 0xb0e   :  { %v1367_v25 = vpop.xlane.xlu1 %1366  ;;  %v1364_v48 = vpop.xlane.xlu0 %1363 }
 0xb0f   :  { %v1580_v5 = vsel %vm1516_vm1, %v1561_v16, -inf  ;;  %v4933_v34 = vadd.f32 -1.0, %v1367_v25  ;;  %v4932_v36 = vadd.f32 -1.0, %v1364_v48  ;;  %v1581_v29 = vsel %vm1517_vm2, %v1563_v7, -inf }
 0xb10   :  { %1634 = vperm.xlu1 %5284, %v1579_v44   ;;  %1637 = vperm.xlu0 %5285, %v1580_v5   ;;  %vm1734_vm1 = vcmask 1047559  }
 0xb11   :  { %v1565_v32 = vmul.f32 %v5345_v51, %v4932_v36  ;;  %v1567_v63 = vmul.f32 %v5343_v31, %v4933_v34 }
 0xb12   :  { %v1451_v22 = vpop.permute.xlu1 %1450  ;;  %v1455_v46 = vpop.permute.xlu0 %1454 }
 0xb13   :  { %v1486_v15 = vmul.f32 %v1451_v22, %v6303_v17  ;;  %v1487_v19 = vmul.f32 %v1455_v46, %v6301_v23 }
 0xb14   :  { %1640 = vperm.xlu1 %5284, %v1581_v29  }
 0xb15   :  { %v1502_v38 = vadd.f32 1.0, %v1486_v15  ;;  %v1503_v24 = vadd.f32 1.0, %v1487_v19 }
 0xb17   :  { %vm1518_vm3 = vcmp.gt.f32.partialorder %v1502_v38, %v1364_v48  ;;  %vm1519_vm4 = vcmp.gt.f32.partialorder %v1503_v24, %v1367_v25 }
 0xb18   :  { %v1582_v28 = vsel %vm1518_vm3, %v1565_v32, -inf  ;;  %v1583_v12 = vsel %vm1519_vm4, %v1567_v63, -inf }
 0xb19   :  { %1643 = vperm.xlu0 %5285, %v1582_v28   ;;  %1646 = vperm.xlu1 %5284, %v1583_v12  }
 0xb77   :  { %v1602_v26 = vpop.permute.xlu1 %1601  ;;  %v1605_v33 = vpop.permute.xlu0 %1604 }
 0xb78   :  { %v1651_v3 = vrot.slane %v1602_v26, %v6334_v55  ;;  %v1656_v56 = vrot.slane %v1605_v33, %v6337_v6 }
 0xb7a   :  { %v1658_v48 = vsel %vm1657_vm5, %v1656_v56, %v1651_v3 }
 0xb7b   :  { %v1608_v0 = vpop.permute.xlu1 %1607 }
 0xb7c   :  { %v1662_v4 = vrot.slane %v1608_v0, %v6334_v55 }
 0xb7f   :  { %v1611_v18 = vpop.permute.xlu1 %1610  ;;  %v1614_v17 = vpop.permute.xlu0 %1613 }
 0xb80   :  { %v1666_v35 = vrot.slane %v1611_v18, %v6337_v6  ;;  %v1671_v13 = vrot.slane %v1614_v17, %v6334_v55 }
 0xb82   :  { %v1667_v14 = vsel %vm1657_vm5, %v1666_v35, %v1662_v4 }
 0xb83   :  { %v1617_v37 = vpop.permute.xlu1 %1616  ;;  %v1620_v23 = vpop.permute.xlu0 %1619  ;;  %v1723_v7 = vsel %vm1722_vm10, %v1667_v14, %v1658_v48 }
 0xb84   :  { %v1675_v1 = vrot.slane %v1617_v37, %v6337_v6  ;;  %v1680_v58 = vrot.slane %v1620_v23, %v6334_v55 }
 0xb86   :  { %v1676_v16 = vsel %vm1657_vm5, %v1675_v1, %v1671_v13 }
 0xb87   :  { %v1623_v21 = vpop.permute.xlu1 %1622  ;;  %v1626_v40 = vpop.permute.xlu0 %1625  ;;  %v1725_v36 = vsel %vm1724_vm11, %v1676_v16, %v1723_v7 }
 0xb88   :  { %v1684_v30 = vrot.slane %v1623_v21, %v6337_v6  ;;  %v1689_v60 = vrot.slane %v1626_v40, %v6334_v55 }
 0xb8a   :  { %v1685_v44 = vsel %vm1657_vm5, %v1684_v30, %v1680_v58 }
 0xb8b   :  { %v1629_v20 = vpop.permute.xlu1 %1628  ;;  %v1632_v39 = vpop.permute.xlu0 %1631  ;;  %v1727_v46 = vsel %vm1726_vm12, %v1685_v44, %v1725_v36 }
 0xb8c   :  { %v1693_v41 = vrot.slane %v1629_v20, %v6337_v6  ;;  %v1698_v5 = vrot.slane %v1632_v39, %v6334_v55 }
 0xb8e   :  { %v1694_v8 = vsel %vm1657_vm5, %v1693_v41, %v1689_v60  ;;  %v5487_v60 = vld [vmem:[#allocation7] ss:$0 sm:$0xff] }
 0xb8f   :  { %v1635_v43 = vpop.permute.xlu1 %1634  ;;  %v1638_v62 = vpop.permute.xlu0 %1637  ;;  %v1729_v38 = vsel %vm1728_vm13, %v1694_v8, %v1727_v46 }
 0xb90   :  { %v1702_v11 = vrot.slane %v1635_v43, %v6337_v6  ;;  %v1707_v34 = vrot.slane %v1638_v62, %v6334_v55 }
 0xb92   :  { %v1703_v22 = vsel %vm1657_vm5, %v1702_v11, %v1698_v5  ;;  %v5486_v11 = vld [vmem:[#allocation5] ss:$0 sm:$0xff] }
 0xb93   :  { %v1641_v53 = vpop.permute.xlu1 %1640  ;;  %v1731_v24 = vsel %vm1730_vm14, %v1703_v22, %v1729_v38 }
 0xb94   :  { %v1711_v25 = vrot.slane %v1641_v53, %v6337_v6 }
 0xb96   :  { %v1712_v19 = vsel %vm1657_vm5, %v1711_v25, %v1707_v34 }
 0xb97   :  { %v1733_v63 = vsel %vm1732_vm15, %v1712_v19, %v1731_v24 }
 0xb98   :  { %v1647_v31 = vpop.permute.xlu1 %1646  ;;  %v1644_v15 = vpop.permute.xlu0 %1643 }
 0xb99   :  { %v1720_v29 = vrot.slane %v1647_v31, %v6337_v6  ;;  %v1716_v51 = vrot.slane %v1644_v15, %v6334_v55 }
 0xb9b   :  { %v1721_v32 = vsel %vm1657_vm5, %v1720_v29, %v1716_v51 }
 0xb9c   :  { %v1735_v28 = vsel %vm1734_vm1, %v1721_v32, %v1733_v63 }
 0xb9d   :  { %v1737_v12 = vsel %vm365_vm6, %v1735_v28, -inf }
 0xb9e   :  { %1738 = vmax.xlane.f32.xlu0 %v1737_v12 }
 0xc2b   :  { %v1739_v26 = vpop.xlane.xlu0 %1738 }
 0xc2c   :  { %v1740_v33 = vsub.f32 %v6082_v47, %v1739_v26 }
 0xc2e   :  { %v6372_v0 = vmax.f32 %v1740_v33, 0.0 }
 0xc30   :  { %1743 = vst.msk [vmem:[#allocation14] sm:$0xff] %vm365_vm6, %v6372_v0  ;;  %5130 = vmatmul.mubr.msk.f32.vlgmr.msra.gmra.mrb[6].mxu1 %vm365_vm6, %v6372_v0 }
 0xc31   :  { %5139 = vmatprep.mubr.msk.f32.mxu1 %vm5744_vm0, %v7054_v10 }
 0xd03   :  { %v1813_v18 = vpop.f32.mrb[6].mxu1 }
 0xd04   :  { %v1817_v17 = vsel %vm365_vm6, %v1813_v18, 0.0  ;;  %v5131_v37 = vpop.f32.mrb[7].mxu1 }
 0xd05   :  { %v1818_v23 = vrot.slane %v1817_v17, 4 }
 0xd07   :  { %v1819_v21 = vadd.f32 %v1818_v23, %v1817_v17 }
 0xd09   :  { %v1820_v40 = vrot.slane %v1819_v21, 2 }
 0xd0b   :  { %v1821_v42 = vadd.f32 %v1820_v40, %v1819_v21  ;;  %v5488_v40 = vld [vmem:[#allocation8] ss:$0 sm:$0xff] }
 0xd0d   :  { %v1822_v47 = vrot.slane %v1821_v42, 1 }
 0xd0f   :  { %v1823_v20 = vadd.f32 %v1822_v47, %v1821_v42 }
 0xd11   :  { %v1824_v39 = vmul.f32 0.125, %v1823_v20 }
 0xd13   :  { %v1825_v35 = vsub.f32 %v1813_v18, %v1824_v39  ;;  %v5489_v39 = vld [vmem:[#allocation10] ss:$0 sm:$0xff] }
 0xd15   :  { %v1826_v43 = vmul.f32 %v1825_v35, %v1825_v35  ;;  %v1835_v62 = vmul.f32 %v5486_v11, %v1825_v35  ;;  %v418_v11 = vld [vmem:[%s7090_s14] sm:$0xff] }
 0xd17   :  { %v1827_v1 = vsel %vm365_vm6, %v1826_v43, 0.0 }
 0xd18   :  { %v1828_v3 = vrot.slane %v1827_v1, 4 }
 0xd1a   :  { %v1829_v56 = vadd.f32 %v1828_v3, %v1827_v1 }
 0xd1c   :  { %v1830_v4 = vrot.slane %v1829_v56, 2 }
 0xd1e   :  { %v1831_v30 = vadd.f32 %v1830_v4, %v1829_v56  ;;  %v415_v56 = vld [vmem:[%s7089_s6] sm:$0xff] }
 0xd1f   :  { %5138 = vmatpush3.msra.mxu1 %v415_v56 }
 0xd20   :  { %v1832_v13 = vrot.slane %v1831_v30, 1  ;;  %5147 = vmatprep.subr.mxu1 %v7054_v10 }
 0xd22   :  { %v1833_v41 = vadd.f32 %v1832_v13, %v1831_v30 }
 0xd24   :  { %v1834_v14 = vmul.f32 0.125, %v1833_v41 }
 0xd26   :  { %v1836_v58 = vadd.f32 1e-05, %v1834_v14 }
 0xd28   :  { %5346 = vrsqrt.f32 %v1836_v58  ;;  %v5490_v58 = vld [vmem:[%s7085_s25] sm:$0xf] }
 0xd32   :  { %v5347_v53 = vpop.eup %5346 }
 0xd33   :  { %v1838_v16 = vmul.f32 %v5347_v53, %v1835_v62 }
 0xd35   :  { %v1839_v25 = vadd.f32 %v5487_v60, %v1838_v16 }
 0xd37   :  { %v4935_v48 = vmul.f32 -1.442695, %v1839_v25 }
 0xd39   :  { %5348 = vpow2.f32 %v4935_v48 }
 0xd43   :  { %v5349_v44 = vpop.eup %5348 }
 0xd44   :  { %v1843_v5 = vadd.f32 1.0, %v5349_v44 }
 0xd46   :  { %5350 = vrcp.f32 %v1843_v5 }
 0xd50   :  { %v5351_v7 = vpop.eup %5350 }
 0xd51   :  { %1847 = vrot.lane.b32.xlu1 %v5351_v7, %s5745_s5 }
 0xdc3   :  { %v1848_v8 = vpop.permute.xlu1 %1847 }
 0xdc4   :  { %v1850_v34 = vmul.f32 %v1848_v8, %v1839_v25 }
 0xdc6   :  { %5135 = vmatmul.mubr.msk.f32.vlgmr.msra.gmra.mrb[6].mxu0 %vm555_vm7, %v1850_v34 }
 0xdc7   :  { %5144 = vmatprep.mubr.msk.f32.mxu0 %vm5744_vm0, %v7054_v10  ;;  %5143 = vmatpush3.msra.mxu0 %v418_v11 }
 0xdc8   :  { %5215 = vmatprep.subr.bf16.mxu0 %v7053_v9 }
 0xe99   :  { %v1920_v36 = vpop.f32.mrb[6].mxu0 }
 0xe9a   :  { %v1924_v22 = vsel %vm365_vm6, %v1920_v36, 0.0  ;;  %v5136_v46 = vpop.f32.mrb[7].mxu0 }
 0xe9b   :  { %v1925_v31 = vrot.slane %v1924_v22, 4 }
 0xe9d   :  { %v1926_v15 = vadd.f32 %v1925_v31, %v1924_v22 }
 0xe9f   :  { %v1927_v19 = vrot.slane %v1926_v15, 2 }
 0xea1   :  { %v1928_v29 = vadd.f32 %v1927_v19, %v1926_v15 }
 0xea3   :  { %v1929_v51 = vrot.slane %v1928_v29, 1 }
 0xea5   :  { %v1930_v38 = vadd.f32 %v1929_v51, %v1928_v29 }
 0xea7   :  { %v1931_v24 = vmul.f32 0.125, %v1930_v38 }
 0xea9   :  { %v1932_v32 = vsub.f32 %v1920_v36, %v1931_v24 }
 0xeab   :  { %v1933_v63 = vmul.f32 %v1932_v32, %v1932_v32  ;;  %v1942_v42 = vmul.f32 %v5488_v40, %v1932_v32  ;;  %v4939_v32 = vld [vmem:[%s7091_s15] ss:$0 sm:$0xff] }
 0xead   :  { %v1934_v28 = vsel %vm365_vm6, %v1933_v63, 0.0 }
 0xeae   :  { %v1935_v12 = vrot.slane %v1934_v28, 4 }
 0xeb0   :  { %v1936_v26 = vadd.f32 %v1935_v12, %v1934_v28  ;;  %v4940_v12 = vld [vmem:[%s7092_s16] ss:$0 sm:$0xff] }
 0xeb2   :  { %v1937_v33 = vrot.slane %v1936_v26, 2 }
 0xeb4   :  { %v1938_v18 = vadd.f32 %v1937_v33, %v1936_v26 }
 0xeb6   :  { %v1939_v17 = vrot.slane %v1938_v18, 1 }
 0xeb8   :  { %v1940_v37 = vadd.f32 %v1939_v17, %v1938_v18 }
 0xeba   :  { %v1941_v23 = vmul.f32 0.125, %v1940_v37 }
 0xebc   :  { %v1943_v21 = vadd.f32 1e-05, %v1941_v23 }
 0xebe   :  { %5352 = vrsqrt.f32 %v1943_v21 }
 0xec8   :  { %v5353_v47 = vpop.eup %5352 }
 0xec9   :  { %v1945_v20 = vmul.f32 %v5353_v47, %v1942_v42 }
 0xecb   :  { %v1946_v35 = vadd.f32 %v5489_v39, %v1945_v20 }
 0xecd   :  { %v4937_v43 = vmul.f32 -1.442695, %v1946_v35 }
 0xecf   :  { %5354 = vpow2.f32 %v4937_v43 }
 0xed9   :  { %v5355_v1 = vpop.eup %5354 }
 0xeda   :  { %v1950_v3 = vadd.f32 1.0, %v5355_v1 }
 0xedc   :  { %5356 = vrcp.f32 %v1950_v3 }
 0xee6   :  { %v5357_v4 = vpop.eup %5356 }
 0xee7   :  { %1954 = vrot.lane.b32.xlu1 %v5357_v4, %s5745_s5 }
 0xf59   :  { %v1955_v30 = vpop.permute.xlu1 %1954 }
 0xf5a   :  { %v1957_v13 = vmul.f32 %v1955_v30, %v1946_v35 }
 0xf5c   :  { %v1958_v41 = vadd.f32 %v1957_v13, %v1850_v34 }
 0xf5e   :  { %v1959_v14 = vmul.f32 0.70710677, %v1958_v41 }
 0xf60   :  { %5140 = vmatmul.mubr.msk.f32.vlgmr.msra.gmra.mrb[8].mxu1 %vm555_vm7, %v1959_v14 }
 0xf61   :  { %5148 = vmatpush3.msk.msra.mxu1 %vm921_vm8, %v5490_v58  ;;  %5149 = vmatprep.mubr.msk.f32.mxu1 %vm5744_vm0, %v7054_v10 }
 0xf62   :  { %5159 = vmatprep.subr.mxu1 %v7054_v10 }
0x1033   :  { %v2029_v62 = vpop.f32.mrb[8].mxu1 }
0x1034   :  { %v2033_v53 = vsel %vm365_vm6, %v2029_v62, 0.0  ;;  %v5141_v16 = vpop.f32.mrb[9].mxu1 }
0x1035   :  { %v2034_v60 = vrot.slane %v2033_v53, 4 }
0x1037   :  { %v2035_v25 = vadd.f32 %v2034_v60, %v2033_v53 }
0x1039   :  { %v2036_v48 = vrot.slane %v2035_v25, 2 }
0x103b   :  { %v2037_v44 = vadd.f32 %v2036_v48, %v2035_v25  ;;  %v4943_v48 = vld [vmem:[%s7093_s0] ss:$0 sm:$0xff] }
0x103d   :  { %v2038_v5 = vrot.slane %v2037_v44, 1 }
0x103f   :  { %v2039_v7 = vadd.f32 %v2038_v5, %v2037_v44 }
0x1041   :  { %v2040_v8 = vmul.f32 0.125, %v2039_v7  ;;  %v4944_v7 = vld [vmem:[%s7094_s30] ss:$0 sm:$0xff] }
0x1043   :  { %v2041_v34 = vsub.f32 %v2029_v62, %v2040_v8 }
0x1045   :  { %v2042_v36 = vmul.f32 %v2041_v34, %v2041_v34  ;;  %v2057_v63 = vmul.f32 %v4939_v32, %v2041_v34 }
0x1047   :  { %v2043_v22 = vsel %vm365_vm6, %v2042_v36, 0.0 }
0x1048   :  { %v2044_v46 = vrot.slane %v2043_v22, 4 }
0x104a   :  { %v2045_v31 = vadd.f32 %v2044_v46, %v2043_v22 }
0x104c   :  { %v2046_v15 = vrot.slane %v2045_v31, 2 }
0x104e   :  { %v2047_v19 = vadd.f32 %v2046_v15, %v2045_v31 }
0x1050   :  { %v2048_v29 = vrot.slane %v2047_v19, 1 }
0x1052   :  { %v2049_v51 = vadd.f32 %v2048_v29, %v2047_v19 }
0x1054   :  { %v2050_v38 = vmul.f32 0.125, %v2049_v51 }
0x1056   :  { %v2058_v24 = vadd.f32 1e-05, %v2050_v38  ;;  %v5491_v38 = vld [vmem:[%s5799_s8] sm:$0xff] }
0x1058   :  { %5358 = vrsqrt.f32 %v2058_v24 }
0x1062   :  { %v5359_v28 = vpop.eup %5358 }
0x1063   :  { %v2060_v26 = vmul.f32 %v5359_v28, %v2057_v63 }
0x1065   :  { %v2067_v33 = vadd.f32 %v4940_v12, %v2060_v26 }
0x1067   :  { %v4941_v18 = vmul.f32 -1.442695, %v2067_v33 }
0x1069   :  { %5360 = vpow2.f32 %v4941_v18 }
0x1073   :  { %v5361_v17 = vpop.eup %5360 }
0x1074   :  { %v2071_v37 = vadd.f32 1.0, %v5361_v17 }
0x1076   :  { %5362 = vrcp.f32 %v2071_v37 }
0x1080   :  { %v5363_v23 = vpop.eup %5362 }
0x1081   :  { %2075 = vrot.lane.b32.xlu1 %v5363_v23, %s5745_s5 }
0x10f3   :  { %v2076_v21 = vpop.permute.xlu1 %2075 }
0x10f4   :  { %v2078_v40 = vmul.f32 %v2076_v21, %v2067_v33 }
0x10f6   :  { %5145 = vmatmul.mubr.msk.f32.vlgmr.msra.gmra.mrb[8].mxu0 %vm555_vm7, %v2078_v40 }
0x10f7   :  { %5217 = vmatpush3.bf16.msra.mxu0 %v6020_v27  ;;  %5156 = vmatprep.mubr.msk.f32.mxu0 %vm5744_vm0, %v7054_v10 }
0x10f8   :  { %5164 = vmatprep.subr.mxu0 %v7054_v10 }
0x11c9   :  { %v2148_v42 = vpop.f32.mrb[8].mxu0 }
0x11ca   :  { %v2152_v47 = vsel %vm365_vm6, %v2148_v42, 0.0  ;;  %v5146_v20 = vpop.f32.mrb[9].mxu0 }
0x11cb   :  { %v2153_v39 = vrot.slane %v2152_v47, 4 }
0x11cd   :  { %v2154_v35 = vadd.f32 %v2153_v39, %v2152_v47 }
0x11cf   :  { %v2155_v43 = vrot.slane %v2154_v35, 2 }
0x11d1   :  { %v2156_v1 = vadd.f32 %v2155_v43, %v2154_v35 }
0x11d3   :  { %v2157_v3 = vrot.slane %v2156_v1, 1 }
0x11d5   :  { %v2158_v56 = vadd.f32 %v2157_v3, %v2156_v1 }
0x11d7   :  { %v2159_v4 = vmul.f32 0.125, %v2158_v56  ;;  %v5492_v56 = vld [vmem:[%s7086_s19] ss:$0 sm:$0xff] }
0x11d9   :  { %v2160_v30 = vsub.f32 %v2148_v42, %v2159_v4 }
0x11db   :  { %v2161_v13 = vmul.f32 %v2160_v30, %v2160_v30  ;;  %v2176_v44 = vmul.f32 %v4943_v48, %v2160_v30 }
0x11dd   :  { %v2162_v41 = vsel %vm365_vm6, %v2161_v13, 0.0 }
0x11de   :  { %v2163_v14 = vrot.slane %v2162_v41, 4 }
0x11e0   :  { %v2164_v58 = vadd.f32 %v2163_v14, %v2162_v41  ;;  %v7052_v41 = vsub.f32 1.0, %v6372_v0  ;;  %v5493_v14 = vld [vmem:[%s7087_s24] ss:$0 sm:$0xff] }
0x11e2   :  { %v2165_v11 = vrot.slane %v2164_v58, 2 }
0x11e4   :  { %v2166_v62 = vadd.f32 %v2165_v11, %v2164_v58 }
0x11e6   :  { %v2167_v53 = vrot.slane %v2166_v62, 1 }
0x11e8   :  { %v2168_v16 = vadd.f32 %v2167_v53, %v2166_v62 }
0x11ea   :  { %v2169_v60 = vmul.f32 0.125, %v2168_v16 }
0x11ec   :  { %v2177_v25 = vadd.f32 1e-05, %v2169_v60 }
0x11ee   :  { %5364 = vrsqrt.f32 %v2177_v25 }
0x11f8   :  { %v5365_v5 = vpop.eup %5364 }
0x11f9   :  { %v2179_v8 = vmul.f32 %v5365_v5, %v2176_v44 }
0x11fb   :  { %v2186_v34 = vadd.f32 %v4944_v7, %v2179_v8 }
0x11fd   :  { %v4945_v36 = vmul.f32 -1.442695, %v2186_v34 }
0x11ff   :  { %5366 = vpow2.f32 %v4945_v36 }
0x1209   :  { %v5367_v22 = vpop.eup %5366 }
0x120a   :  { %v2190_v46 = vadd.f32 1.0, %v5367_v22 }
0x120c   :  { %5368 = vrcp.f32 %v2190_v46 }
0x1216   :  { %v5369_v31 = vpop.eup %5368 }
0x1217   :  { %2194 = vrot.lane.b32.xlu1 %v5369_v31, %s5745_s5 }
0x1289   :  { %v2195_v15 = vpop.permute.xlu1 %2194 }
0x128a   :  { %v2197_v19 = vmul.f32 %v2195_v15, %v2186_v34 }
0x128c   :  { %v2198_v29 = vadd.f32 %v2197_v19, %v2078_v40 }
0x128e   :  { %v6414_v51 = vmul.f32 0.70710677, %v2198_v29 }
0x1290   :  { %5150 = vmatmul.mubr.msk.f32.vlgmr.msra.gmra.mrb[10].mxu1 %vm7051_vm9, %v6414_v51 }
0x1291   :  { %5160 = vmatpush3.msra.mxu1 %v5491_v38  ;;  %5161 = vmatprep.mubr.msk.f32.mxu1 %vm5744_vm0, %v7054_v10 }
0x1292   :  { %5169 = vmatprep.subr.mxu1 %v7054_v10 }
0x1363   :  { %v2271_v24 = vpop.f32.mrb[10].mxu1 }
0x1364   :  { %v2275_v32 = vsel %vm365_vm6, %v2271_v24, 0.0  ;;  %v5151_v63 = vpop.f32.mrb[11].mxu1 }
0x1365   :  { %v2276_v28 = vrot.slane %v2275_v32, 4 }
0x1367   :  { %v2277_v12 = vadd.f32 %v2276_v28, %v2275_v32 }
0x1369   :  { %v2278_v26 = vrot.slane %v2277_v12, 2 }
0x136b   :  { %v2279_v33 = vadd.f32 %v2278_v26, %v2277_v12 }
0x136d   :  { %v2280_v18 = vrot.slane %v2279_v33, 1 }
0x136f   :  { %v2281_v17 = vadd.f32 %v2280_v18, %v2279_v33 }
0x1371   :  { %v2282_v37 = vmul.f32 0.125, %v2281_v17 }
0x1373   :  { %v2283_v23 = vsub.f32 %v2271_v24, %v2282_v37 }
0x1375   :  { %v2284_v21 = vmul.f32 %v2283_v23, %v2283_v23  ;;  %v2293_v4 = vmul.f32 %v5492_v56, %v2283_v23 }
0x1377   :  { %v2285_v40 = vsel %vm365_vm6, %v2284_v21, 0.0 }
0x1378   :  { %v2286_v42 = vrot.slane %v2285_v40, 4 }
0x137a   :  { %v2287_v47 = vadd.f32 %v2286_v42, %v2285_v40 }
0x137c   :  { %v2288_v20 = vrot.slane %v2287_v47, 2 }
0x137e   :  { %v2289_v39 = vadd.f32 %v2288_v20, %v2287_v47 }
0x1380   :  { %v2290_v35 = vrot.slane %v2289_v39, 1 }
0x1382   :  { %v2291_v43 = vadd.f32 %v2290_v35, %v2289_v39 }
0x1384   :  { %v2292_v1 = vmul.f32 0.125, %v2291_v43 }
0x1386   :  { %v2294_v3 = vadd.f32 1e-05, %v2292_v1 }
0x1388   :  { %5370 = vrsqrt.f32 %v2294_v3 }
0x1392   :  { %v5371_v30 = vpop.eup %5370 }
0x1393   :  { %v2296_v13 = vmul.f32 %v5371_v30, %v2293_v4 }
0x1395   :  { %v2297_v58 = vadd.f32 %v5493_v14, %v2296_v13 }
0x1397   :  { %v6429_v11 = vmul.f32 %v2297_v58, %v7052_v41 }
0x1399   :  { %v2374_v62 = vrot.slane %v6429_v11, %v6092_v50  ;;  %v2352_v53 = vrot.slane %v6429_v11, %v6080_v45  ;;  %v2407_v16 = vrot.slane %v6429_v11, %v6107_v57  ;;  %v2418_v60 = vrot.slane %v6429_v11, %v6112_v59 }
0x139a   :  { %v2363_v25 = vrot.slane %v6429_v11, %v6087_v49  ;;  %v6443_v48 = vrot.slane %v6429_v11, %v6117_v61  ;;  %v2385_v44 = vrot.slane %v6429_v11, %v6097_v52  ;;  %v2396_v5 = vrot.slane %v6429_v11, %v6102_v54 }
0x139b   :  { %2376 = vbcast.lane.b32.xlu0 %v2374_v62, 256  ;;  %2354 = vbcast.lane.b32.xlu1 %v2352_v53, 256  ;;  %v2307_v7 = vrot.slane %v6429_v11, %v6126_v2  ;;  %v2300_v21 = vcombine.high %v6429_v11, %v6429_v11 }
0x139d   :  { %v2323_v8 = vrot.slane %v2307_v7, %v6126_v2  ;;  %v2315_v46 = vcombine.high %v2307_v7, %v2307_v7  ;;  %v2314_v39 = vrot.slane %v2300_v21, %v6126_v2 }
0x139f   :  { %2413 = vbcast.lane.b32.xlu0 %v2407_v16, 264  ;;  %2358 = vbcast.lane.b32.xlu1 %v2352_v53, 264  ;;  %v2345_v34 = vcombine.high %v2323_v8, %v2323_v8  ;;  %v6458_v22 = vrot.slane %v2323_v8, %v6080_v45  ;;  %v2337_v38 = vrot.slane %v2315_v46, %v6126_v2 }
0x13a0   :  { %v2316_v56 = vcombine.high %v2314_v39, %v2314_v39  ;;  %v2330_v4 = vrot.slane %v2314_v39, %v6126_v2 }
0x13a1   :  { %v6455_v36 = vrot.slane %v2345_v34, %v6080_v45  ;;  %v6476_v28 = vrot.slane %v2337_v38, %v6080_v45  ;;  %v2347_v42 = vcombine.high %v2337_v38, %v2337_v38 }
0x13a3   :  { %2424 = vbcast.lane.b32.xlu0 %v2418_v60, 264  ;;  %2365 = vbcast.lane.b32.xlu1 %v2363_v25, 256  ;;  %v6502_v35 = vrot.slane %v2347_v42, %v6080_v45 }
0x13a7   :  { %2435 = vbcast.lane.b32.xlu0 %v6443_v48, 264  ;;  %2369 = vbcast.lane.b32.xlu1 %v2363_v25, 264 }
0x13ab   :  { %2646 = vbcast.lane.b32.xlu0 %v2352_v53, 264  ;;  %2380 = vbcast.lane.b32.xlu1 %v2374_v62, 264 }
0x13af   :  { %2668 = vbcast.lane.b32.xlu0 %v2374_v62, 264  ;;  %2387 = vbcast.lane.b32.xlu1 %v2385_v44, 256 }
0x13b3   :  { %2679 = vbcast.lane.b32.xlu0 %v2385_v44, 264  ;;  %2391 = vbcast.lane.b32.xlu1 %v2385_v44, 264 }
0x13b7   :  { %2690 = vbcast.lane.b32.xlu0 %v2396_v5, 264  ;;  %2398 = vbcast.lane.b32.xlu1 %v2396_v5, 256 }
0x13bb   :  { %2701 = vbcast.lane.b32.xlu0 %v2407_v16, 264  ;;  %2402 = vbcast.lane.b32.xlu1 %v2396_v5, 264 }
0x13bf   :  { %2712 = vbcast.lane.b32.xlu0 %v2418_v60, 264  ;;  %2409 = vbcast.lane.b32.xlu1 %v2407_v16, 256 }
0x13c3   :  { %2420 = vbcast.lane.b32.xlu1 %v2418_v60, 256 }
0x13c7   :  { %2431 = vbcast.lane.b32.xlu1 %v6443_v48, 256 }
0x13cb   :  { %2642 = vbcast.lane.b32.xlu1 %v2352_v53, 256  ;;  %v6519_v53 = vrot.slane %v2330_v4, %v6080_v45 }
0x13cf   :  { %2653 = vbcast.lane.b32.xlu1 %v2363_v25, 256 }
0x13d3   :  { %2657 = vbcast.lane.b32.xlu1 %v2363_v25, 264 }
0x13d7   :  { %2664 = vbcast.lane.b32.xlu1 %v2374_v62, 256  ;;  %v2344_v62 = vrot.slane %v2316_v56, %v6126_v2 }
0x13db   :  { %2675 = vbcast.lane.b32.xlu1 %v2385_v44, 256  ;;  %v6528_v44 = vrot.slane %v2344_v62, %v6080_v45 }
0x13df   :  { %2686 = vbcast.lane.b32.xlu1 %v2396_v5, 256  ;;  %v2346_v5 = vcombine.high %v2330_v4, %v2330_v4 }
0x13e3   :  { %2697 = vbcast.lane.b32.xlu1 %v2407_v16, 256 }
0x13e7   :  { %2708 = vbcast.lane.b32.xlu1 %v2418_v60, 256 }
0x140d   :  { %v2377_v31 = vpop.permute.xlu0 %2376  ;;  %v2355_v15 = vpop.permute.xlu1 %2354 }
0x140e   :  { %vm2481_vm2 = vcmp.ge.f32.partialorder %v6455_v36, %v2377_v31  ;;  %vm2477_vm3 = vcmp.ge.f32.partialorder %v6458_v22, %v2355_v15  ;;  %v6536_v31 = vrot.slane %v2346_v5, %v6080_v45  ;;  %v2348_v15 = vcombine.high %v2344_v62, %v2344_v62 }
0x140f   :  { %v6463_v19 = vsel %vm2477_vm3, 1.0, %v7054_v10  ;;  %v6469_v32 = vsel %vm2481_vm2, 1.0, %v7054_v10 }
0x1410   :  { %v2525_v29 = vsel %vm365_vm6, %v6463_v19, 0.0  ;;  %v2537_v26 = vsel %vm365_vm6, %v6469_v32, 0.0 }
0x1411   :  { %v2359_v24 = vpop.permute.xlu1 %2358  ;;  %2526 = vadd.xlane.f32.xlu1 %v2525_v29  ;;  %v2414_v14 = vpop.permute.xlu0 %2413 }
0x1412   :  { %vm2478_vm4 = vcmp.ge.f32.partialorder %v6458_v22, %v2359_v24 }
0x1413   :  { %v6473_v63 = vsel %vm2478_vm4, 1.0, %v7054_v10 }
0x1414   :  { %v2528_v12 = vsel %vm365_vm6, %v6473_v63, 0.0 }
0x1415   :  { %v2366_v33 = vpop.permute.xlu1 %2365  ;;  %2529 = vadd.xlane.f32.xlu0 %v2528_v12  ;;  %2538 = vadd.xlane.f32.xlu1 %v2537_v26  ;;  %v2425_v8 = vpop.permute.xlu0 %2424 }
0x1416   :  { %vm2479_vm2 = vcmp.ge.f32.partialorder %v6476_v28, %v2366_v33  ;;  %v6544_v33 = vrot.slane %v2348_v15, %v6080_v45 }
0x1417   :  { %v6484_v18 = vsel %vm2479_vm2, 1.0, %v7054_v10 }
0x1418   :  { %v2531_v17 = vsel %vm365_vm6, %v6484_v18, 0.0  ;;  %v2575_v5 = vmul.f32 %v6484_v18, %v6476_v28 }
0x1419   :  { %v2370_v37 = vpop.permute.xlu1 %2369  ;;  %2532 = vadd.xlane.f32.xlu0 %v2531_v17  ;;  %v2436_v12 = vpop.permute.xlu0 %2435 }
0x141a   :  { %vm2480_vm3 = vcmp.ge.f32.partialorder %v6476_v28, %v2370_v37 }
0x141b   :  { %v6490_v23 = vsel %vm2480_vm3, 1.0, %v7054_v10 }
0x141c   :  { %v2534_v40 = vsel %vm365_vm6, %v6490_v23, 0.0 }
0x141d   :  { %v2381_v47 = vpop.permute.xlu1 %2380  ;;  %2535 = vadd.xlane.f32.xlu0 %v2534_v40 }
0x141e   :  { %vm2482_vm4 = vcmp.ge.f32.partialorder %v6455_v36, %v2381_v47 }
0x141f   :  { %v6498_v20 = vsel %vm2482_vm4, 1.0, %v7054_v10 }
0x1420   :  { %v2540_v43 = vsel %vm365_vm6, %v6498_v20, 0.0 }
0x1421   :  { %v2388_v1 = vpop.permute.xlu1 %2387  ;;  %2541 = vadd.xlane.f32.xlu0 %v2540_v43 }
0x1422   :  { %vm2483_vm2 = vcmp.ge.f32.partialorder %v6502_v35, %v2388_v1 }
0x1423   :  { %v6508_v3 = vsel %vm2483_vm2, 1.0, %v7054_v10  ;;  %vm2488_vm2 = vcmp.ge.f32.partialorder %v6528_v44, %v2414_v14  ;;  %v2573_v14 = vmul.f32 %v6463_v19, %v6458_v22  ;;  %v2577_v19 = vmul.f32 %v6469_v32, %v6455_v36 }
0x1424   :  { %v2543_v30 = vsel %vm365_vm6, %v6508_v3, 0.0  ;;  %v4959_v24 = vsel %vm2488_vm2, 1.0, %v7054_v10  ;;  %vm2492_vm2 = vcmp.ge.f32.partialorder %v6544_v33, %v2436_v12  ;;  %v2579_v18 = vmul.f32 %v6508_v3, %v6502_v35 }
0x1425   :  { %v2392_v13 = vpop.permute.xlu1 %2391  ;;  %2544 = vadd.xlane.f32.xlu1 %v2543_v30  ;;  %v2558_v17 = vsel %vm365_vm6, %v4959_v24, 0.0  ;;  %v4963_v1 = vsel %vm2492_vm2, 1.0, %v7054_v10 }
0x1426   :  { %vm2484_vm3 = vcmp.ge.f32.partialorder %v6502_v35, %v2392_v13  ;;  %v2570_v4 = vsel %vm365_vm6, %v4963_v1, 0.0  ;;  %v2574_v13 = vmul.f32 %v6473_v63, %v6458_v22  ;;  %v2595_v63 = vsel %vm365_vm6, %v2575_v5, 0.0 }
0x1427   :  { %v6515_v58 = vsel %vm2484_vm3, 1.0, %v7054_v10  ;;  %v2578_v22 = vmul.f32 %v6498_v20, %v6455_v36  ;;  %v2607_v20 = vsel %vm365_vm6, %v2579_v18, 0.0 }
0x1428   :  { %v2546_v16 = vsel %vm365_vm6, %v6515_v58, 0.0  ;;  %v2592_v62 = vsel %vm365_vm6, %v2574_v13, 0.0 }
0x1429   :  { %v2399_v60 = vpop.permute.xlu1 %2398  ;;  %2547 = vadd.xlane.f32.xlu0 %v2546_v16  ;;  %v2589_v16 = vsel %vm365_vm6, %v2573_v14, 0.0 }
0x142a   :  { %vm2485_vm4 = vcmp.ge.f32.partialorder %v6519_v53, %v2399_v60  ;;  %v2576_v60 = vmul.f32 %v6490_v23, %v6476_v28  ;;  %v2601_v23 = vsel %vm365_vm6, %v2577_v19, 0.0  ;;  %v2580_v28 = vmul.f32 %v6515_v58, %v6502_v35 }
0x142b   :  { %v6525_v25 = vsel %vm2485_vm4, 1.0, %v7054_v10  ;;  %vm2490_vm4 = vcmp.ge.f32.partialorder %v6536_v31, %v2425_v8  ;;  %v2604_v8 = vsel %vm365_vm6, %v2578_v22, 0.0 }
0x142c   :  { %v2549_v7 = vsel %vm365_vm6, %v6525_v25, 0.0  ;;  %v4961_v40 = vsel %vm2490_vm4, 1.0, %v7054_v10  ;;  %v2581_v32 = vmul.f32 %v6525_v25, %v6519_v53 }
0x142d   :  { %v2403_v34 = vpop.permute.xlu1 %2402  ;;  %2550 = vadd.xlane.f32.xlu1 %v2549_v7  ;;  %v2564_v47 = vsel %vm365_vm6, %v4961_v40, 0.0  ;;  %v2598_v7 = vsel %vm365_vm6, %v2576_v60, 0.0 }
0x142e   :  { %vm2486_vm3 = vcmp.ge.f32.partialorder %v6519_v53, %v2403_v34  ;;  %v2610_v34 = vsel %vm365_vm6, %v2580_v28, 0.0  ;;  %v2613_v58 = vsel %vm365_vm6, %v2581_v32, 0.0 }
0x142f   :  { %v4957_v46 = vsel %vm2486_vm3, 1.0, %v7054_v10 }
0x1430   :  { %v2552_v29 = vsel %vm365_vm6, %v4957_v46, 0.0  ;;  %v2582_v36 = vmul.f32 %v4957_v46, %v6519_v53  ;;  %v2586_v46 = vmul.f32 %v4961_v40, %v6536_v31 }
0x1431   :  { %v2410_v38 = vpop.permute.xlu1 %2409  ;;  %2553 = vadd.xlane.f32.xlu0 %v2552_v29  ;;  %v2584_v29 = vmul.f32 %v4959_v24, %v6528_v44  ;;  %v2588_v24 = vmul.f32 %v4963_v1, %v6544_v33 }
0x1432   :  { %vm2487_vm9 = vcmp.ge.f32.partialorder %v6528_v44, %v2410_v38  ;;  %v2616_v15 = vsel %vm365_vm6, %v2582_v36, 0.0  ;;  %v2628_v25 = vsel %vm365_vm6, %v2586_v46, 0.0 }
0x1433   :  { %v4958_v26 = vsel %vm2487_vm9, 1.0, %v7054_v10  ;;  %v2622_v3 = vsel %vm365_vm6, %v2584_v29, 0.0 }
0x1434   :  { %v2555_v37 = vsel %vm365_vm6, %v4958_v26, 0.0  ;;  %v2583_v35 = vmul.f32 %v4958_v26, %v6528_v44  ;;  %v2634_v26 = vsel %vm365_vm6, %v2588_v24, 0.0 }
0x1435   :  { %v2421_v21 = vpop.permute.xlu1 %2420  ;;  %2559 = vadd.xlane.f32.xlu0 %v2558_v17  ;;  %2556 = vadd.xlane.f32.xlu1 %v2555_v37 }
0x1436   :  { %vm2489_vm3 = vcmp.ge.f32.partialorder %v6536_v31, %v2421_v21  ;;  %v2619_v38 = vsel %vm365_vm6, %v2583_v35, 0.0 }
0x1437   :  { %v4960_v42 = vsel %vm2489_vm3, 1.0, %v7054_v10 }
0x1438   :  { %v2561_v39 = vsel %vm365_vm6, %v4960_v42, 0.0  ;;  %v2585_v53 = vmul.f32 %v4960_v42, %v6536_v31  ;;  %v2647_v31 = vpop.permute.xlu0 %2646 }
0x1439   :  { %v2432_v43 = vpop.permute.xlu1 %2431  ;;  %2565 = vadd.xlane.f32.xlu0 %v2564_v47  ;;  %2562 = vadd.xlane.f32.xlu1 %v2561_v39 }
0x143a   :  { %vm2491_vm9 = vcmp.ge.f32.partialorder %v6544_v33, %v2432_v43  ;;  %v2625_v12 = vsel %vm365_vm6, %v2585_v53, 0.0 }
0x143b   :  { %v4962_v56 = vsel %vm2491_vm9, 1.0, %v7054_v10 }
0x143c   :  { %v2567_v30 = vsel %vm365_vm6, %v4962_v56, 0.0  ;;  %v2587_v44 = vmul.f32 %v4962_v56, %v6544_v33  ;;  %v6602_v21 = vpop.permute.xlu0 %2668 }
0x143d   :  { %2571 = vadd.xlane.f32.xlu0 %v2570_v4  ;;  %2568 = vadd.xlane.f32.xlu1 %v2567_v30  ;;  %v2643_v37 = vpop.permute.xlu1 %2642 }
0x143e   :  { %v2631_v17 = vsel %vm365_vm6, %v2587_v44, 0.0 }
0x1440   :  { %v6604_v42 = vpop.permute.xlu0 %2679 }
0x1441   :  { %2593 = vadd.xlane.f32.xlu0 %v2592_v62  ;;  %2590 = vadd.xlane.f32.xlu1 %v2589_v16  ;;  %v2654_v40 = vpop.permute.xlu1 %2653 }
0x1444   :  { %v6606_v47 = vpop.permute.xlu0 %2690 }
0x1445   :  { %2599 = vadd.xlane.f32.xlu0 %v2598_v7  ;;  %2596 = vadd.xlane.f32.xlu1 %v2595_v63  ;;  %v2658_v33 = vpop.permute.xlu1 %2657 }
0x1448   :  { %v6608_v43 = vpop.permute.xlu0 %2701 }
0x1449   :  { %2605 = vadd.xlane.f32.xlu0 %v2604_v8  ;;  %2602 = vadd.xlane.f32.xlu1 %v2601_v23  ;;  %v2665_v39 = vpop.permute.xlu1 %2664 }
0x144c   :  { %v6610_v56 = vpop.permute.xlu0 %2712 }
0x144d   :  { %2611 = vadd.xlane.f32.xlu0 %v2610_v34  ;;  %2608 = vadd.xlane.f32.xlu1 %v2607_v20  ;;  %v2676_v1 = vpop.permute.xlu1 %2675 }
0x1451   :  { %2617 = vadd.xlane.f32.xlu0 %v2616_v15  ;;  %2614 = vadd.xlane.f32.xlu1 %v2613_v58  ;;  %v6612_v4 = vpop.permute.xlu1 %2686 }
0x1455   :  { %2623 = vadd.xlane.f32.xlu0 %v2622_v3  ;;  %2620 = vadd.xlane.f32.xlu1 %v2619_v38 }
0x1459   :  { %2629 = vadd.xlane.f32.xlu0 %v2628_v25  ;;  %2626 = vadd.xlane.f32.xlu1 %v2625_v12 }
0x145d   :  { %2635 = vadd.xlane.f32.xlu0 %v2634_v26  ;;  %2632 = vadd.xlane.f32.xlu1 %v2631_v17 }
0x146e   :  { %2719 = vbcast.lane.b32.xlu1 %v6443_v48, 256 }
0x1473   :  { %2723 = vbcast.lane.b32.xlu0 %v6443_v48, 264  ;;  %v6614_v48 = vpop.permute.xlu1 %2697 }
0x1477   :  { %v6616_v14 = vpop.permute.xlu1 %2708 }
0x149e   :  { %v2527_v62 = vpop.xlane.xlu1 %2526 }
0x149f   :  { %5372 = vrcp.f32 %v2527_v62  ;;  %v2741_v36 = vmul.f32 %v2643_v37, %v2527_v62 }
0x14a1   :  { %v2757_v46 = vadd.f32 1.0, %v2741_v36 }
0x14a2   :  { %v2530_v30 = vpop.xlane.xlu0 %2529  ;;  %v2539_v60 = vpop.xlane.xlu1 %2538 }
0x14a3   :  { %5374 = vrcp.f32 %v2530_v30  ;;  %v2742_v32 = vmul.f32 %v2647_v31, %v2530_v30  ;;  %v2745_v26 = vmul.f32 %v2665_v39, %v2539_v60 }
0x14a5   :  { %v2758_v12 = vadd.f32 1.0, %v2742_v32 }
0x14a6   :  { %v2533_v13 = vpop.xlane.xlu0 %2532 }
0x14a7   :  { %5376 = vrcp.f32 %v2533_v13  ;;  %v2743_v53 = vmul.f32 %v2654_v40, %v2533_v13 }
0x14a9   :  { %v5373_v29 = vpop.eup %5372  ;;  %v2759_v9 = vadd.f32 1.0, %v2743_v53 }
0x14aa   :  { %v2536_v16 = vpop.xlane.xlu0 %2535 }
0x14ab   :  { %5378 = vrcp.f32 %v2536_v16  ;;  %v2744_v25 = vmul.f32 %v2658_v33, %v2536_v16 }
0x14ac   :  { %5380 = vrcp.f32 %v2539_v60 }
0x14ad   :  { %v5375_v38 = vpop.eup %5374  ;;  %v2760_v10 = vadd.f32 1.0, %v2744_v25 }
0x14ae   :  { %v2542_v5 = vpop.xlane.xlu0 %2541 }
0x14af   :  { %5382 = vrcp.f32 %v2542_v5  ;;  %v2746_v40 = vmul.f32 %v6602_v21, %v2542_v5 }
0x14b1   :  { %v5377_v31 = vpop.eup %5376 }
0x14b2   :  { %v2545_v7 = vpop.xlane.xlu1 %2544 }
0x14b3   :  { %5384 = vrcp.f32 %v2545_v7  ;;  %v2747_v13 = vmul.f32 %v2676_v1, %v2545_v7 }
0x14b5   :  { %v5379_v41 = vpop.eup %5378  ;;  %v2763_v7 = vadd.f32 1.0, %v2747_v13 }
0x14b6   :  { %v2548_v63 = vpop.xlane.xlu0 %2547  ;;  %v5381_v32 = vpop.eup %5380 }
0x14b7   :  { %5386 = vrcp.f32 %v2548_v63  ;;  %v2748_v21 = vmul.f32 %v6604_v42, %v2548_v63 }
0x14b9   :  { %v2764_v63 = vadd.f32 1.0, %v2748_v21 }
0x14ba   :  { %v6618_v22 = vpop.xlane.xlu1 %2550 }
0x14bb   :  { %5388 = vrcp.f32 %v6618_v22  ;;  %v2749_v25 = vmul.f32 %v6612_v4, %v6618_v22 }
0x14be   :  { %v6620_v19 = vpop.xlane.xlu0 %2553 }
0x14bf   :  { %5390 = vrcp.f32 %v6620_v19 }
0x14c2   :  { %v6622_v8 = vpop.xlane.xlu0 %2559  ;;  %v6624_v23 = vpop.xlane.xlu1 %2556 }
0x14c3   :  { %5392 = vrcp.f32 %v6622_v8 }
0x14c4   :  { %5394 = vrcp.f32 %v6624_v23 }
0x14c6   :  { %v6626_v28 = vpop.xlane.xlu0 %2565  ;;  %v6628_v18 = vpop.xlane.xlu1 %2562 }
0x14c7   :  { %5396 = vrcp.f32 %v6626_v28  ;;  %v2753_v21 = vmul.f32 %v6616_v14, %v6628_v18 }
0x14c8   :  { %5398 = vrcp.f32 %v6628_v18 }
0x14c9   :  { %v2769_v18 = vadd.f32 1.0, %v2753_v21 }
0x14ca   :  { %v6630_v34 = vpop.xlane.xlu0 %2571  ;;  %v6632_v20 = vpop.xlane.xlu1 %2568 }
0x14cb   :  { %5400 = vrcp.f32 %v6630_v34 }
0x14cc   :  { %5402 = vrcp.f32 %v6632_v20 }
0x14ce   :  { %v2594_v15 = vpop.xlane.xlu0 %2593  ;;  %v2591_v58 = vpop.xlane.xlu1 %2590 }
0x14cf   :  { %v4965_v35 = vadd.f32 -1.0, %v2594_v15  ;;  %v4964_v3 = vadd.f32 -1.0, %v2591_v58  ;;  %vm2774_vm4 = vcmp.gt.f32.partialorder %v2758_v12, %v2594_v15  ;;  %vm2773_vm2 = vcmp.gt.f32.partialorder %v2757_v46, %v2591_v58 }
0x14d1   :  { %v2808_v24 = vmul.f32 %v5375_v38, %v4965_v35  ;;  %v2806_v44 = vmul.f32 %v5373_v29, %v4964_v3  ;;  %v5383_v29 = vpop.eup %5382  ;;  %v2761_v35 = vadd.f32 1.0, %v2745_v26 }
0x14d2   :  { %v2600_v17 = vpop.xlane.xlu0 %2599  ;;  %v2597_v37 = vpop.xlane.xlu1 %2596 }
0x14d3   :  { %v4967_v30 = vadd.f32 -1.0, %v2600_v17  ;;  %v4966_v62 = vadd.f32 -1.0, %v2597_v37  ;;  %v2838_v2 = vsel %vm2774_vm4, %v2808_v24, -inf  ;;  %v2837_v36 = vsel %vm2773_vm2, %v2806_v44, -inf  ;;  %v5385_v38 = vpop.eup %5384 }
0x14d4   :  { %2873 = vperm.xlu0 %5285, %v2838_v2   ;;  %2870 = vperm.xlu1 %5284, %v2837_v36   ;;  %vm2776_vm3 = vcmp.gt.f32.partialorder %v2760_v10, %v2600_v17  ;;  %vm2775_vm9 = vcmp.gt.f32.partialorder %v2759_v9, %v2597_v37  ;;  %v2762_v2 = vadd.f32 1.0, %v2746_v40  ;;  %v5387_v42 = vpop.eup %5386  ;;  %v2750_v44 = vmul.f32 %v6606_v47, %v6620_v19 }
0x14d5   :  { %v2812_v33 = vmul.f32 %v5379_v41, %v4967_v30  ;;  %v2810_v39 = vmul.f32 %v5377_v31, %v4966_v62  ;;  %v2752_v37 = vmul.f32 %v6608_v43, %v6622_v8  ;;  %v5389_v62 = vpop.eup %5388  ;;  %v2765_v47 = vadd.f32 1.0, %v2749_v25 }
0x14d6   :  { %v2606_v16 = vpop.xlane.xlu0 %2605  ;;  %v2603_v60 = vpop.xlane.xlu1 %2602 }
0x14d7   :  { %v4969_v15 = vadd.f32 -1.0, %v2606_v16  ;;  %v4968_v58 = vadd.f32 -1.0, %v2603_v60  ;;  %v2840_v5 = vsel %vm2776_vm3, %v2812_v33, -inf  ;;  %v2839_v3 = vsel %vm2775_vm9, %v2810_v39, -inf  ;;  %v5391_v36 = vpop.eup %5390 }
0x14d8   :  { %2879 = vperm.xlu0 %5285, %v2840_v5   ;;  %2876 = vperm.xlu1 %5284, %v2839_v3   ;;  %vm2778_vm4 = vcmp.gt.f32.partialorder %v2762_v2, %v2606_v16  ;;  %vm2777_vm2 = vcmp.gt.f32.partialorder %v2761_v35, %v2603_v60  ;;  %v2766_v33 = vadd.f32 1.0, %v2750_v44  ;;  %v2751_v39 = vmul.f32 %v6614_v48, %v6624_v23 }
0x14d9   :  { %v2816_v41 = vmul.f32 %v5383_v29, %v4969_v15  ;;  %v2814_v1 = vmul.f32 %v5381_v32, %v4968_v58  ;;  %v2768_v13 = vadd.f32 1.0, %v2752_v37  ;;  %v5393_v32 = vpop.eup %5392  ;;  %v2754_v35 = vmul.f32 %v6610_v56, %v6626_v28 }
0x14da   :  { %v2612_v10 = vpop.xlane.xlu0 %2611  ;;  %v2609_v9 = vpop.xlane.xlu1 %2608  ;;  %v2767_v5 = vadd.f32 1.0, %v2751_v39 }
0x14db   :  { %v4971_v46 = vadd.f32 -1.0, %v2612_v10  ;;  %v4970_v53 = vadd.f32 -1.0, %v2609_v9  ;;  %v2842_v12 = vsel %vm2778_vm4, %v2816_v41, -inf  ;;  %v2841_v24 = vsel %vm2777_vm2, %v2814_v1, -inf  ;;  %v5395_v29 = vpop.eup %5394 }
0x14dc   :  { %2885 = vperm.xlu0 %5285, %v2842_v12   ;;  %2882 = vperm.xlu1 %5284, %v2841_v24   ;;  %vm2780_vm3 = vcmp.gt.f32.partialorder %v2764_v63, %v2612_v10  ;;  %vm2779_vm9 = vcmp.gt.f32.partialorder %v2763_v7, %v2609_v9  ;;  %v5397_v7 = vpop.eup %5396  ;;  %v2770_v14 = vadd.f32 1.0, %v2754_v35 }
0x14dd   :  { %v2820_v26 = vmul.f32 %v5387_v42, %v4971_v46  ;;  %v2818_v17 = vmul.f32 %v5385_v38, %v4970_v53  ;;  %v5399_v10 = vpop.eup %5398 }
0x14de   :  { %v2618_v31 = vpop.xlane.xlu0 %2617  ;;  %v2615_v30 = vpop.xlane.xlu1 %2614 }
0x14df   :  { %v4973_v4 = vadd.f32 -1.0, %v2618_v31  ;;  %v4972_v22 = vadd.f32 -1.0, %v2615_v30  ;;  %v2844_v19 = vsel %vm2780_vm3, %v2820_v26, -inf  ;;  %v2843_v40 = vsel %vm2779_vm9, %v2818_v17, -inf  ;;  %v5401_v37 = vpop.eup %5400 }
0x14e0   :  { %2891 = vperm.xlu0 %5285, %v2844_v19   ;;  %2888 = vperm.xlu1 %5284, %v2843_v40   ;;  %vm2782_vm4 = vcmp.gt.f32.partialorder %v2766_v33, %v2618_v31  ;;  %vm2781_vm2 = vcmp.gt.f32.partialorder %v2765_v47, %v2615_v30 }
0x14e1   :  { %v2824_v43 = vmul.f32 %v5391_v36, %v4973_v4  ;;  %v2822_v8 = vmul.f32 %v5389_v62, %v4972_v22  ;;  %v5403_v62 = vpop.eup %5402 }
0x14e2   :  { %v2624_v16 = vpop.xlane.xlu0 %2623  ;;  %v2621_v60 = vpop.xlane.xlu1 %2620 }
0x14e3   :  { %v4975_v15 = vadd.f32 -1.0, %v2624_v16  ;;  %v4974_v58 = vadd.f32 -1.0, %v2621_v60  ;;  %v2846_v48 = vsel %vm2782_vm4, %v2824_v43, -inf  ;;  %v2845_v23 = vsel %vm2781_vm2, %v2822_v8, -inf }
0x14e4   :  { %2897 = vperm.xlu0 %5285, %v2846_v48   ;;  %2894 = vperm.xlu1 %5284, %v2845_v23   ;;  %vm2784_vm3 = vcmp.gt.f32.partialorder %v2768_v13, %v2624_v16  ;;  %vm2783_vm9 = vcmp.gt.f32.partialorder %v2767_v5, %v2621_v60 }
0x14e5   :  { %v2828_v3 = vmul.f32 %v5393_v32, %v4975_v15  ;;  %v2826_v2 = vmul.f32 %v5395_v29, %v4974_v58 }
0x14e6   :  { %v2630_v41 = vpop.xlane.xlu0 %2629  ;;  %v2627_v1 = vpop.xlane.xlu1 %2626 }
0x14e7   :  { %v4977_v56 = vadd.f32 -1.0, %v2630_v41  ;;  %v4976_v28 = vadd.f32 -1.0, %v2627_v1  ;;  %v2848_v9 = vsel %vm2784_vm3, %v2828_v3, -inf  ;;  %v2847_v38 = vsel %vm2783_vm9, %v2826_v2, -inf }
0x14e8   :  { %2903 = vperm.xlu0 %5285, %v2848_v9   ;;  %2900 = vperm.xlu1 %5284, %v2847_v38   ;;  %vm2786_vm4 = vcmp.gt.f32.partialorder %v2770_v14, %v2630_v41  ;;  %vm2785_vm2 = vcmp.gt.f32.partialorder %v2769_v18, %v2627_v1 }
0x14e9   :  { %v2832_v46 = vmul.f32 %v5397_v7, %v4977_v56  ;;  %v2830_v53 = vmul.f32 %v5399_v10, %v4976_v28 }
0x14ea   :  { %v2636_v42 = vpop.xlane.xlu0 %2635  ;;  %v2633_v63 = vpop.xlane.xlu1 %2632 }
0x14eb   :  { %v2850_v25 = vsel %vm2786_vm4, %v2832_v46, -inf  ;;  %v2849_v12 = vsel %vm2785_vm2, %v2830_v53, -inf  ;;  %v4979_v24 = vadd.f32 -1.0, %v2636_v42  ;;  %v4978_v44 = vadd.f32 -1.0, %v2633_v63 }
0x14ec   :  { %2909 = vperm.xlu0 %5285, %v2850_v25   ;;  %2906 = vperm.xlu1 %5284, %v2849_v12   ;;  %vm7103_vm4 = vcmask 31744  }
0x14ed   :  { %v2836_v36 = vmul.f32 %v5401_v37, %v4979_v24  ;;  %v2834_v47 = vmul.f32 %v5403_v62, %v4978_v44 }
0x14ee   :  { %v2724_v26 = vpop.permute.xlu0 %2723  ;;  %v2720_v17 = vpop.permute.xlu1 %2719 }
0x14ef   :  { %v2756_v31 = vmul.f32 %v2724_v26, %v6630_v34  ;;  %v2755_v30 = vmul.f32 %v2720_v17, %v6632_v20 }
0x14f1   :  { %v2772_v4 = vadd.f32 1.0, %v2756_v31  ;;  %v2771_v22 = vadd.f32 1.0, %v2755_v30 }
0x14f3   :  { %vm2788_vm3 = vcmp.gt.f32.partialorder %v2772_v4, %v2636_v42  ;;  %vm2787_vm9 = vcmp.gt.f32.partialorder %v2771_v22, %v2633_v63 }
0x14f4   :  { %v2852_v19 = vsel %vm2788_vm3, %v2836_v36, -inf  ;;  %v2851_v40 = vsel %vm2787_vm9, %v2834_v47, -inf }
0x14f5   :  { %2915 = vperm.xlu0 %5285, %v2852_v19   ;;  %2912 = vperm.xlu1 %5284, %v2851_v40  }
0x1553   :  { %v2874_v33 = vpop.permute.xlu0 %2873  ;;  %v2871_v39 = vpop.permute.xlu1 %2870 }
0x1554   :  { %v2924_v23 = vrot.slane %v2874_v33, %v6337_v6  ;;  %v2920_v5 = vrot.slane %v2871_v39, %v6334_v55  ;;  %v7095_v39 = vmov 0.0  }
0x1556   :  { %v2925_v46 = vsel %vm1657_vm5, %v2924_v23, %v2920_v5 }
0x1557   :  { %v2880_v43 = vpop.permute.xlu0 %2879  ;;  %v2877_v8 = vpop.permute.xlu1 %2876 }
0x1558   :  { %v2933_v29 = vrot.slane %v2880_v43, %v6337_v6  ;;  %v2929_v35 = vrot.slane %v2877_v8, %v6334_v55 }
0x155a   :  { %v2934_v28 = vsel %vm1657_vm5, %v2933_v29, %v2929_v35 }
0x155b   :  { %v2886_v13 = vpop.permute.xlu0 %2885  ;;  %v2883_v16 = vpop.permute.xlu1 %2882  ;;  %v2989_v42 = vsel %vm1722_vm10, %v2934_v28, %v2925_v46 }
0x155c   :  { %v2942_v21 = vrot.slane %v2886_v13, %v6337_v6  ;;  %v2938_v48 = vrot.slane %v2883_v16, %v6334_v55 }
0x155e   :  { %v2943_v18 = vsel %vm1657_vm5, %v2942_v21, %v2938_v48 }
0x155f   :  { %v2892_v34 = vpop.permute.xlu0 %2891  ;;  %v2889_v60 = vpop.permute.xlu1 %2888  ;;  %v2990_v25 = vsel %vm1724_vm11, %v2943_v18, %v2989_v42 }
0x1560   :  { %v2951_v3 = vrot.slane %v2892_v34, %v6337_v6  ;;  %v2947_v2 = vrot.slane %v2889_v60, %v6334_v55 }
0x1562   :  { %v2952_v53 = vsel %vm1657_vm5, %v2951_v3, %v2947_v2 }
0x1563   :  { %v2898_v20 = vpop.permute.xlu0 %2897  ;;  %v2895_v32 = vpop.permute.xlu1 %2894  ;;  %v2991_v24 = vsel %vm1726_vm12, %v2952_v53, %v2990_v25 }
0x1564   :  { %v2960_v7 = vrot.slane %v2898_v20, %v6337_v6  ;;  %v2956_v56 = vrot.slane %v2895_v32, %v6334_v55 }
0x1566   :  { %v2961_v63 = vsel %vm1657_vm5, %v2960_v7, %v2956_v56  ;;  %v5494_v7 = vld [vmem:[#allocation5] ss:$0 sm:$0xff] }
0x1567   :  { %v2904_v15 = vpop.permute.xlu0 %2903  ;;  %v2901_v58 = vpop.permute.xlu1 %2900  ;;  %v2992_v37 = vsel %vm1728_vm13, %v2961_v63, %v2991_v24 }
0x1568   :  { %v2969_v10 = vrot.slane %v2904_v15, %v6337_v6  ;;  %v2965_v14 = vrot.slane %v2901_v58, %v6334_v55 }
0x156a   :  { %v2970_v12 = vsel %vm1657_vm5, %v2969_v10, %v2965_v14  ;;  %v5495_v14 = vld [vmem:[#allocation7] ss:$0 sm:$0xff] }
0x156b   :  { %v2910_v41 = vpop.permute.xlu0 %2909  ;;  %v2907_v1 = vpop.permute.xlu1 %2906  ;;  %v2993_v62 = vsel %vm1730_vm14, %v2970_v12, %v2992_v37 }
0x156c   :  { %v2978_v9 = vrot.slane %v2910_v41, %v6337_v6  ;;  %v2974_v38 = vrot.slane %v2907_v1, %v6334_v55 }
0x156e   :  { %v2979_v44 = vsel %vm1657_vm5, %v2978_v9, %v2974_v38 }
0x156f   :  { %v2994_v22 = vsel %vm1732_vm15, %v2979_v44, %v2993_v62 }
0x1574   :  { %v2916_v26 = vpop.permute.xlu0 %2915  ;;  %v2913_v17 = vpop.permute.xlu1 %2912 }
0x1575   :  { %v2987_v31 = vrot.slane %v2916_v26, %v6337_v6  ;;  %v2983_v30 = vrot.slane %v2913_v17, %v6334_v55 }
0x1577   :  { %v2988_v4 = vsel %vm1657_vm5, %v2987_v31, %v2983_v30 }
0x1578   :  { %v2995_v36 = vsel %vm1734_vm1, %v2988_v4, %v2994_v22 }
0x1579   :  { %v2997_v47 = vsel %vm365_vm6, %v2995_v36, -inf }
0x157a   :  { %2998 = vmax.xlane.f32.xlu1 %v2997_v47 }
0x1607   :  { %v2999_v19 = vpop.xlane.xlu1 %2998 }
0x1608   :  { %v3000_v40 = vsub.f32 %v6429_v11, %v2999_v19 }
0x160a   :  { %v6691_v33 = vmax.f32 %v3000_v40, 0.0 }
0x160c   :  { %3005 = vst.msk [vmem:[#allocation14 + $0x8] sm:$0xff] %vm365_vm6, %v6691_v33  ;;  %5157 = vmatmul.mubr.msk.f32.vlgmr.msra.gmra.mrb[10].mxu0 %vm365_vm6, %v6691_v33 }
0x160d   :  { %5166 = vmatprep.mubr.msk.f32.mxu0 %vm5744_vm0, %v7095_v39 }
0x16df   :  { %v3075_v43 = vpop.f32.mrb[10].mxu0 }
0x16e0   :  { %v3079_v8 = vsel %vm365_vm6, %v3075_v43, 0.0  ;;  %v5158_v13 = vpop.f32.mrb[11].mxu0 }
0x16e1   :  { %v3080_v16 = vrot.slane %v3079_v8, 4 }
0x16e3   :  { %v3081_v34 = vadd.f32 %v3080_v16, %v3079_v8 }
0x16e5   :  { %v3082_v60 = vrot.slane %v3081_v34, 2 }
0x16e7   :  { %v3083_v20 = vadd.f32 %v3082_v60, %v3081_v34  ;;  %v5496_v60 = vld [vmem:[#allocation8] ss:$0 sm:$0xff] }
0x16e9   :  { %v3084_v11 = vrot.slane %v3083_v20, 1 }
0x16eb   :  { %v3085_v32 = vadd.f32 %v3084_v11, %v3083_v20 }
0x16ed   :  { %v3086_v15 = vmul.f32 0.125, %v3085_v32 }
0x16ef   :  { %v3087_v58 = vsub.f32 %v3075_v43, %v3086_v15  ;;  %v5497_v15 = vld [vmem:[#allocation10] ss:$0 sm:$0xff] }
0x16f1   :  { %v3088_v29 = vmul.f32 %v3087_v58, %v3087_v58  ;;  %v3097_v56 = vmul.f32 %v5494_v7, %v3087_v58  ;;  %v424_v7 = vld [vmem:[%s7097_s22] sm:$0xff] }
0x16f3   :  { %v3089_v35 = vsel %vm365_vm6, %v3088_v29, 0.0 }
0x16f4   :  { %v3090_v21 = vrot.slane %v3089_v35, 4 }
0x16f6   :  { %v3091_v48 = vadd.f32 %v3090_v21, %v3089_v35 }
0x16f8   :  { %v3092_v23 = vrot.slane %v3091_v48, 2 }
0x16fa   :  { %v3093_v5 = vadd.f32 %v3092_v23, %v3091_v48  ;;  %v421_v48 = vld [vmem:[%s7096_s18] sm:$0xff] }
0x16fb   :  { %5165 = vmatpush3.msra.mxu0 %v421_v48 }
0x16fc   :  { %v3094_v3 = vrot.slane %v3093_v5, 1  ;;  %5174 = vmatprep.subr.mxu0 %v7095_v39 }
0x16fe   :  { %v3095_v2 = vadd.f32 %v3094_v3, %v3093_v5 }
0x1700   :  { %v3096_v41 = vmul.f32 0.125, %v3095_v2 }
0x1702   :  { %v3098_v1 = vadd.f32 1e-05, %v3096_v41 }
0x1704   :  { %5404 = vrsqrt.f32 %v3098_v1  ;;  %v5498_v1 = vld [vmem:[%s7085_s25] sm:$0xf] }
0x170e   :  { %v5405_v28 = vpop.eup %5404 }
0x170f   :  { %v3100_v10 = vmul.f32 %v5405_v28, %v3097_v56  ;;  %v7098_v56 = vmov 0.0|0.0  }
0x1711   :  { %v3101_v18 = vadd.f32 %v5495_v14, %v3100_v10 }
0x1713   :  { %v4981_v9 = vmul.f32 -1.442695, %v3101_v18 }
0x1715   :  { %5406 = vpow2.f32 %v4981_v9 }
0x171f   :  { %v5407_v38 = vpop.eup %5406 }
0x1720   :  { %v3105_v46 = vadd.f32 1.0, %v5407_v38 }
0x1722   :  { %5408 = vrcp.f32 %v3105_v46 }
0x172c   :  { %v5409_v53 = vpop.eup %5408 }
0x172d   :  { %3109 = vrot.lane.b32.xlu0 %v5409_v53, %s5745_s5 }
0x179f   :  { %v3110_v42 = vpop.permute.xlu0 %3109 }
0x17a0   :  { %v3112_v63 = vmul.f32 %v3110_v42, %v3101_v18 }
0x17a2   :  { %5162 = vmatmul.mubr.msk.f32.vlgmr.msra.gmra.mrb[12].mxu1 %vm555_vm7, %v3112_v63 }
0x17a3   :  { %5171 = vmatprep.mubr.msk.f32.mxu1 %vm5744_vm0, %v7095_v39  ;;  %5170 = vmatpush3.msra.mxu1 %v424_v7 }
0x17a4   :  { %5218 = vmatprep.subr.bf16.mxu1 %v7098_v56 }
0x1875   :  { %v3182_v25 = vpop.f32.mrb[12].mxu1 }
0x1876   :  { %v3186_v12 = vsel %vm365_vm6, %v3182_v25, 0.0  ;;  %v5163_v24 = vpop.f32.mrb[13].mxu1 }
0x1877   :  { %v3187_v44 = vrot.slane %v3186_v12, 4 }
0x1879   :  { %v3188_v26 = vadd.f32 %v3187_v44, %v3186_v12 }
0x187b   :  { %v3189_v17 = vrot.slane %v3188_v26, 2 }
0x187d   :  { %v3190_v37 = vadd.f32 %v3189_v17, %v3188_v26 }
0x187f   :  { %v3191_v31 = vrot.slane %v3190_v37, 1 }
0x1881   :  { %v3192_v30 = vadd.f32 %v3191_v31, %v3190_v37 }
0x1883   :  { %v3193_v62 = vmul.f32 0.125, %v3192_v30 }
0x1885   :  { %v3194_v4 = vsub.f32 %v3182_v25, %v3193_v62 }
0x1887   :  { %v3195_v22 = vmul.f32 %v3194_v4, %v3194_v4  ;;  %v3204_v20 = vmul.f32 %v5496_v60, %v3194_v4 }
0x1889   :  { %v3196_v36 = vsel %vm365_vm6, %v3195_v22, 0.0  ;;  %v4985_v22 = vld [vmem:[%s7099_s23] ss:$0 sm:$0xff] }
0x188a   :  { %v3197_v47 = vrot.slane %v3196_v36, 4 }
0x188c   :  { %v3198_v19 = vadd.f32 %v3197_v47, %v3196_v36 }
0x188e   :  { %v3199_v40 = vrot.slane %v3198_v19, 2 }
0x1890   :  { %v3200_v43 = vadd.f32 %v3199_v40, %v3198_v19  ;;  %v4986_v19 = vld [vmem:[%s7100_s26] ss:$0 sm:$0xff] }
0x1892   :  { %v3201_v8 = vrot.slane %v3200_v43, 1 }
0x1894   :  { %v3202_v13 = vadd.f32 %v3201_v8, %v3200_v43 }
0x1896   :  { %v3203_v16 = vmul.f32 0.125, %v3202_v13 }
0x1898   :  { %v3205_v34 = vadd.f32 1e-05, %v3203_v16 }
0x189a   :  { %5410 = vrsqrt.f32 %v3205_v34 }
0x18a4   :  { %v5411_v11 = vpop.eup %5410 }
0x18a5   :  { %v3207_v32 = vmul.f32 %v5411_v11, %v3204_v20 }
0x18a7   :  { %v3208_v58 = vadd.f32 %v5497_v15, %v3207_v32 }
0x18a9   :  { %v4983_v29 = vmul.f32 -1.442695, %v3208_v58 }
0x18ab   :  { %5412 = vpow2.f32 %v4983_v29 }
0x18b5   :  { %v5413_v35 = vpop.eup %5412 }
0x18b6   :  { %v3212_v21 = vadd.f32 1.0, %v5413_v35 }
0x18b8   :  { %5414 = vrcp.f32 %v3212_v21 }
0x18c2   :  { %v5415_v23 = vpop.eup %5414 }
0x18c3   :  { %3216 = vrot.lane.b32.xlu0 %v5415_v23, %s5745_s5 }
0x1935   :  { %v3217_v5 = vpop.permute.xlu0 %3216 }
0x1936   :  { %v3219_v3 = vmul.f32 %v3217_v5, %v3208_v58 }
0x1938   :  { %v3220_v2 = vadd.f32 %v3219_v3, %v3112_v63 }
0x193a   :  { %v3221_v41 = vmul.f32 0.70710677, %v3220_v2 }
0x193c   :  { %5167 = vmatmul.mubr.msk.f32.vlgmr.msra.gmra.mrb[12].mxu0 %vm555_vm7, %v3221_v41 }
0x193d   :  { %5175 = vmatpush3.msk.msra.mxu0 %vm921_vm8, %v5498_v1  ;;  %5176 = vmatprep.mubr.msk.f32.mxu0 %vm5744_vm0, %v7095_v39 }
0x193e   :  { %5186 = vmatprep.subr.mxu0 %v7095_v39 }
0x1a0f   :  { %v3291_v28 = vpop.f32.mrb[12].mxu0 }
0x1a10   :  { %v3295_v10 = vsel %vm365_vm6, %v3291_v28, 0.0  ;;  %v5168_v14 = vpop.f32.mrb[13].mxu0 }
0x1a11   :  { %v3296_v18 = vrot.slane %v3295_v10, 4 }
0x1a13   :  { %v3297_v9 = vadd.f32 %v3296_v18, %v3295_v10 }
0x1a15   :  { %v3298_v38 = vrot.slane %v3297_v9, 2 }
0x1a17   :  { %v3299_v46 = vadd.f32 %v3298_v38, %v3297_v9  ;;  %v4989_v9 = vld [vmem:[%s7101_s28] ss:$0 sm:$0xff] }
0x1a19   :  { %v3300_v53 = vrot.slane %v3299_v46, 1 }
0x1a1b   :  { %v3301_v42 = vadd.f32 %v3300_v53, %v3299_v46  ;;  %v4990_v53 = vld [vmem:[%s7102_s21] ss:$0 sm:$0xff] }
0x1a1d   :  { %v3302_v63 = vmul.f32 0.125, %v3301_v42 }
0x1a1f   :  { %v3303_v25 = vsub.f32 %v3291_v28, %v3302_v63 }
0x1a21   :  { %v3304_v12 = vmul.f32 %v3303_v25, %v3303_v25  ;;  %v3319_v36 = vmul.f32 %v4985_v22, %v3303_v25 }
0x1a23   :  { %v3305_v24 = vsel %vm365_vm6, %v3304_v12, 0.0 }
0x1a24   :  { %v3306_v44 = vrot.slane %v3305_v24, 4 }
0x1a26   :  { %v3307_v26 = vadd.f32 %v3306_v44, %v3305_v24 }
0x1a28   :  { %v3308_v17 = vrot.slane %v3307_v26, 2 }
0x1a2a   :  { %v3309_v37 = vadd.f32 %v3308_v17, %v3307_v26 }
0x1a2c   :  { %v3310_v31 = vrot.slane %v3309_v37, 1 }
0x1a2e   :  { %v3311_v30 = vadd.f32 %v3310_v31, %v3309_v37 }
0x1a30   :  { %v3312_v62 = vmul.f32 0.125, %v3311_v30  ;;  %v2200_v30 = vmax.f32 %v6414_v51, 0.0 }
0x1a32   :  { %v3320_v4 = vadd.f32 1e-05, %v3312_v62 }
0x1a34   :  { %5416 = vrsqrt.f32 %v3320_v4  ;;  %v5499_v4 = vld [vmem:[%s5799_s8] sm:$0xff]  ;;  %s7106_s8 = sld [smem:[#allocation35_spill]] }
0x1a3e   :  { %v5417_v47 = vpop.eup %5416 }
0x1a3f   :  { %v3322_v40 = vmul.f32 %v5417_v47, %v3319_v36 }
0x1a41   :  { %v3329_v43 = vadd.f32 %v4986_v19, %v3322_v40 }
0x1a43   :  { %v4987_v8 = vmul.f32 -1.442695, %v3329_v43 }
0x1a45   :  { %5418 = vpow2.f32 %v4987_v8 }
0x1a4f   :  { %v5419_v13 = vpop.eup %5418 }
0x1a50   :  { %v3333_v16 = vadd.f32 1.0, %v5419_v13 }
0x1a52   :  { %5420 = vrcp.f32 %v3333_v16 }
0x1a5c   :  { %v5421_v34 = vpop.eup %5420 }
0x1a5d   :  { %3337 = vrot.lane.b32.xlu0 %v5421_v34, %s5745_s5 }
0x1acf   :  { %v3338_v60 = vpop.permute.xlu0 %3337 }
0x1ad0   :  { %v3340_v20 = vmul.f32 %v3338_v60, %v3329_v43 }
0x1ad2   :  { %5172 = vmatmul.mubr.msk.f32.vlgmr.msra.gmra.mrb[14].mxu1 %vm555_vm7, %v3340_v20 }
0x1ad3   :  { %5220 = vmatpush3.bf16.msra.mxu1 %v6020_v27  ;;  %5183 = vmatprep.mubr.msk.f32.mxu1 %vm5744_vm0, %v7095_v39 }
0x1ad4   :  { %5191 = vmatprep.subr.mxu1 %v7095_v39 }
0x1ba5   :  { %v3410_v11 = vpop.f32.mrb[14].mxu1 }
0x1ba6   :  { %v3414_v32 = vsel %vm365_vm6, %v3410_v11, 0.0  ;;  %v5173_v15 = vpop.f32.mrb[15].mxu1 }
0x1ba7   :  { %v3415_v58 = vrot.slane %v3414_v32, 4 }
0x1ba9   :  { %v3416_v29 = vadd.f32 %v3415_v58, %v3414_v32 }
0x1bab   :  { %v3417_v35 = vrot.slane %v3416_v29, 2 }
0x1bad   :  { %v3418_v21 = vadd.f32 %v3417_v35, %v3416_v29 }
0x1baf   :  { %v3419_v48 = vrot.slane %v3418_v21, 1 }
0x1bb1   :  { %v3420_v23 = vadd.f32 %v3419_v48, %v3418_v21 }
0x1bb3   :  { %v3421_v5 = vmul.f32 0.125, %v3420_v23 }
0x1bb5   :  { %v3422_v3 = vsub.f32 %v3410_v11, %v3421_v5  ;;  %v3002_v5 = vsub.f32 1.0, %v6691_v33 }
0x1bb7   :  { %v3423_v27 = vmul.f32 %v3422_v3, %v3422_v3  ;;  %v3438_v38 = vmul.f32 %v4989_v9, %v3422_v3  ;;  %v5500_v3 = vld [vmem:[%s7086_s19] ss:$0 sm:$0xff] }
0x1bb9   :  { %v3424_v2 = vsel %vm365_vm6, %v3423_v27, 0.0 }
0x1bba   :  { %v3425_v41 = vrot.slane %v3424_v2, 4 }
0x1bbc   :  { %v3426_v1 = vadd.f32 %v3425_v41, %v3424_v2 }
0x1bbe   :  { %v3427_v7 = vrot.slane %v3426_v1, 2 }
0x1bc0   :  { %v3428_v56 = vadd.f32 %v3427_v7, %v3426_v1  ;;  %v7104_v1 = vsub.f32 1.0, %v6372_v0 }
0x1bc2   :  { %v3429_v28 = vrot.slane %v3428_v56, 1  ;;  %v3003_v7 = vmul.f32 %v3002_v5, %v7104_v1 }
0x1bc4   :  { %v3430_v10 = vadd.f32 %v3429_v28, %v3428_v56  ;;  %v5501_v56 = vld [vmem:[%s7087_s24] ss:$0 sm:$0xff] }
0x1bc6   :  { %v3431_v14 = vmul.f32 0.125, %v3430_v10 }
0x1bc8   :  { %v3439_v18 = vadd.f32 1e-05, %v3431_v14 }
0x1bca   :  { %5422 = vrsqrt.f32 %v3439_v18 }
0x1bd4   :  { %v5423_v46 = vpop.eup %5422 }
0x1bd5   :  { %v3441_v42 = vmul.f32 %v5423_v46, %v3438_v38 }
0x1bd7   :  { %v3448_v63 = vadd.f32 %v4990_v53, %v3441_v42 }
0x1bd9   :  { %v4991_v25 = vmul.f32 -1.442695, %v3448_v63 }
0x1bdb   :  { %5424 = vpow2.f32 %v4991_v25 }
0x1be5   :  { %v5425_v12 = vpop.eup %5424 }
0x1be6   :  { %v3452_v24 = vadd.f32 1.0, %v5425_v12 }
0x1be8   :  { %5426 = vrcp.f32 %v3452_v24 }
0x1bf2   :  { %v5427_v44 = vpop.eup %5426 }
0x1bf3   :  { %3456 = vrot.lane.b32.xlu0 %v5427_v44, %s5745_s5 }
0x1c65   :  { %v3457_v26 = vpop.permute.xlu0 %3456 }
0x1c66   :  { %v3459_v17 = vmul.f32 %v3457_v26, %v3448_v63 }
0x1c68   :  { %v3460_v37 = vadd.f32 %v3459_v17, %v3340_v20 }
0x1c6a   :  { %v3461_v31 = vmul.f32 0.70710677, %v3460_v37 }
0x1c6c   :  { %v3462_v62 = vmax.f32 %v3461_v31, 0.0  ;;  %5177 = vmatmul.mubr.msk.f32.vlgmr.msra.gmra.mrb[14].mxu0 %vm7103_vm4, %v3461_v31 }
0x1c6d   :  { %5187 = vmatpush3.msra.mxu0 %v5499_v4  ;;  %5188 = vmatprep.mubr.msk.f32.mxu0 %vm5744_vm0, %v7095_v39 }
0x1c6e   :  { %v6738_v22 = vadd.f32 %v3462_v62, %v2200_v30  ;;  %5196 = vmatprep.subr.mxu0 %v7095_v39 }
0x1d3f   :  { %v3533_v36 = vpop.f32.mrb[14].mxu0 }
0x1d40   :  { %v3537_v47 = vsel %vm365_vm6, %v3533_v36, 0.0  ;;  %v5178_v19 = vpop.f32.mrb[15].mxu0 }
0x1d41   :  { %v3538_v40 = vrot.slane %v3537_v47, 4 }
0x1d43   :  { %v3539_v43 = vadd.f32 %v3538_v40, %v3537_v47 }
0x1d45   :  { %v3540_v8 = vrot.slane %v3539_v43, 2 }
0x1d47   :  { %v3541_v51 = vadd.f32 %v3540_v8, %v3539_v43 }
0x1d49   :  { %v3542_v13 = vrot.slane %v3541_v51, 1 }
0x1d4b   :  { %v3543_v16 = vadd.f32 %v3542_v13, %v3541_v51 }
0x1d4d   :  { %v3544_v34 = vmul.f32 0.125, %v3543_v16 }
0x1d4f   :  { %v3545_v60 = vsub.f32 %v3533_v36, %v3544_v34 }
0x1d51   :  { %v3546_v20 = vmul.f32 %v3545_v60, %v3545_v60  ;;  %v3555_v27 = vmul.f32 %v5500_v3, %v3545_v60 }
0x1d53   :  { %v3547_v11 = vsel %vm365_vm6, %v3546_v20, 0.0 }
0x1d54   :  { %v3548_v32 = vrot.slane %v3547_v11, 4 }
0x1d56   :  { %v3549_v15 = vadd.f32 %v3548_v32, %v3547_v11 }
0x1d58   :  { %v3550_v58 = vrot.slane %v3549_v15, 2 }
0x1d5a   :  { %v3551_v29 = vadd.f32 %v3550_v58, %v3549_v15 }
0x1d5c   :  { %v3552_v35 = vrot.slane %v3551_v29, 1 }
0x1d5e   :  { %v3553_v21 = vadd.f32 %v3552_v35, %v3551_v29 }
0x1d60   :  { %v3554_v48 = vmul.f32 0.125, %v3553_v21 }
0x1d62   :  { %v3556_v23 = vadd.f32 1e-05, %v3554_v48 }
0x1d64   :  { %5428 = vrsqrt.f32 %v3556_v23 }
0x1d6e   :  { %v5429_v2 = vpop.eup %5428 }
0x1d6f   :  { %v3558_v41 = vmul.f32 %v5429_v2, %v3555_v27 }
0x1d71   :  { %v3559_v28 = vadd.f32 %v5501_v56, %v3558_v41 }
0x1d73   :  { %v6748_v10 = vmul.f32 %v3559_v28, %v3003_v7 }
0x1d75   :  { %v3636_v14 = vrot.slane %v6748_v10, %v6092_v50  ;;  %v3614_v18 = vrot.slane %v6748_v10, %v6080_v45  ;;  %v3669_v33 = vrot.slane %v6748_v10, %v6107_v57  ;;  %v3680_v0 = vrot.slane %v6748_v10, %v6112_v59 }
0x1d76   :  { %v3625_v9 = vrot.slane %v6748_v10, %v6087_v49  ;;  %v6762_v50 = vrot.slane %v6748_v10, %v6117_v61  ;;  %v3647_v57 = vrot.slane %v6748_v10, %v6097_v52  ;;  %v3658_v49 = vrot.slane %v6748_v10, %v6102_v54  ;;  %v7105_v52 = vld [vmem:[#allocation44_spill] sm:$0xff] }
0x1d77   :  { %3642 = vbcast.lane.b32.xlu1 %v3636_v14, 264  ;;  %3616 = vbcast.lane.b32.xlu0 %v3614_v18, 256  ;;  %v3569_v54 = vrot.slane %v6748_v10, %v7105_v52  ;;  %v3562_v47 = vcombine.high %v6748_v10, %v6748_v10 }
0x1d79   :  { %v3585_v59 = vrot.slane %v3569_v54, %v7105_v52  ;;  %v3577_v38 = vcombine.high %v3569_v54, %v3569_v54  ;;  %v3576_v13 = vrot.slane %v3562_v47, %v7105_v52 }
0x1d7b   :  { %3675 = vbcast.lane.b32.xlu1 %v3669_v33, 264  ;;  %3620 = vbcast.lane.b32.xlu0 %v3614_v18, 264  ;;  %v6774_v61 = vrot.slane %v3585_v59, %v6080_v45  ;;  %v3599_v63 = vrot.slane %v3577_v38, %v7105_v52  ;;  %v3607_v24 = vcombine.high %v3585_v59, %v3585_v59 }
0x1d7c   :  { %v3578_v32 = vcombine.high %v3576_v13, %v3576_v13  ;;  %v3592_v15 = vrot.slane %v3576_v13, %v7105_v52 }
0x1d7d   :  { %v6788_v44 = vrot.slane %v3599_v63, %v6080_v45  ;;  %v6797_v30 = vrot.slane %v3607_v24, %v6080_v45  ;;  %v3609_v40 = vcombine.high %v3599_v63, %v3599_v63 }
0x1d7e   :  { %v3606_v48 = vrot.slane %v3578_v32, %v7105_v52  ;;  %v6838_v23 = vrot.slane %v3592_v15, %v6080_v45  ;;  %v3608_v41 = vcombine.high %v3592_v15, %v3592_v15 }
0x1d7f   :  { %3686 = vbcast.lane.b32.xlu1 %v3680_v0, 264  ;;  %3627 = vbcast.lane.b32.xlu0 %v3625_v9, 256  ;;  %v6819_v16 = vrot.slane %v3609_v40, %v6080_v45 }
0x1d80   :  { %v6845_v2 = vrot.slane %v3606_v48, %v6080_v45 }
0x1d83   :  { %3697 = vbcast.lane.b32.xlu1 %v6762_v50, 264  ;;  %3631 = vbcast.lane.b32.xlu0 %v3625_v9, 264 }
0x1d87   :  { %3904 = vbcast.lane.b32.xlu1 %v3614_v18, 256  ;;  %3638 = vbcast.lane.b32.xlu0 %v3636_v14, 256 }
0x1d8b   :  { %3915 = vbcast.lane.b32.xlu1 %v3625_v9, 256  ;;  %3649 = vbcast.lane.b32.xlu0 %v3647_v57, 256 }
0x1d8f   :  { %3919 = vbcast.lane.b32.xlu1 %v3625_v9, 264  ;;  %3653 = vbcast.lane.b32.xlu0 %v3647_v57, 264 }
0x1d93   :  { %3930 = vbcast.lane.b32.xlu1 %v3636_v14, 264  ;;  %3660 = vbcast.lane.b32.xlu0 %v3658_v49, 256 }
0x1d97   :  { %3941 = vbcast.lane.b32.xlu1 %v3647_v57, 264  ;;  %3664 = vbcast.lane.b32.xlu0 %v3658_v49, 264 }
0x1d9b   :  { %3952 = vbcast.lane.b32.xlu1 %v3658_v49, 264  ;;  %3671 = vbcast.lane.b32.xlu0 %v3669_v33, 256 }
0x1d9f   :  { %3963 = vbcast.lane.b32.xlu1 %v3669_v33, 264  ;;  %3682 = vbcast.lane.b32.xlu0 %v3680_v0, 256 }
0x1da3   :  { %3974 = vbcast.lane.b32.xlu1 %v3680_v0, 264  ;;  %3693 = vbcast.lane.b32.xlu0 %v6762_v50, 256 }
0x1da7   :  { %3908 = vbcast.lane.b32.xlu0 %v3614_v18, 264  ;;  %v3610_v18 = vcombine.high %v3606_v48, %v3606_v48 }
0x1da9   :  { %v3730_v52 = vrot.slane %v3610_v18, %v6080_v45 }
0x1dab   :  { %3926 = vbcast.lane.b32.xlu0 %v3636_v14, 256  ;;  %v6852_v14 = vrot.slane %v3608_v41, %v6080_v45 }
0x1daf   :  { %3937 = vbcast.lane.b32.xlu0 %v3647_v57, 256 }
0x1db3   :  { %3948 = vbcast.lane.b32.xlu0 %v3658_v49, 256 }
0x1db7   :  { %3959 = vbcast.lane.b32.xlu0 %v3669_v33, 256 }
0x1dbb   :  { %3970 = vbcast.lane.b32.xlu0 %v3680_v0, 256 }
0x1de9   :  { %v3617_v46 = vpop.permute.xlu0 %3616  ;;  %v3643_v37 = vpop.permute.xlu1 %3642 }
0x1dea   :  { %vm3739_vm2 = vcmp.ge.f32.partialorder %v6774_v61, %v3617_v46  ;;  %vm3744_vm4 = vcmp.ge.f32.partialorder %v6797_v30, %v3643_v37 }
0x1deb   :  { %v6778_v53 = vsel %vm3739_vm2, 1.0, %v7095_v39  ;;  %v6811_v43 = vsel %vm3744_vm4, 1.0, %v7095_v39 }
0x1dec   :  { %v3787_v42 = vsel %vm365_vm6, %v6778_v53, 0.0  ;;  %v3802_v60 = vsel %vm365_vm6, %v6811_v43, 0.0 }
0x1ded   :  { %v3621_v25 = vpop.permute.xlu0 %3620  ;;  %3788 = vadd.xlane.f32.xlu0 %v3787_v42  ;;  %v3676_v35 = vpop.permute.xlu1 %3675 }
0x1dee   :  { %vm3740_vm3 = vcmp.ge.f32.partialorder %v6774_v61, %v3621_v25 }
0x1def   :  { %v6785_v12 = vsel %vm3740_vm3, 1.0, %v7095_v39 }
0x1df0   :  { %v3790_v26 = vsel %vm365_vm6, %v6785_v12, 0.0  ;;  %v3836_v37 = vmul.f32 %v6785_v12, %v6774_v61 }
0x1df1   :  { %v3628_v17 = vpop.permute.xlu0 %3627  ;;  %3791 = vadd.xlane.f32.xlu1 %v3790_v26  ;;  %v3687_v7 = vpop.permute.xlu1 %3686 }
0x1df2   :  { %vm3741_vm9 = vcmp.ge.f32.partialorder %v6788_v44, %v3628_v17  ;;  %v3835_v17 = vmul.f32 %v6778_v53, %v6774_v61  ;;  %v3854_v40 = vsel %vm365_vm6, %v3836_v37, 0.0  ;;  %v3840_v61 = vmul.f32 %v6811_v43, %v6797_v30 }
0x1df3   :  { %v6794_v31 = vsel %vm3741_vm9, 1.0, %v7095_v39 }
0x1df4   :  { %v3793_v62 = vsel %vm365_vm6, %v6794_v31, 0.0  ;;  %v3837_v47 = vmul.f32 %v6794_v31, %v6788_v44 }
0x1df5   :  { %v3632_v4 = vpop.permute.xlu0 %3631  ;;  %3794 = vadd.xlane.f32.xlu0 %v3793_v62  ;;  %v3698_v57 = vpop.permute.xlu1 %3697 }
0x1df6   :  { %vm3742_vm2 = vcmp.ge.f32.partialorder %v6788_v44, %v3632_v4  ;;  %v3857_v13 = vsel %vm365_vm6, %v3837_v47, 0.0 }
0x1df7   :  { %v6804_v36 = vsel %vm3742_vm2, 1.0, %v7095_v39 }
0x1df8   :  { %v3796_v19 = vsel %vm365_vm6, %v6804_v36, 0.0 }
0x1df9   :  { %v3639_v8 = vpop.permute.xlu0 %3638  ;;  %3797 = vadd.xlane.f32.xlu0 %v3796_v19  ;;  %v3838_v19 = vmul.f32 %v6804_v36, %v6788_v44  ;;  %v3866_v36 = vsel %vm365_vm6, %v3840_v61, 0.0 }
0x1dfa   :  { %vm3743_vm3 = vcmp.ge.f32.partialorder %v6797_v30, %v3639_v8  ;;  %v3851_v8 = vsel %vm365_vm6, %v3835_v17, 0.0 }
0x1dfb   :  { %v6815_v51 = vsel %vm3743_vm3, 1.0, %v7095_v39  ;;  %vm3750_vm3 = vcmp.ge.f32.partialorder %v6845_v2, %v3676_v35  ;;  %v3860_v12 = vsel %vm365_vm6, %v3838_v19, 0.0 }
0x1dfc   :  { %v3799_v34 = vsel %vm365_vm6, %v6815_v51, 0.0  ;;  %v5005_v0 = vsel %vm3750_vm3, 1.0, %v7095_v39  ;;  %vm3754_vm3 = vcmp.ge.f32.partialorder %v3730_v52, %v3698_v57  ;;  %v3839_v53 = vmul.f32 %v6815_v51, %v6797_v30 }
0x1dfd   :  { %v3650_v20 = vpop.permute.xlu0 %3649  ;;  %3800 = vadd.xlane.f32.xlu1 %v3799_v34  ;;  %3803 = vadd.xlane.f32.xlu0 %v3802_v60  ;;  %v3820_v54 = vsel %vm365_vm6, %v5005_v0, 0.0  ;;  %v5009_v45 = vsel %vm3754_vm3, 1.0, %v7095_v39 }
0x1dfe   :  { %vm3745_vm9 = vcmp.ge.f32.partialorder %v6819_v16, %v3650_v20  ;;  %v3832_v62 = vsel %vm365_vm6, %v5009_v45, 0.0  ;;  %v3863_v34 = vsel %vm365_vm6, %v3839_v53, 0.0  ;;  %v3846_v20 = vmul.f32 %v5005_v0, %v6845_v2 }
0x1dff   :  { %v6827_v11 = vsel %vm3745_vm9, 1.0, %v7095_v39 }
0x1e00   :  { %v3805_v58 = vsel %vm365_vm6, %v6827_v11, 0.0  ;;  %v3841_v44 = vmul.f32 %v6827_v11, %v6819_v16 }
0x1e01   :  { %v3654_v29 = vpop.permute.xlu0 %3653  ;;  %3806 = vadd.xlane.f32.xlu1 %v3805_v58 }
0x1e02   :  { %vm3746_vm4 = vcmp.ge.f32.partialorder %v6819_v16, %v3654_v29  ;;  %v3869_v60 = vsel %vm365_vm6, %v3841_v44, 0.0  ;;  %v3884_v29 = vsel %vm365_vm6, %v3846_v20, 0.0 }
0x1e03   :  { %v6834_v21 = vsel %vm3746_vm4, 1.0, %v7095_v39  ;;  %vm3752_vm4 = vcmp.ge.f32.partialorder %v6852_v14, %v3687_v7 }
0x1e04   :  { %v3808_v5 = vsel %vm365_vm6, %v6834_v21, 0.0  ;;  %v5007_v38 = vsel %vm3752_vm4, 1.0, %v7095_v39  ;;  %v3842_v31 = vmul.f32 %v6834_v21, %v6819_v16  ;;  %v3850_v21 = vmul.f32 %v5009_v45, %v3730_v52 }
0x1e05   :  { %v3661_v3 = vpop.permute.xlu0 %3660  ;;  %3809 = vadd.xlane.f32.xlu0 %v3808_v5  ;;  %v3826_v63 = vsel %vm365_vm6, %v5007_v38, 0.0  ;;  %v3848_v15 = vmul.f32 %v5007_v38, %v6852_v14 }
0x1e06   :  { %vm3747_vm2 = vcmp.ge.f32.partialorder %v6838_v23, %v3661_v3  ;;  %v3872_v51 = vsel %vm365_vm6, %v3842_v31, 0.0  ;;  %v3896_v3 = vsel %vm365_vm6, %v3850_v21, 0.0 }
0x1e07   :  { %v5002_v27 = vsel %vm3747_vm2, 1.0, %v7095_v39 }
0x1e08   :  { %v3811_v1 = vsel %vm365_vm6, %v5002_v27, 0.0  ;;  %v3843_v30 = vmul.f32 %v5002_v27, %v6838_v23 }
0x1e09   :  { %v3665_v56 = vpop.permute.xlu0 %3664  ;;  %3812 = vadd.xlane.f32.xlu1 %v3811_v1 }
0x1e0a   :  { %vm3748_vm9 = vcmp.ge.f32.partialorder %v6838_v23, %v3665_v56  ;;  %v3875_v32 = vsel %vm365_vm6, %v3843_v30, 0.0 }
0x1e0b   :  { %v5003_v28 = vsel %vm3748_vm9, 1.0, %v7095_v39 }
0x1e0c   :  { %v3814_v33 = vsel %vm365_vm6, %v5003_v28, 0.0  ;;  %v3844_v43 = vmul.f32 %v5003_v28, %v6838_v23  ;;  %v3890_v23 = vsel %vm365_vm6, %v3848_v15, 0.0 }
0x1e0d   :  { %v3672_v9 = vpop.permute.xlu0 %3671  ;;  %3815 = vadd.xlane.f32.xlu0 %v3814_v33 }
0x1e0e   :  { %vm3749_vm2 = vcmp.ge.f32.partialorder %v6845_v2, %v3672_v9  ;;  %v3878_v11 = vsel %vm365_vm6, %v3844_v43, 0.0 }
0x1e0f   :  { %v5004_v49 = vsel %vm3749_vm2, 1.0, %v7095_v39 }
0x1e10   :  { %v3817_v59 = vsel %vm365_vm6, %v5004_v49, 0.0  ;;  %v3845_v16 = vmul.f32 %v5004_v49, %v6845_v2  ;;  %v3905_v2 = vpop.permute.xlu1 %3904 }
0x1e11   :  { %v3683_v46 = vpop.permute.xlu0 %3682  ;;  %3821 = vadd.xlane.f32.xlu0 %v3820_v54  ;;  %3818 = vadd.xlane.f32.xlu1 %v3817_v59 }
0x1e12   :  { %vm3751_vm9 = vcmp.ge.f32.partialorder %v6852_v14, %v3683_v46  ;;  %v3881_v35 = vsel %vm365_vm6, %v3845_v16, 0.0 }
0x1e13   :  { %v5006_v42 = vsel %vm3751_vm9, 1.0, %v7095_v39 }
0x1e14   :  { %v3823_v25 = vsel %vm365_vm6, %v5006_v42, 0.0  ;;  %v3847_v58 = vmul.f32 %v5006_v42, %v6852_v14  ;;  %v3916_v1 = vpop.permute.xlu1 %3915 }
0x1e15   :  { %v3694_v24 = vpop.permute.xlu0 %3693  ;;  %3827 = vadd.xlane.f32.xlu0 %v3826_v63  ;;  %3824 = vadd.xlane.f32.xlu1 %v3823_v25 }
0x1e16   :  { %vm3753_vm2 = vcmp.ge.f32.partialorder %v3730_v52, %v3694_v24  ;;  %v3887_v5 = vsel %vm365_vm6, %v3847_v58, 0.0 }
0x1e17   :  { %v5008_v26 = vsel %vm3753_vm2, 1.0, %v7095_v39 }
0x1e18   :  { %v3829_v4 = vsel %vm365_vm6, %v5008_v26, 0.0  ;;  %v3849_v48 = vmul.f32 %v5008_v26, %v3730_v52  ;;  %v3920_v56 = vpop.permute.xlu1 %3919 }
0x1e19   :  { %3833 = vadd.xlane.f32.xlu0 %v3832_v62  ;;  %3830 = vadd.xlane.f32.xlu1 %v3829_v4  ;;  %v3909_v41 = vpop.permute.xlu0 %3908 }
0x1e1a   :  { %v3893_v27 = vsel %vm365_vm6, %v3849_v48, 0.0 }
0x1e1c   :  { %v3931_v14 = vpop.permute.xlu1 %3930 }
0x1e1d   :  { %3855 = vadd.xlane.f32.xlu0 %v3854_v40  ;;  %3852 = vadd.xlane.f32.xlu1 %v3851_v8  ;;  %v6911_v7 = vpop.permute.xlu0 %3926 }
0x1e20   :  { %v6917_v33 = vpop.permute.xlu1 %3941 }
0x1e21   :  { %3861 = vadd.xlane.f32.xlu0 %v3860_v12  ;;  %3858 = vadd.xlane.f32.xlu1 %v3857_v13  ;;  %v6913_v28 = vpop.permute.xlu0 %3937 }
0x1e24   :  { %v6921_v9 = vpop.permute.xlu1 %3952 }
0x1e25   :  { %3867 = vadd.xlane.f32.xlu0 %v3866_v36  ;;  %3864 = vadd.xlane.f32.xlu1 %v3863_v34  ;;  %v6915_v18 = vpop.permute.xlu0 %3948 }
0x1e29   :  { %3873 = vadd.xlane.f32.xlu0 %v3872_v51  ;;  %3870 = vadd.xlane.f32.xlu1 %v3869_v60  ;;  %v6919_v0 = vpop.permute.xlu0 %3959 }
0x1e2d   :  { %3879 = vadd.xlane.f32.xlu0 %v3878_v11  ;;  %3876 = vadd.xlane.f32.xlu1 %v3875_v32  ;;  %v6923_v57 = vpop.permute.xlu0 %3970 }
0x1e31   :  { %3885 = vadd.xlane.f32.xlu0 %v3884_v29  ;;  %3882 = vadd.xlane.f32.xlu1 %v3881_v35 }
0x1e35   :  { %3891 = vadd.xlane.f32.xlu0 %v3890_v23  ;;  %3888 = vadd.xlane.f32.xlu1 %v3887_v5 }
0x1e39   :  { %3897 = vadd.xlane.f32.xlu0 %v3896_v3  ;;  %3894 = vadd.xlane.f32.xlu1 %v3893_v27 }
0x1e4a   :  { %3985 = vbcast.lane.b32.xlu1 %v6762_v50, 264 }
0x1e4f   :  { %3981 = vbcast.lane.b32.xlu0 %v6762_v50, 256  ;;  %v6925_v50 = vpop.permute.xlu1 %3963 }
0x1e53   :  { %v6927_v54 = vpop.permute.xlu1 %3974 }
0x1e7a   :  { %v3789_v49 = vpop.xlane.xlu0 %3788 }
0x1e7b   :  { %5430 = vrcp.f32 %v3789_v49  ;;  %v4003_v19 = vmul.f32 %v3905_v2, %v3789_v49 }
0x1e7d   :  { %v4019_v31 = vadd.f32 1.0, %v4003_v19 }
0x1e7e   :  { %v3792_v59 = vpop.xlane.xlu1 %3791 }
0x1e7f   :  { %5432 = vrcp.f32 %v3792_v59  ;;  %v4004_v40 = vmul.f32 %v3909_v41, %v3792_v59 }
0x1e81   :  { %v4020_v36 = vadd.f32 1.0, %v4004_v40 }
0x1e82   :  { %v3795_v52 = vpop.xlane.xlu0 %3794 }
0x1e83   :  { %v4005_v30 = vmul.f32 %v3916_v1, %v3795_v52 }
0x1e85   :  { %v5431_v53 = vpop.eup %5430  ;;  %v4021_v48 = vadd.f32 1.0, %v4005_v30 }
0x1e86   :  { %v3798_v38 = vpop.xlane.xlu0 %3797 }
0x1e87   :  { %5434 = vrcp.f32 %v3798_v38  ;;  %v4006_v34 = vmul.f32 %v3920_v56, %v3798_v38 }
0x1e88   :  { %5436 = vrcp.f32 %v3795_v52 }
0x1e89   :  { %v5433_v44 = vpop.eup %5432  ;;  %v4022_v58 = vadd.f32 1.0, %v4006_v34 }
0x1e8a   :  { %v3801_v46 = vpop.xlane.xlu1 %3800  ;;  %v3804_v42 = vpop.xlane.xlu0 %3803 }
0x1e8b   :  { %5438 = vrcp.f32 %v3804_v42  ;;  %v4008_v29 = vmul.f32 %v3931_v14, %v3804_v42  ;;  %v4007_v23 = vmul.f32 %v6911_v7, %v3801_v46 }
0x1e8c   :  { %5440 = vrcp.f32 %v3801_v46 }
0x1e8d   :  { %v4024_v14 = vadd.f32 1.0, %v4008_v29  ;;  %v4023_v38 = vadd.f32 1.0, %v4007_v23 }
0x1e8e   :  { %v6929_v63 = vpop.xlane.xlu1 %3806 }
0x1e8f   :  { %v4009_v46 = vmul.f32 %v6913_v28, %v6929_v63 }
0x1e91   :  { %v5435_v15 = vpop.eup %5434 }
0x1e92   :  { %v3810_v25 = vpop.xlane.xlu0 %3809  ;;  %v5437_v21 = vpop.eup %5436 }
0x1e93   :  { %5442 = vrcp.f32 %v3810_v25  ;;  %v4010_v49 = vmul.f32 %v6917_v33, %v3810_v25 }
0x1e94   :  { %5444 = vrcp.f32 %v6929_v63 }
0x1e95   :  { %v5439_v56 = vpop.eup %5438 }
0x1e96   :  { %v6931_v45 = vpop.xlane.xlu1 %3812  ;;  %v5441_v7 = vpop.eup %5440 }
0x1e9a   :  { %v6933_v24 = vpop.xlane.xlu0 %3815 }
0x1e9b   :  { %5446 = vrcp.f32 %v6933_v24 }
0x1e9c   :  { %5448 = vrcp.f32 %v6931_v45 }
0x1e9d   :  { %v5443_v25 = vpop.eup %5442 }
0x1e9e   :  { %v6935_v26 = vpop.xlane.xlu0 %3821  ;;  %v6937_v17 = vpop.xlane.xlu1 %3818 }
0x1e9f   :  { %5450 = vrcp.f32 %v6935_v26  ;;  %v5445_v63 = vpop.eup %5444 }
0x1ea0   :  { %5452 = vrcp.f32 %v6937_v17 }
0x1ea2   :  { %v6939_v37 = vpop.xlane.xlu0 %3827  ;;  %v6941_v62 = vpop.xlane.xlu1 %3824 }
0x1ea3   :  { %5454 = vrcp.f32 %v6939_v37 }
0x1ea4   :  { %5456 = vrcp.f32 %v6941_v62 }
0x1ea6   :  { %v6943_v4 = vpop.xlane.xlu0 %3833  ;;  %v6945_v47 = vpop.xlane.xlu1 %3830 }
0x1ea7   :  { %5458 = vrcp.f32 %v6943_v4 }
0x1ea8   :  { %5460 = vrcp.f32 %v6945_v47 }
0x1eaa   :  { %v3856_v8 = vpop.xlane.xlu0 %3855  ;;  %v3853_v61 = vpop.xlane.xlu1 %3852 }
0x1eab   :  { %v5011_v12 = vadd.f32 -1.0, %v3856_v8  ;;  %v5010_v13 = vadd.f32 -1.0, %v3853_v61  ;;  %vm4036_vm4 = vcmp.gt.f32.partialorder %v4020_v36, %v3856_v8  ;;  %vm4035_vm3 = vcmp.gt.f32.partialorder %v4019_v31, %v3853_v61 }
0x1eac   :  { %v4011_v31 = vmul.f32 %v6915_v18, %v6931_v45 }
0x1ead   :  { %v4070_v43 = vmul.f32 %v5433_v44, %v5011_v12  ;;  %v4068_v51 = vmul.f32 %v5431_v53, %v5010_v13  ;;  %v4026_v53 = vadd.f32 1.0, %v4010_v49  ;;  %v4012_v12 = vmul.f32 %v6921_v9, %v6933_v24  ;;  %v5447_v24 = vpop.eup %5446 }
0x1eae   :  { %v3862_v60 = vpop.xlane.xlu0 %3861  ;;  %v3859_v20 = vpop.xlane.xlu1 %3858  ;;  %v4025_v44 = vadd.f32 1.0, %v4009_v46 }
0x1eaf   :  { %v4100_v16 = vsel %vm4036_vm4, %v4070_v43, -inf  ;;  %v4099_v11 = vsel %vm4035_vm3, %v4068_v51, -inf  ;;  %v5013_v32 = vadd.f32 -1.0, %v3862_v60  ;;  %v5012_v35 = vadd.f32 -1.0, %v3859_v20  ;;  %v5449_v45 = vpop.eup %5448 }
0x1eb0   :  { %4135 = vperm.xlu1 %5284, %v4100_v16   ;;  %4132 = vperm.xlu0 %5285, %v4099_v11   ;;  %vm4038_vm9 = vcmp.gt.f32.partialorder %v4022_v58, %v3862_v60  ;;  %vm4037_vm2 = vcmp.gt.f32.partialorder %v4021_v48, %v3859_v20  ;;  %v4028_v60 = vadd.f32 1.0, %v4012_v12  ;;  %v4014_v20 = vmul.f32 %v6925_v50, %v6935_v26  ;;  %v5451_v23 = vpop.eup %5450 }
0x1eb1   :  { %v4074_v5 = vmul.f32 %v5435_v15, %v5013_v32  ;;  %v4072_v3 = vmul.f32 %v5437_v21, %v5012_v35  ;;  %v4027_v11 = vadd.f32 1.0, %v4011_v31  ;;  %v4013_v32 = vmul.f32 %v6919_v0, %v6937_v17 }
0x1eb2   :  { %v3868_v27 = vpop.xlane.xlu0 %3867  ;;  %v3865_v2 = vpop.xlane.xlu1 %3864  ;;  %v4016_v50 = vmul.f32 %v6927_v54, %v6939_v37  ;;  %v4015_v0 = vmul.f32 %v6923_v57, %v6941_v62 }
0x1eb3   :  { %v4102_v41 = vsel %vm4038_vm9, %v4074_v5, -inf  ;;  %v5015_v1 = vadd.f32 -1.0, %v3868_v27  ;;  %v4101_v52 = vsel %vm4037_vm2, %v4072_v3, -inf  ;;  %v5014_v59 = vadd.f32 -1.0, %v3865_v2 }
0x1eb4   :  { %4141 = vperm.xlu1 %5284, %v4102_v41   ;;  %4138 = vperm.xlu0 %5285, %v4101_v52   ;;  %vm4040_vm4 = vcmp.gt.f32.partialorder %v4024_v14, %v3868_v27  ;;  %vm4039_vm3 = vcmp.gt.f32.partialorder %v4023_v38, %v3865_v2  ;;  %v4030_v5 = vadd.f32 1.0, %v4014_v20  ;;  %v5453_v27 = vpop.eup %5452  ;;  %v4029_v2 = vadd.f32 1.0, %v4013_v32 }
0x1eb5   :  { %v4078_v42 = vmul.f32 %v5439_v56, %v5015_v1  ;;  %v4076_v19 = vmul.f32 %v5441_v7, %v5014_v59  ;;  %v5455_v37 = vpop.eup %5454  ;;  %v4032_v49 = vadd.f32 1.0, %v4016_v50  ;;  %v4031_v57 = vadd.f32 1.0, %v4015_v0 }
0x1eb6   :  { %v3874_v40 = vpop.xlane.xlu0 %3873  ;;  %v3871_v8 = vpop.xlane.xlu1 %3870 }
0x1eb7   :  { %v4104_v61 = vsel %vm4040_vm4, %v4078_v42, -inf  ;;  %v5017_v33 = vadd.f32 -1.0, %v3874_v40  ;;  %v4103_v13 = vsel %vm4039_vm3, %v4076_v19, -inf  ;;  %v5016_v28 = vadd.f32 -1.0, %v3871_v8  ;;  %v5457_v7 = vpop.eup %5456 }
0x1eb8   :  { %4147 = vperm.xlu1 %5284, %v4104_v61   ;;  %4144 = vperm.xlu0 %5285, %v4103_v13   ;;  %vm4042_vm9 = vcmp.gt.f32.partialorder %v4026_v53, %v3874_v40  ;;  %vm4041_vm2 = vcmp.gt.f32.partialorder %v4025_v44, %v3871_v8  ;;  %v5459_v13 = vpop.eup %5458 }
0x1eb9   :  { %v4082_v36 = vmul.f32 %v5443_v25, %v5017_v33  ;;  %v4080_v34 = vmul.f32 %v5445_v63, %v5016_v28  ;;  %v5461_v28 = vpop.eup %5460 }
0x1eba   :  { %v3880_v30 = vpop.xlane.xlu0 %3879  ;;  %v3877_v43 = vpop.xlane.xlu1 %3876 }
0x1ebb   :  { %v4106_v51 = vsel %vm4042_vm9, %v4082_v36, -inf  ;;  %v5019_v9 = vadd.f32 -1.0, %v3880_v30  ;;  %v4105_v16 = vsel %vm4041_vm2, %v4080_v34, -inf  ;;  %v5018_v18 = vadd.f32 -1.0, %v3877_v43 }
0x1ebc   :  { %4153 = vperm.xlu1 %5284, %v4106_v51   ;;  %4150 = vperm.xlu0 %5285, %v4105_v16   ;;  %vm4044_vm4 = vcmp.gt.f32.partialorder %v4028_v60, %v3880_v30  ;;  %vm4043_vm3 = vcmp.gt.f32.partialorder %v4027_v11, %v3877_v43 }
0x1ebd   :  { %v4086_v15 = vmul.f32 %v5447_v24, %v5019_v9  ;;  %v4084_v58 = vmul.f32 %v5449_v45, %v5018_v18 }
0x1ebe   :  { %v3886_v29 = vpop.xlane.xlu0 %3885  ;;  %v3883_v35 = vpop.xlane.xlu1 %3882 }
0x1ebf   :  { %v4108_v21 = vsel %vm4044_vm4, %v4086_v15, -inf  ;;  %v5021_v48 = vadd.f32 -1.0, %v3886_v29  ;;  %v4107_v26 = vsel %vm4043_vm3, %v4084_v58, -inf  ;;  %v5020_v3 = vadd.f32 -1.0, %v3883_v35 }
0x1ec0   :  { %4159 = vperm.xlu1 %5284, %v4108_v21   ;;  %4156 = vperm.xlu0 %5285, %v4107_v26   ;;  %vm4046_vm9 = vcmp.gt.f32.partialorder %v4030_v5, %v3886_v29  ;;  %vm4045_vm2 = vcmp.gt.f32.partialorder %v4029_v2, %v3883_v35 }
0x1ec1   :  { %v4090_v17 = vmul.f32 %v5451_v23, %v5021_v48  ;;  %v4088_v41 = vmul.f32 %v5453_v27, %v5020_v3 }
0x1ec2   :  { %v3892_v1 = vpop.xlane.xlu0 %3891  ;;  %v3889_v56 = vpop.xlane.xlu1 %3888 }
0x1ec3   :  { %v4110_v14 = vsel %vm4046_vm9, %v4090_v17, -inf  ;;  %v5023_v54 = vadd.f32 -1.0, %v3892_v1  ;;  %v4109_v52 = vsel %vm4045_vm2, %v4088_v41, -inf  ;;  %v5022_v59 = vadd.f32 -1.0, %v3889_v56 }
0x1ec4   :  { %4165 = vperm.xlu1 %5284, %v4110_v14   ;;  %4162 = vperm.xlu0 %5285, %v4109_v52   ;;  %vm4048_vm4 = vcmp.gt.f32.partialorder %v4032_v49, %v3892_v1  ;;  %vm4047_vm3 = vcmp.gt.f32.partialorder %v4031_v57, %v3889_v56 }
0x1ec5   :  { %v4094_v62 = vmul.f32 %v5455_v37, %v5023_v54  ;;  %v4092_v38 = vmul.f32 %v5457_v7, %v5022_v59 }
0x1ec6   :  { %v3898_v46 = vpop.xlane.xlu0 %3897  ;;  %v3895_v42 = vpop.xlane.xlu1 %3894 }
0x1ec7   :  { %v4112_v19 = vsel %vm4048_vm4, %v4094_v62, -inf  ;;  %v4111_v40 = vsel %vm4047_vm3, %v4092_v38, -inf  ;;  %v5025_v8 = vadd.f32 -1.0, %v3898_v46  ;;  %v5024_v61 = vadd.f32 -1.0, %v3895_v42 }
0x1ec8   :  { %4171 = vperm.xlu1 %5284, %v4112_v19   ;;  %4168 = vperm.xlu0 %5285, %v4111_v40  }
0x1ec9   :  { %v4098_v31 = vmul.f32 %v5459_v13, %v5025_v8  ;;  %v4096_v36 = vmul.f32 %v5461_v28, %v5024_v61 }
0x1eca   :  { %v3982_v33 = vpop.permute.xlu0 %3981  ;;  %v3986_v25 = vpop.permute.xlu1 %3985 }
0x1ecb   :  { %v4017_v53 = vmul.f32 %v3982_v33, %v6945_v47  ;;  %v4018_v12 = vmul.f32 %v3986_v25, %v6943_v4 }
0x1ecd   :  { %v4033_v63 = vadd.f32 1.0, %v4017_v53  ;;  %v4034_v44 = vadd.f32 1.0, %v4018_v12 }
0x1ecf   :  { %vm4049_vm9 = vcmp.gt.f32.partialorder %v4033_v63, %v3895_v42  ;;  %vm4050_vm2 = vcmp.gt.f32.partialorder %v4034_v44, %v3898_v46 }
0x1ed0   :  { %v4113_v34 = vsel %vm4049_vm9, %v4096_v36, -inf  ;;  %v4114_v30 = vsel %vm4050_vm2, %v4098_v31, -inf }
0x1ed1   :  { %4174 = vperm.xlu0 %5285, %v4113_v34   ;;  %4177 = vperm.xlu1 %5284, %v4114_v30  }
0x1f2f   :  { %v4133_v43 = vpop.permute.xlu0 %4132  ;;  %v4136_v51 = vpop.permute.xlu1 %4135 }
0x1f30   :  { %v4182_v35 = vrot.slane %v4133_v43, %v6334_v55  ;;  %v4186_v21 = vrot.slane %v4136_v51, %v6337_v6 }
0x1f32   :  { %v4187_v56 = vsel %vm1657_vm5, %v4186_v21, %v4182_v35 }
0x1f33   :  { %v4142_v9 = vpop.permute.xlu1 %4141  ;;  %v4139_v24 = vpop.permute.xlu0 %4138 }
0x1f34   :  { %v4191_v32 = vrot.slane %v4139_v24, %v6334_v55  ;;  %v4195_v15 = vrot.slane %v4142_v9, %v6337_v6 }
0x1f36   :  { %v4196_v27 = vsel %vm1657_vm5, %v4195_v15, %v4191_v32 }
0x1f37   :  { %v4148_v60 = vpop.permute.xlu1 %4147  ;;  %v4145_v47 = vpop.permute.xlu0 %4144  ;;  %v4251_v54 = vsel %vm1722_vm10, %v4196_v27, %v4187_v56 }
0x1f38   :  { %v4200_v58 = vrot.slane %v4145_v47, %v6334_v55  ;;  %v4204_v29 = vrot.slane %v4148_v60, %v6337_v6 }
0x1f3a   :  { %v4205_v17 = vsel %vm1657_vm5, %v4204_v29, %v4200_v58  ;;  %v5503_v58 = vld [vmem:[#allocation7] ss:$0 sm:$0xff] }
0x1f3b   :  { %v4154_v20 = vpop.permute.xlu1 %4153  ;;  %v4151_v4 = vpop.permute.xlu0 %4150  ;;  %v4252_v49 = vsel %vm1724_vm11, %v4205_v17, %v4251_v54 }
0x1f3c   :  { %v4209_v48 = vrot.slane %v4151_v4, %v6334_v55  ;;  %v4213_v23 = vrot.slane %v4154_v20, %v6337_v6 }
0x1f3e   :  { %v4214_v14 = vsel %vm1657_vm5, %v4213_v23, %v4209_v48 }
0x1f3f   :  { %v4160_v16 = vpop.permute.xlu1 %4159  ;;  %v4157_v18 = vpop.permute.xlu0 %4156  ;;  %v4253_v59 = vsel %vm1726_vm12, %v4214_v14, %v4252_v49 }
0x1f40   :  { %v4218_v26 = vrot.slane %v4157_v18, %v6334_v55  ;;  %v4222_v3 = vrot.slane %v4160_v16, %v6337_v6 }
0x1f42   :  { %v4223_v37 = vsel %vm1657_vm5, %v4222_v3, %v4218_v26 }
0x1f43   :  { %v4166_v45 = vpop.permute.xlu1 %4165  ;;  %v4163_v11 = vpop.permute.xlu0 %4162  ;;  %v4254_v38 = vsel %vm1728_vm13, %v4223_v37, %v4253_v59 }
0x1f44   :  { %v4227_v2 = vrot.slane %v4163_v11, %v6334_v55  ;;  %v4231_v0 = vrot.slane %v4166_v45, %v6337_v6  ;;  %v5502_v45 = vld [vmem:[#allocation5] ss:$0 sm:$0xff] }
0x1f46   :  { %v4232_v52 = vsel %vm1657_vm5, %v4231_v0, %v4227_v2 }
0x1f47   :  { %v4169_v5 = vpop.permute.xlu0 %4168  ;;  %v4172_v50 = vpop.permute.xlu1 %4171  ;;  %v4255_v19 = vsel %vm1730_vm14, %v4232_v52, %v4254_v38 }
0x1f48   :  { %v4236_v41 = vrot.slane %v4169_v5, %v6334_v55  ;;  %v4240_v1 = vrot.slane %v4172_v50, %v6337_v6 }
0x1f4a   :  { %v4241_v7 = vsel %vm1657_vm5, %v4240_v1, %v4236_v41 }
0x1f4b   :  { %v4256_v8 = vsel %vm1732_vm15, %v4241_v7, %v4255_v19  ;;  %v5504_v19 = vld [vmem:[#allocation8] ss:$0 sm:$0xff] }
0x1f50   :  { %v4175_v57 = vpop.permute.xlu0 %4174  ;;  %v4178_v62 = vpop.permute.xlu1 %4177 }
0x1f51   :  { %v4245_v46 = vrot.slane %v4175_v57, %v6334_v55  ;;  %v4249_v42 = vrot.slane %v4178_v62, %v6337_v6 }
0x1f53   :  { %v4250_v40 = vsel %vm1657_vm5, %v4249_v42, %v4245_v46 }
0x1f54   :  { %v4257_v61 = vsel %vm1734_vm1, %v4250_v40, %v4256_v8 }
0x1f55   :  { %v4259_v33 = vsel %vm365_vm6, %v4257_v61, -inf }
0x1f56   :  { %4260 = vmax.xlane.f32.xlu0 %v4259_v33  ;;  %v5505_v33 = vld [vmem:[#allocation10] ss:$0 sm:$0xff] }
0x1fe3   :  { %v4261_v25 = vpop.xlane.xlu0 %4260 }
0x1fe4   :  { %v4262_v53 = vsub.f32 %v6748_v10, %v4261_v25 }
0x1fe6   :  { %v4263_v12 = vmax.f32 %v4262_v53, 0.0 }
0x1fe8   :  { %4265 = vst.msk [vmem:[#allocation14 + $0x10] sm:$0xff] %vm365_vm6, %v4263_v12  ;;  %5184 = vmatmul.mubr.msk.f32.vlgmr.msra.gmra.mrb[16].mxu1 %vm365_vm6, %v4263_v12 }
0x1fe9   :  { %5193 = vmatprep.mubr.msk.f32.mxu1 %vm5744_vm0, %v7095_v39 }
0x20bb   :  { %v4335_v55 = vpop.f32.mrb[16].mxu1 }
0x20bc   :  { %v4339_v6 = vsel %vm365_vm6, %v4335_v55, 0.0  ;;  %v5185_v13 = vpop.f32.mrb[17].mxu1 }
0x20bd   :  { %v4340_v28 = vrot.slane %v4339_v6, 4 }
0x20bf   :  { %v4341_v63 = vadd.f32 %v4340_v28, %v4339_v6  ;;  %v427_v6 = vld [vmem:[%s7106_s8] sm:$0xff] }
0x20c0   :  { %5192 = vmatpush3.msra.mxu1 %v427_v6 }
0x20c1   :  { %v4342_v44 = vrot.slane %v4341_v63, 2  ;;  %5201 = vmatprep.subr.mxu1 %v7095_v39 }
0x20c3   :  { %v4343_v31 = vadd.f32 %v4342_v44, %v4341_v63 }
0x20c5   :  { %v4344_v36 = vrot.slane %v4343_v31, 1 }
0x20c7   :  { %v4345_v34 = vadd.f32 %v4344_v36, %v4343_v31  ;;  %v430_v36 = vld [vmem:[%s7107_s29] sm:$0xff] }
0x20c9   :  { %v4346_v30 = vmul.f32 0.125, %v4345_v34 }
0x20cb   :  { %v4347_v10 = vsub.f32 %v4335_v55, %v4346_v30 }
0x20cd   :  { %v4348_v43 = vmul.f32 %v4347_v10, %v4347_v10  ;;  %v4357_v11 = vmul.f32 %v5502_v45, %v4347_v10 }
0x20cf   :  { %v4349_v51 = vsel %vm365_vm6, %v4348_v43, 0.0 }
0x20d0   :  { %v4350_v9 = vrot.slane %v4349_v51, 4 }
0x20d2   :  { %v4351_v24 = vadd.f32 %v4350_v9, %v4349_v51 }
0x20d4   :  { %v4352_v60 = vrot.slane %v4351_v24, 2 }
0x20d6   :  { %v4353_v47 = vadd.f32 %v4352_v60, %v4351_v24 }
0x20d8   :  { %v4354_v20 = vrot.slane %v4353_v47, 1 }
0x20da   :  { %v4355_v4 = vadd.f32 %v4354_v20, %v4353_v47 }
0x20dc   :  { %v4356_v16 = vmul.f32 0.125, %v4355_v4 }
0x20de   :  { %v4358_v18 = vadd.f32 1e-05, %v4356_v16 }
0x20e0   :  { %5462 = vrsqrt.f32 %v4358_v18 }
0x20ea   :  { %v5463_v32 = vpop.eup %5462 }
0x20eb   :  { %v4360_v15 = vmul.f32 %v5463_v32, %v4357_v11 }
0x20ed   :  { %v4361_v29 = vadd.f32 %v5503_v58, %v4360_v15 }
0x20ef   :  { %v5027_v35 = vmul.f32 -1.442695, %v4361_v29 }
0x20f1   :  { %5464 = vpow2.f32 %v5027_v35 }
0x20fb   :  { %v5465_v21 = vpop.eup %5464 }
0x20fc   :  { %v4365_v48 = vadd.f32 1.0, %v5465_v21  ;;  %v5031_v21 = vld [vmem:[%s7108_s1] ss:$0 sm:$0xff] }
0x20fe   :  { %5466 = vrcp.f32 %v4365_v48 }
0x2108   :  { %v5467_v23 = vpop.eup %5466 }
0x2109   :  { %4369 = vrot.lane.b32.xlu1 %v5467_v23, %s5745_s5 }
0x217b   :  { %v4370_v5 = vpop.permute.xlu1 %4369 }
0x217c   :  { %v4372_v50 = vmul.f32 %v4370_v5, %v4361_v29  ;;  %v5032_v5 = vld [vmem:[%s7109_s2] ss:$0 sm:$0xff] }
0x217e   :  { %5189 = vmatmul.mubr.msk.f32.vlgmr.msra.gmra.mrb[16].mxu0 %vm555_vm7, %v4372_v50 }
0x217f   :  { %5198 = vmatprep.mubr.msk.f32.mxu0 %vm5744_vm0, %v7095_v39  ;;  %5197 = vmatpush3.msra.mxu0 %v430_v36 }
0x2251   :  { %v4442_v26 = vpop.f32.mrb[16].mxu0 }
0x2252   :  { %v4446_v3 = vsel %vm365_vm6, %v4442_v26, 0.0  ;;  %v5190_v27 = vpop.f32.mrb[17].mxu0 }
0x2253   :  { %v4447_v2 = vrot.slane %v4446_v3, 4 }
0x2255   :  { %v4448_v0 = vadd.f32 %v4447_v2, %v4446_v3 }
0x2257   :  { %v4449_v17 = vrot.slane %v4448_v0, 2 }
0x2259   :  { %v4450_v41 = vadd.f32 %v4449_v17, %v4448_v0 }
0x225b   :  { %v4451_v1 = vrot.slane %v4450_v41, 1 }
0x225d   :  { %v4452_v56 = vadd.f32 %v4451_v1, %v4450_v41 }
0x225f   :  { %v4453_v14 = vmul.f32 0.125, %v4452_v56 }
0x2261   :  { %v4454_v54 = vsub.f32 %v4442_v26, %v4453_v14 }
0x2263   :  { %v4455_v37 = vmul.f32 %v4454_v54, %v4454_v54  ;;  %v4464_v40 = vmul.f32 %v5504_v19, %v4454_v54 }
0x2265   :  { %v4456_v49 = vsel %vm365_vm6, %v4455_v37, 0.0 }
0x2266   :  { %v4457_v52 = vrot.slane %v4456_v49, 4 }
0x2268   :  { %v4458_v59 = vadd.f32 %v4457_v52, %v4456_v49 }
0x226a   :  { %v4459_v7 = vrot.slane %v4458_v59, 2 }
0x226c   :  { %v4460_v57 = vadd.f32 %v4459_v7, %v4458_v59 }
0x226e   :  { %v4461_v62 = vrot.slane %v4460_v57, 1 }
0x2270   :  { %v4462_v38 = vadd.f32 %v4461_v62, %v4460_v57 }
0x2272   :  { %v4463_v46 = vmul.f32 0.125, %v4462_v38 }
0x2274   :  { %v4465_v42 = vadd.f32 1e-05, %v4463_v46 }
0x2276   :  { %5468 = vrsqrt.f32 %v4465_v42 }
0x2280   :  { %v5469_v8 = vpop.eup %5468 }
0x2281   :  { %v4467_v61 = vmul.f32 %v5469_v8, %v4464_v40 }
0x2283   :  { %v4468_v25 = vadd.f32 %v5505_v33, %v4467_v61 }
0x2285   :  { %v5029_v53 = vmul.f32 -1.442695, %v4468_v25 }
0x2287   :  { %5470 = vpow2.f32 %v5029_v53 }
0x2291   :  { %v5471_v12 = vpop.eup %5470 }
0x2292   :  { %v4472_v55 = vadd.f32 1.0, %v5471_v12  ;;  %v5035_v12 = vld [vmem:[%s7110_s3] ss:$0 sm:$0xff] }
0x2294   :  { %5472 = vrcp.f32 %v4472_v55 }
0x229e   :  { %v5473_v13 = vpop.eup %5472 }
0x229f   :  { %4476 = vrot.lane.b32.xlu1 %v5473_v13, %s5745_s5  ;;  %v5036_v13 = vld [vmem:[%s7111_s7] ss:$0 sm:$0xff] }
0x2311   :  { %v4477_v28 = vpop.permute.xlu1 %4476 }
0x2312   :  { %v4479_v63 = vmul.f32 %v4477_v28, %v4468_v25 }
0x2314   :  { %v4480_v44 = vadd.f32 %v4479_v63, %v4372_v50 }
0x2316   :  { %v4481_v31 = vmul.f32 0.70710677, %v4480_v44 }
0x2318   :  { %5194 = vmatmul.mubr.msk.f32.vlgmr.msra.gmra.mrb[18].mxu1 %vm555_vm7, %v4481_v31 }
0x2319   :  { %5203 = vmatprep.mubr.msk.f32.mxu1 %vm5744_vm0, %v7095_v39  ;;  %vm7112_vm0 = vcmask 31744  }
0x23eb   :  { %v4551_v34 = vpop.f32.mrb[18].mxu1 }
0x23ec   :  { %v4555_v30 = vsel %vm365_vm6, %v4551_v34, 0.0  ;;  %v5195_v10 = vpop.f32.mrb[19].mxu1 }
0x23ed   :  { %v4556_v43 = vrot.slane %v4555_v30, 4 }
0x23ef   :  { %v4557_v51 = vadd.f32 %v4556_v43, %v4555_v30 }
0x23f1   :  { %v4558_v9 = vrot.slane %v4557_v51, 2 }
0x23f3   :  { %v4559_v24 = vadd.f32 %v4558_v9, %v4557_v51 }
0x23f5   :  { %v4560_v60 = vrot.slane %v4559_v24, 1 }
0x23f7   :  { %v4561_v47 = vadd.f32 %v4560_v60, %v4559_v24 }
0x23f9   :  { %v4562_v20 = vmul.f32 0.125, %v4561_v47 }
0x23fb   :  { %v4563_v4 = vsub.f32 %v4551_v34, %v4562_v20  ;;  %v4724_v34 = vld [vmem:[%s5949_s12] sm:$0xf]  ;;  %s5660_s12 = scalar_lea.vmem %s4820_s9, 384 }
0x23fc   :  { %5202 = vmatpush3.msk.msra.mxu1 %vm921_vm8, %v4724_v34  ;;  %p5661_p0 = scmp.ne.s32.totalorder %s4820_s9, %s5660_s12  ;;  %p5666_p2 = scmp.lt.s32.totalorder %s5660_s12, %s5660_s12 }
0x23fd   :  { %v4564_v16 = vmul.f32 %v4563_v4, %v4563_v4  ;;  %v4579_v48 = vmul.f32 %v5031_v21, %v4563_v4 }
0x23fe   :  { %p5667_p3 = por %p5666_p2, %p5665_p1 }
0x23ff   :  { %v4565_v18 = vsel %vm365_vm6, %v4564_v16, 0.0 }
0x2400   :  { %v4566_v39 = vrot.slane %v4565_v18, 4  ;;  %p5668_p4 = pnand %p5667_p3, %p5661_p0 }
0x2402   :  { %v4567_v45 = vadd.f32 %v4566_v39, %v4565_v18 }
0x2404   :  { %v4568_v11 = vrot.slane %v4567_v45, 2 }
0x2406   :  { %v4569_v32 = vadd.f32 %v4568_v11, %v4567_v45 }
0x2408   :  { %v4570_v15 = vrot.slane %v4569_v32, 1 }
0x240a   :  { %v4571_v58 = vadd.f32 %v4570_v15, %v4569_v32 }
0x240c   :  { %v4572_v29 = vmul.f32 0.125, %v4571_v58 }
0x240e   :  { %v4580_v35 = vadd.f32 1e-05, %v4572_v29 }
0x2410   :  { %5474 = vrsqrt.f32 %v4580_v35 }
0x241a   :  { %v5475_v23 = vpop.eup %5474 }
0x241b   :  { %v4582_v50 = vmul.f32 %v5475_v23, %v4579_v48 }
0x241d   :  { %v4589_v26 = vadd.f32 %v5032_v5, %v4582_v50 }
0x241f   :  { %v5033_v3 = vmul.f32 -1.442695, %v4589_v26 }
0x2421   :  { %5476 = vpow2.f32 %v5033_v3 }
0x242b   :  { %v5477_v27 = vpop.eup %5476 }
0x242c   :  { %v4593_v2 = vadd.f32 1.0, %v5477_v27 }
0x242e   :  { %5478 = vrcp.f32 %v4593_v2 }
0x2438   :  { %v5479_v0 = vpop.eup %5478 }
0x2439   :  { %4597 = vrot.lane.b32.xlu1 %v5479_v0, %s5745_s5 }
0x24ab   :  { %v4598_v17 = vpop.permute.xlu1 %4597 }
0x24ac   :  { %v4600_v41 = vmul.f32 %v4598_v17, %v4589_v26 }
0x24ae   :  { %5199 = vmatmul.mubr.msk.f32.vlgmr.msra.gmra.mrb[18].mxu0 %vm555_vm7, %v4600_v41 }
0x2581   :  { %v4670_v1 = vpop.f32.mrb[18].mxu0 }
0x2582   :  { %v4674_v56 = vsel %vm365_vm6, %v4670_v1, 0.0  ;;  %v5200_v14 = vpop.f32.mrb[19].mxu0 }
0x2583   :  { %v4675_v54 = vrot.slane %v4674_v56, 4 }
0x2585   :  { %v4676_v37 = vadd.f32 %v4675_v54, %v4674_v56 }
0x2587   :  { %v4677_v49 = vrot.slane %v4676_v37, 2 }
0x2589   :  { %v4678_v52 = vadd.f32 %v4677_v49, %v4676_v37 }
0x258b   :  { %v4679_v59 = vrot.slane %v4678_v52, 1 }
0x258d   :  { %v4680_v7 = vadd.f32 %v4679_v59, %v4678_v52 }
0x258f   :  { %v4681_v57 = vmul.f32 0.125, %v4680_v7 }
0x2591   :  { %v4682_v62 = vsub.f32 %v4670_v1, %v4681_v57 }
0x2593   :  { %v4683_v38 = vmul.f32 %v4682_v62, %v4682_v62  ;;  %v4698_v55 = vmul.f32 %v5035_v12, %v4682_v62 }
0x2595   :  { %v4684_v46 = vsel %vm365_vm6, %v4683_v38, 0.0 }
0x2596   :  { %v4685_v42 = vrot.slane %v4684_v46, 4 }
0x2598   :  { %v4686_v19 = vadd.f32 %v4685_v42, %v4684_v46 }
0x259a   :  { %v4687_v40 = vrot.slane %v4686_v19, 2 }
0x259c   :  { %v4688_v8 = vadd.f32 %v4687_v40, %v4686_v19 }
0x259e   :  { %v4689_v61 = vrot.slane %v4688_v8, 1 }
0x25a0   :  { %v4690_v33 = vadd.f32 %v4689_v61, %v4688_v8 }
0x25a2   :  { %v4691_v25 = vmul.f32 0.125, %v4690_v33 }
0x25a4   :  { %v4699_v53 = vadd.f32 1e-05, %v4691_v25 }
0x25a6   :  { %5480 = vrsqrt.f32 %v4699_v53 }
0x25b0   :  { %v5481_v6 = vpop.eup %5480 }
0x25b1   :  { %v4701_v28 = vmul.f32 %v5481_v6, %v4698_v55 }
0x25b3   :  { %v4708_v63 = vadd.f32 %v5036_v13, %v4701_v28 }
0x25b5   :  { %v5037_v44 = vmul.f32 -1.442695, %v4708_v63 }
0x25b7   :  { %5482 = vpow2.f32 %v5037_v44 }
0x25c1   :  { %v5483_v31 = vpop.eup %5482 }
0x25c2   :  { %v4712_v36 = vadd.f32 1.0, %v5483_v31 }
0x25c4   :  { %5484 = vrcp.f32 %v4712_v36 }
0x25ce   :  { %v5485_v30 = vpop.eup %5484 }
0x25cf   :  { %4716 = vrot.lane.b32.xlu1 %v5485_v30, %s5745_s5 }
0x2641   :  { %v4717_v10 = vpop.permute.xlu1 %4716 }
0x2642   :  { %v4719_v43 = vmul.f32 %v4717_v10, %v4708_v63 }
0x2644   :  { %v4720_v51 = vadd.f32 %v4719_v43, %v4600_v41 }
0x2646   :  { %v4721_v9 = vmul.f32 0.70710677, %v4720_v51 }
0x2648   :  { %v4722_v24 = vmax.f32 %v4721_v9, 0.0 }
0x264a   :  { %v4723_v60 = vadd.f32 %v4722_v24, %v6738_v22 }
0x264c   :  { %4733 = vrot.lane.b32.xlu1 %v4723_v60, %s5747_s10 }
0x26be   :  { %v4734_v47 = vpop.permute.xlu1 %4733 }
0x26bf   :  { %5204 = vmatmul.mubr.msk.f32.vlgmr.msra.gmra.mrb[20].mxu1 %vm7112_vm0, %v4734_v47 }
0x26c0   :  { %5671 = shalt.err (!%p5668_p4)
}
0x26c1   :  { %s5672_s5 = scalar_lea.hbm %s5964_s4, 384 }
0x26c2   :  { %p5673_p5 = scmp.ne.s32.totalorder %s5964_s4, %s5672_s5  ;;  %p5676_p6 = scmp.lt.u32.totalorder %s5672_s5, %s5964_s4 }
0x26c4   :  { %p5678_p7 = pnand %p5676_p6, %p5673_p5 }
0x26c6   :  { %5681 = shalt.err (!%p5678_p7)
}
0x26c7   :  { %s5749_s13 = smov 128   ;;  %s5750_s17 = smov 8   ;;  %v5038_v22 = vld [vmem:[%s5954_s20] ss:$0 sm:$0xff]  ;;  %vm4810_vm6 = vcmask 23552  }
0x26c8   :  { %4825 = dma.vmem_to_hbm [thread:$0]  %s4820_s9, 384, %s5964_s4, [#allocation4], %s5749_s13, %s5749_s13, %s5750_s17  }
0x2792   :  { %v4806_v20 = vpop.f32.mrb[20].mxu1 }
0x2793   :  { %v4807_v4 = vadd.f32 %v5038_v22, %v4806_v20  ;;  %v5205_v16 = vpop.f32.mrb[21].mxu1 }
0x2795   :  { %4811 = vst.msk [vmem:[%s5959_s27] sm:$0xff] %vm4810_vm6, %v4807_v4 }
0x2796   :  { %5690 = dma.done.wait [#allocation4], 384  }
0x2797   :  { %5691 = vsyncadd [#allocation4], 4294966912 }
0x2798   :  { %4831 = vsyncpa [#allocation3], 1 }
0x2799   :  { %4832 = vsyncpa [#allocation6], 1 }
0x279a   :  { %4833 = vsyncpa [#allocation9], 1 }
0x279b   :  { %4834 = vsyncpa [#allocation12], 1 }
0x279c   :  { %4835 = vsyncpa [#allocation4], 1 }

</bundles_post_ra>
